<compile_context>
chip_gen: v7x
topology: tpu7x:2x2x1
jax: 0.10.0
libtpu: 0.0.40
codegen_flags: <defaults>
</compile_context>

<pallas_src>
import jax
import jax.numpy as jnp
from jax import lax
from jax.experimental import pallas as pl
from jax.experimental.pallas import tpu as pltpu


# 2-D dot_general dimension_numbers (no batch dims):
_NN = (((1,), (0,)), ((), ()))   # A @ B
_NT = (((1,), (1,)), ((), ()))   # A @ B.T (contract last dims; no transpose op)


def _dot(a, b, dims):
    return lax.dot_general(a, b, dims, preferred_element_type=jnp.float32)


def _co_attention_kernel(text_ref, meta_ref,        # (T, H), (M, H)   mxu dtype
                         wtt_ref, bt_ref,           # (H, H) mxu, (1, H) f32
                         wmt_ref, bm_ref,           # (H, H) mxu, (1, H) f32
                         wct_ref, bc_ref,           # (2H, H) mxu, (1, H) f32
                         o_ref,                     # (TILE, H) output tile
                         mlin_scr,                  # (M, H)  mxu  meta_linear(meta)
                         tctx_scr,                  # (T, H)  mxu  normalized text_ctx
                         macc_scr,                  # (M, H)  f32  online meta accumulator
                         cmax_scr, csum_scr,        # (M, 1)  f32  running col max / sum
                         cat_scr):                  # (TILE, 2H) mxu concat buffer
    p = pl.program_id(0)                            # 0: accumulate, 1: finalize
    i = pl.program_id(1)                            # row-tile index
    tile = o_ref.shape[0]
    hid = o_ref.shape[1]
    mxu_dt = mlin_scr.dtype
    r0 = pl.multiple_of(i * tile, tile)

    @pl.when(jnp.logical_and(p == 0, i == 0))
    def _init():
        cmax_scr[...] = jnp.full_like(cmax_scr, -jnp.inf)
        csum_scr[...] = jnp.zeros_like(csum_scr)
        macc_scr[...] = jnp.zeros_like(macc_scr)
        # meta_linear(meta_emb): computed once, cached for every row tile.
        m_lin = _dot(meta_ref[...], wmt_ref[...], _NN) + bm_ref[...]
        mlin_scr[...] = m_lin.astype(mxu_dt)

    @pl.when(p == 0)
    def _accumulate():
        text_tile = text_ref[pl.ds(r0, tile), :]                    # (TILE, H)
        meta_tile = meta_ref[pl.ds(r0, tile), :]                    # (TILE, H)
        t_lin = _dot(text_tile, wtt_ref[...], _NN) + bt_ref[...]    # (TILE, H) f32
        t_lin = t_lin.astype(mxu_dt)
        m_lin = mlin_scr[...]                                       # (M, H)

        # ---- text path: row strip + row softmax (deferred normalization) ----
        strip = _dot(t_lin, m_lin, _NT)                             # (TILE, M) f32
        row_max = jnp.max(strip, axis=1, keepdims=True)
        row_e = jnp.exp(strip - row_max)                            # f32 exp (EUP)
        row_sum = jnp.sum(row_e, axis=1, keepdims=True)
        t_ctx = _dot(row_e.astype(mxu_dt), text_ref[...], _NN)      # (TILE, H) f32
        t_ctx = t_ctx * pl.reciprocal(row_sum, approx=True)
        tctx_scr[pl.ds(r0, tile), :] = t_ctx.astype(mxu_dt)

        # ---- meta path: transposed strip + online column softmax ----
        # strip_t[j, ii] == affinity[r0 + ii, j]; computed as a second NT
        # matmul rather than an XLU transpose of `strip`.
        strip_t = _dot(m_lin, t_lin, _NT)                           # (M, TILE) f32
        tile_max = jnp.max(strip_t, axis=1, keepdims=True)          # (M, 1)
        new_max = jnp.maximum(cmax_scr[...], tile_max)
        alpha = jnp.exp(cmax_scr[...] - new_max)                    # (M, 1)
        p_t = jnp.exp(strip_t - new_max)                            # (M, TILE) f32
        csum_scr[...] = alpha * csum_scr[...] + jnp.sum(p_t, axis=1, keepdims=True)
        macc_scr[...] = alpha * macc_scr[...] + _dot(p_t.astype(mxu_dt), meta_tile, _NN)
        cmax_scr[...] = new_max

        # With the (p * i, 0) out index_map, block 0 is the only live output
        # buffer during pass 0; keep it initialized (pass 1 overwrites it).
        o_ref[...] = jnp.zeros_like(o_ref)

    @pl.when(p == 1)
    def _finalize():
        m_ctx = macc_scr[pl.ds(r0, tile), :] * pl.reciprocal(
            csum_scr[pl.ds(r0, tile), :], approx=True)              # (TILE, H) f32
        cat_scr[:, :hid] = tctx_scr[pl.ds(r0, tile), :]
        cat_scr[:, hid:] = m_ctx.astype(mxu_dt)
        # Single K = 2H concat-linear matmul (fills the 256-deep MXU).
        out = _dot(cat_scr[...], wct_ref[...], _NN) + bc_ref[...]
        o_ref[...] = out.astype(o_ref.dtype)


def co_attention(text_emb, meta_emb, wt, bt, wm, bm, wc, bc,
                 *, tile_t=128, mxu_dtype=jnp.bfloat16):
    """text_emb: (T, H), meta_emb: (M, H) with T == M (module requirement).
    wt/wm: (H, H), bt/bm: (H,), wc: (H, 2H), bc: (H,).  Returns (T, H)."""
    T, H = text_emb.shape
    M, H2 = meta_emb.shape
    if not (T == M and H == H2):
        raise ValueError("Co_attention requires T == M and matching hidden size")
    if H % 128 != 0:
        raise ValueError("hidden_size must be a multiple of 128 (lane-dense)")
    tile_t = min(tile_t, T)
    if T % tile_t != 0 or tile_t % 8 != 0:
        raise ValueError("T must be a multiple of the row tile (tile multiple of 8)")
    n_t = T // tile_t
    f32 = jnp.float32

    # Parameter-side prep (free, one-time): cast MXU operands and pre-transpose
    # weights so the kernel only uses NN / NT contractions.
    text_x = text_emb.astype(mxu_dtype)
    meta_x = meta_emb.astype(mxu_dtype)
    wt_t = wt.T.astype(mxu_dtype)                      # (H, H)
    wm_t = wm.T.astype(mxu_dtype)                      # (H, H)
    wc_t = wc.T.astype(mxu_dtype)                      # (2H, H): one K=2H matmul
    bt2 = bt.reshape(1, H).astype(f32)
    bm2 = bm.reshape(1, H).astype(f32)
    bc2 = bc.reshape(1, H).astype(f32)

    def full(shape):                                   # resident operand
        return pl.BlockSpec(shape, lambda p, i: (0, 0))

    esize = jnp.dtype(mxu_dtype).itemsize
    flops = (2 * T * H * H + 2 * M * H * H             # text / meta linear
             + 2 * (2 * T * M * H)                     # affinity strip + strip^T
             + 2 * T * M * H + 2 * M * T * H           # text_ctx / meta accumulation
             + 2 * T * (2 * H) * H)                    # concat linear (K = 2H)
    bytes_accessed = (esize * ((T + M) * H + 2 * H * H + 2 * H * H)
                      + 4 * 3 * H + 4 * T * H)         # f32 biases + f32 output
    vmem_bytes = (esize * ((T + M) * H + 4 * H * H)            # resident inputs
                  + esize * (M * H + T * H + tile_t * 2 * H)   # low-precision scratch
                  + 4 * (M * H + 2 * M * 128)                  # f32 scratch (lane-padded)
                  + 4 * (3 * tile_t * M)                       # live f32 strips
                  + 4 * 2 * tile_t * H)                        # double-buffered out tile
    vmem_limit = int(max(32 * 1024 * 1024, 2 * vmem_bytes))

    return pl.pallas_call(
        _co_attention_kernel,
        out_shape=jax.ShapeDtypeStruct((T, H), text_emb.dtype),
        grid_spec=pltpu.PrefetchScalarGridSpec(
            num_scalar_prefetch=0,
            grid=(2, n_t),                             # (pass, row tile)
            in_specs=[full((T, H)), full((M, H)),
                      full((H, H)), full((1, H)),
                      full((H, H)), full((1, H)),
                      full((2 * H, H)), full((1, H))],
            # Pass 0 parks on output block 0 (no writeback while the block
            # index is unchanged); pass 1 writes block i -> one HBM writeback
            # per output tile.
            out_specs=pl.BlockSpec((tile_t, H), lambda p, i: (p * i, 0)),
            scratch_shapes=[
                pltpu.VMEM((M, H), mxu_dtype),           # m_lin
                pltpu.VMEM((T, H), mxu_dtype),           # normalized text_ctx
                pltpu.VMEM((M, H), f32),                 # online meta accumulator
                pltpu.VMEM((M, 1), f32),                 # running column max
                pltpu.VMEM((M, 1), f32),                 # running column sum
                pltpu.VMEM((tile_t, 2 * H), mxu_dtype),  # concat buffer (K = 2H)
            ]),
        compiler_params=pltpu.CompilerParams(
            dimension_semantics=("arbitrary", "arbitrary"),
            vmem_limit_bytes=vmem_limit),
        cost_estimate=pl.CostEstimate(
            flops=flops, transcendentals=2 * T * M,
            bytes_accessed=bytes_accessed),
    )(text_x, meta_x, wt_t, bt2, wm_t, bm2, wc_t, bc2)


if __name__ == "__main__":
    key = jax.random.PRNGKey(0)
    keys = jax.random.split(key, 8)

    seq = 256      # text / meta sequence length (module requires equal) -> 2 row tiles
    hidden = 128   # lane-dense hidden size

    text_emb = jax.random.normal(keys[0], (seq, hidden), dtype=jnp.float32)
    meta_emb = jax.random.normal(keys[1], (seq, hidden), dtype=jnp.float32)

    # nn.Linear-style uniform(-1/sqrt(fan_in), 1/sqrt(fan_in)) init.
    b1 = 1.0 / jnp.sqrt(jnp.float32(hidden))
    wt = jax.random.uniform(keys[2], (hidden, hidden), minval=-b1, maxval=b1,
                            dtype=jnp.float32)
    bt = jax.random.uniform(keys[3], (hidden,), minval=-b1, maxval=b1,
                            dtype=jnp.float32)
    wm = jax.random.uniform(keys[4], (hidden, hidden), minval=-b1, maxval=b1,
                            dtype=jnp.float32)
    bm = jax.random.uniform(keys[5], (hidden,), minval=-b1, maxval=b1,
                            dtype=jnp.float32)
    b2 = 1.0 / jnp.sqrt(jnp.float32(2 * hidden))
    wc = jax.random.uniform(keys[6], (hidden, 2 * hidden), minval=-b2, maxval=b2,
                            dtype=jnp.float32)
    bc = jax.random.uniform(keys[7], (hidden,), minval=-b2, maxval=b2,
                            dtype=jnp.float32)

    out = co_attention(text_emb, meta_emb, wt, bt, wm, bm, wc, bc, tile_t=128)
    out = jax.block_until_ready(out)

    # Pure-JAX f32 reference (mirrors the PyTorch forward exactly).
    t_lin = text_emb @ wt.T + bt
    m_lin = meta_emb @ wm.T + bm
    affinity = t_lin @ m_lin.T
    text_att = jax.nn.softmax(affinity, axis=1)
    meta_att = jax.nn.softmax(affinity.T, axis=1)
    meta_ctx = meta_att @ meta_emb
    text_ctx = text_att @ text_emb
    ref = jnp.concatenate([text_ctx, meta_ctx], axis=1) @ wc.T + bc

    # Tolerance reflects the intentional bf16 MXU operands (f32 accumulation);
    # an all-f32 variant (mxu_dtype=jnp.float32) matches the reference to ~1e-5.
    max_err = float(jnp.max(jnp.abs(out - ref)))
    assert jnp.allclose(out, ref, atol=3e-2, rtol=3e-2), (
        f"mismatch vs reference: max abs err = {max_err}")
    print("KERNEL_OK")
</pallas_src>

<mosaic_0001>
module attributes {stable_mosaic.version = 11 : i64} {
  func.func @_co_attention_kernel(%arg0: i32, %arg1: i32, %arg2: memref<256x128xbf16, #tpu.memory_space<vmem>>, %arg3: memref<256x128xbf16, #tpu.memory_space<vmem>>, %arg4: memref<128x128xbf16, #tpu.memory_space<vmem>>, %arg5: memref<1x128xf32, #tpu.memory_space<vmem>>, %arg6: memref<128x128xbf16, #tpu.memory_space<vmem>>, %arg7: memref<1x128xf32, #tpu.memory_space<vmem>>, %arg8: memref<256x128xbf16, #tpu.memory_space<vmem>>, %arg9: memref<1x128xf32, #tpu.memory_space<vmem>>, %arg10: memref<128x128xf32, #tpu.memory_space<vmem>>, %arg11: memref<256x128xbf16, #tpu.memory_space<vmem>>, %arg12: memref<256x128xbf16, #tpu.memory_space<vmem>>, %arg13: memref<256x128xf32, #tpu.memory_space<vmem>>, %arg14: memref<256x1xf32, #tpu.memory_space<vmem>>, %arg15: memref<256x1xf32, #tpu.memory_space<vmem>>, %arg16: memref<128x256xbf16, #tpu.memory_space<vmem>>) attributes {dimension_semantics = [#tpu.dimension_semantics<arbitrary>, #tpu.dimension_semantics<arbitrary>], iteration_bounds = array<i64: 2, 2>, scalar_prefetch = 0 : i64, scratch_operands = 6 : i64, tpu.core_type = #tpu.core_type<tc>, window_params = [{pipeline_mode = #tpu.pipeline_mode<synchronous>, transform_indices = @transform_0, window_bounds = array<i64: 256, 128>}, {pipeline_mode = #tpu.pipeline_mode<synchronous>, transform_indices = @transform_1, window_bounds = array<i64: 256, 128>}, {pipeline_mode = #tpu.pipeline_mode<synchronous>, transform_indices = @transform_2, window_bounds = array<i64: 128, 128>}, {pipeline_mode = #tpu.pipeline_mode<synchronous>, transform_indices = @transform_3, window_bounds = array<i64: 1, 128>}, {pipeline_mode = #tpu.pipeline_mode<synchronous>, transform_indices = @transform_4, window_bounds = array<i64: 128, 128>}, {pipeline_mode = #tpu.pipeline_mode<synchronous>, transform_indices = @transform_5, window_bounds = array<i64: 1, 128>}, {pipeline_mode = #tpu.pipeline_mode<synchronous>, transform_indices = @transform_6, window_bounds = array<i64: 256, 128>}, {pipeline_mode = #tpu.pipeline_mode<synchronous>, transform_indices = @transform_7, window_bounds = array<i64: 1, 128>}, {transform_indices = @transform_8, window_bounds = array<i64: 128, 128>}]} {
    %c128_i32 = arith.constant 128 : i32
    %0 = arith.muli %arg1, %c128_i32 : i32
    %1 = tpu.assume_multiple %0, 128 : i32
    %c0_i32 = arith.constant 0 : i32
    %2 = arith.cmpi eq, %arg0, %c0_i32 : i32
    %c0_i32_0 = arith.constant 0 : i32
    %3 = arith.cmpi eq, %arg1, %c0_i32_0 : i32
    %4 = arith.andi %2, %3 : i1
    %5 = arith.extui %4 : i1 to i32
    %c0_i32_1 = arith.constant 0 : i32
    %6 = arith.cmpi ne, %5, %c0_i32_1 : i32
    scf.if %6 {
      %cst = arith.constant 0xFF800000 : f32
      %13 = vector.broadcast %cst : f32 to vector<256x1xf32>
      %c0 = arith.constant 0 : index
      %c0_5 = arith.constant 0 : index
      %14 = vector.load %arg14[%c0, %c0_5] : memref<256x1xf32, #tpu.memory_space<vmem>>, vector<256x1xf32>
      tpu.vector_store %arg14[%c0, %c0_5], %13 {strides = array<i32>} : memref<256x1xf32, #tpu.memory_space<vmem>>, vector<256x1xf32>,
      %cst_6 = arith.constant 0.000000e+00 : f32
      %15 = vector.broadcast %cst_6 : f32 to vector<256x1xf32>
      %c0_7 = arith.constant 0 : index
      %c0_8 = arith.constant 0 : index
      %16 = vector.load %arg15[%c0_7, %c0_8] : memref<256x1xf32, #tpu.memory_space<vmem>>, vector<256x1xf32>
      tpu.vector_store %arg15[%c0_7, %c0_8], %15 {strides = array<i32>} : memref<256x1xf32, #tpu.memory_space<vmem>>, vector<256x1xf32>,
      %cst_9 = arith.constant 0.000000e+00 : f32
      %17 = vector.broadcast %cst_9 : f32 to vector<256x128xf32>
      %c0_10 = arith.constant 0 : index
      %c0_11 = arith.constant 0 : index
      %18 = vector.load %arg13[%c0_10, %c0_11] : memref<256x128xf32, #tpu.memory_space<vmem>>, vector<256x128xf32>
      tpu.vector_store %arg13[%c0_10, %c0_11], %17 {strides = array<i32>} : memref<256x128xf32, #tpu.memory_space<vmem>>, vector<256x128xf32>,
      %c0_12 = arith.constant 0 : index
      %c0_13 = arith.constant 0 : index
      %19 = vector.load %arg3[%c0_12, %c0_13] : memref<256x128xbf16, #tpu.memory_space<vmem>>, vector<256x128xbf16>
      %c0_14 = arith.constant 0 : index
      %c0_15 = arith.constant 0 : index
      %20 = vector.load %arg6[%c0_14, %c0_15] : memref<128x128xbf16, #tpu.memory_space<vmem>>, vector<128x128xbf16>
      %cst_16 = arith.constant dense<0.000000e+00> : vector<256x128xf32>
      %21 = tpu.matmul %19, %20, %cst_16 {dimension_numbers = #tpu.dot_dimension_numbers<[1], [0], [0], [1], [0, 0, 1, 1], [], []>} : vector<256x128xbf16>, vector<128x128xbf16>, vector<256x128xf32> -> vector<256x128xf32>
      %c0_17 = arith.constant 0 : index
      %c0_18 = arith.constant 0 : index
      %22 = vector.load %arg7[%c0_17, %c0_18] : memref<1x128xf32, #tpu.memory_space<vmem>>, vector<1x128xf32>
      %23 = vector.broadcast %22 : vector<1x128xf32> to vector<256x128xf32>
      %24 = arith.addf %21, %23 : vector<256x128xf32>
      %25 = arith.truncf %24 : vector<256x128xf32> to vector<256x128xbf16>
      %c0_19 = arith.constant 0 : index
      %c0_20 = arith.constant 0 : index
      %26 = vector.load %arg11[%c0_19, %c0_20] : memref<256x128xbf16, #tpu.memory_space<vmem>>, vector<256x128xbf16>
      tpu.vector_store %arg11[%c0_19, %c0_20], %25 {strides = array<i32>} : memref<256x128xbf16, #tpu.memory_space<vmem>>, vector<256x128xbf16>,
    } else {
    }
    %c0_i32_2 = arith.constant 0 : i32
    %7 = arith.cmpi eq, %arg0, %c0_i32_2 : i32
    %8 = arith.extui %7 : i1 to i32
    %c0_i32_3 = arith.constant 0 : i32
    %9 = arith.cmpi ne, %8, %c0_i32_3 : i32
    scf.if %9 {
      %13 = arith.index_cast %1 : i32 to index
      %c0 = arith.constant 0 : index
      %14 = vector.load %arg2[%13, %c0] : memref<256x128xbf16, #tpu.memory_space<vmem>>, vector<128x128xbf16>
      %15 = arith.index_cast %1 : i32 to index
      %c0_5 = arith.constant 0 : index
      %16 = vector.load %arg3[%15, %c0_5] : memref<256x128xbf16, #tpu.memory_space<vmem>>, vector<128x128xbf16>
      %c0_6 = arith.constant 0 : index
      %c0_7 = arith.constant 0 : index
      %17 = vector.load %arg4[%c0_6, %c0_7] : memref<128x128xbf16, #tpu.memory_space<vmem>>, vector<128x128xbf16>
      %cst = arith.constant dense<0.000000e+00> : vector<128x128xf32>
      %18 = tpu.matmul %14, %17, %cst {dimension_numbers = #tpu.dot_dimension_numbers<[1], [0], [0], [1], [0, 0, 1, 1], [], []>} : vector<128x128xbf16>, vector<128x128xbf16>, vector<128x128xf32> -> vector<128x128xf32>
      %c0_8 = arith.constant 0 : index
      %c0_9 = arith.constant 0 : index
      %19 = vector.load %arg5[%c0_8, %c0_9] : memref<1x128xf32, #tpu.memory_space<vmem>>, vector<1x128xf32>
      %20 = vector.broadcast %19 : vector<1x128xf32> to vector<128x128xf32>
      %21 = arith.addf %18, %20 : vector<128x128xf32>
      %22 = arith.truncf %21 : vector<128x128xf32> to vector<128x128xbf16>
      %c0_10 = arith.constant 0 : index
      %c0_11 = arith.constant 0 : index
      %23 = vector.load %arg11[%c0_10, %c0_11] : memref<256x128xbf16, #tpu.memory_space<vmem>>, vector<256x128xbf16>
      %cst_12 = arith.constant dense<0.000000e+00> : vector<128x256xf32>
      %24 = tpu.matmul %22, %23, %cst_12 {dimension_numbers = #tpu.dot_dimension_numbers<[1], [1], [0], [0], [0, 0, 1, 0], [], []>} : vector<128x128xbf16>, vector<256x128xbf16>, vector<128x256xf32> -> vector<128x256xf32>
      %cst_13 = arith.constant dense<0xFF800000> : vector<128xf32>
      %25 = vector.multi_reduction <maximumf>, %24, %cst_13 [1] : vector<128x256xf32> to vector<128xf32>
      %26 = vector.shape_cast %25 : vector<128xf32> to vector<128x1xf32>
      %27 = vector.broadcast %26 : vector<128x1xf32> to vector<128x256xf32>
      %28 = arith.subf %24, %27 : vector<128x256xf32>
      %29 = math.exp %28 : vector<128x256xf32>
      %cst_14 = arith.constant dense<0.000000e+00> : vector<128xf32>
      %30 = vector.multi_reduction <add>, %29, %cst_14 [1] : vector<128x256xf32> to vector<128xf32>
      %31 = vector.shape_cast %30 : vector<128xf32> to vector<128x1xf32>
      %32 = arith.truncf %29 : vector<128x256xf32> to vector<128x256xbf16>
      %c0_15 = arith.constant 0 : index
      %c0_16 = arith.constant 0 : index
      %33 = vector.load %arg2[%c0_15, %c0_16] : memref<256x128xbf16, #tpu.memory_space<vmem>>, vector<256x128xbf16>
      %cst_17 = arith.constant dense<0.000000e+00> : vector<128x128xf32>
      %34 = tpu.matmul %32, %33, %cst_17 {dimension_numbers = #tpu.dot_dimension_numbers<[1], [0], [0], [1], [0, 0, 1, 1], [], []>} : vector<128x256xbf16>, vector<256x128xbf16>, vector<128x128xf32> -> vector<128x128xf32>
      %35 = tpu.reciprocal %31 {approx = true} : vector<128x1xf32> -> vector<128x1xf32>
      %36 = vector.broadcast %35 : vector<128x1xf32> to vector<128x128xf32>
      %37 = arith.mulf %34, %36 : vector<128x128xf32>
      %38 = arith.truncf %37 : vector<128x128xf32> to vector<128x128xbf16>
      %39 = arith.index_cast %1 : i32 to index
      %c0_18 = arith.constant 0 : index
      %40 = vector.load %arg12[%39, %c0_18] : memref<256x128xbf16, #tpu.memory_space<vmem>>, vector<128x128xbf16>
      tpu.vector_store %arg12[%39, %c0_18], %38 {strides = array<i32>} : memref<256x128xbf16, #tpu.memory_space<vmem>>, vector<128x128xbf16>,
      %cst_19 = arith.constant dense<0.000000e+00> : vector<256x128xf32>
      %41 = tpu.matmul %23, %22, %cst_19 {dimension_numbers = #tpu.dot_dimension_numbers<[1], [1], [0], [0], [0, 0, 1, 0], [], []>} : vector<256x128xbf16>, vector<128x128xbf16>, vector<256x128xf32> -> vector<256x128xf32>
      %cst_20 = arith.constant dense<0xFF800000> : vector<256xf32>
      %42 = vector.multi_reduction <maximumf>, %41, %cst_20 [1] : vector<256x128xf32> to vector<256xf32>
      %43 = vector.shape_cast %42 : vector<256xf32> to vector<256x1xf32>
      %c0_21 = arith.constant 0 : index
      %c0_22 = arith.constant 0 : index
      %44 = vector.load %arg14[%c0_21, %c0_22] : memref<256x1xf32, #tpu.memory_space<vmem>>, vector<256x1xf32>
      %45 = arith.maximumf %44, %43 : vector<256x1xf32>
      %c0_23 = arith.constant 0 : index
      %c0_24 = arith.constant 0 : index
      %46 = vector.load %arg14[%c0_23, %c0_24] : memref<256x1xf32, #tpu.memory_space<vmem>>, vector<256x1xf32>
      %47 = arith.subf %46, %45 : vector<256x1xf32>
      %48 = math.exp %47 : vector<256x1xf32>
      %49 = vector.broadcast %45 : vector<256x1xf32> to vector<256x128xf32>
      %50 = arith.subf %41, %49 : vector<256x128xf32>
      %51 = math.exp %50 : vector<256x128xf32>
      %c0_25 = arith.constant 0 : index
      %c0_26 = arith.constant 0 : index
      %52 = vector.load %arg15[%c0_25, %c0_26] : memref<256x1xf32, #tpu.memory_space<vmem>>, vector<256x1xf32>
      %53 = arith.mulf %48, %52 : vector<256x1xf32>
      %cst_27 = arith.constant dense<0.000000e+00> : vector<256xf32>
      %54 = vector.multi_reduction <add>, %51, %cst_27 [1] : vector<256x128xf32> to vector<256xf32>
      %55 = vector.shape_cast %54 : vector<256xf32> to vector<256x1xf32>
      %56 = arith.addf %53, %55 : vector<256x1xf32>
      %c0_28 = arith.constant 0 : index
      %c0_29 = arith.constant 0 : index
      %57 = vector.load %arg15[%c0_28, %c0_29] : memref<256x1xf32, #tpu.memory_space<vmem>>, vector<256x1xf32>
      tpu.vector_store %arg15[%c0_28, %c0_29], %56 {strides = array<i32>} : memref<256x1xf32, #tpu.memory_space<vmem>>, vector<256x1xf32>,
      %c0_30 = arith.constant 0 : index
      %c0_31 = arith.constant 0 : index
      %58 = vector.load %arg13[%c0_30, %c0_31] : memref<256x128xf32, #tpu.memory_space<vmem>>, vector<256x128xf32>
      %59 = vector.broadcast %48 : vector<256x1xf32> to vector<256x128xf32>
      %60 = arith.mulf %59, %58 : vector<256x128xf32>
      %61 = arith.truncf %51 : vector<256x128xf32> to vector<256x128xbf16>
      %cst_32 = arith.constant dense<0.000000e+00> : vector<256x128xf32>
      %62 = tpu.matmul %61, %16, %cst_32 {dimension_numbers = #tpu.dot_dimension_numbers<[1], [0], [0], [1], [0, 0, 1, 1], [], []>} : vector<256x128xbf16>, vector<128x128xbf16>, vector<256x128xf32> -> vector<256x128xf32>
      %63 = arith.addf %60, %62 : vector<256x128xf32>
      %c0_33 = arith.constant 0 : index
      %c0_34 = arith.constant 0 : index
      %64 = vector.load %arg13[%c0_33, %c0_34] : memref<256x128xf32, #tpu.memory_space<vmem>>, vector<256x128xf32>
      tpu.vector_store %arg13[%c0_33, %c0_34], %63 {strides = array<i32>} : memref<256x128xf32, #tpu.memory_space<vmem>>, vector<256x128xf32>,
      %c0_35 = arith.constant 0 : index
      %c0_36 = arith.constant 0 : index
      %65 = vector.load %arg14[%c0_35, %c0_36] : memref<256x1xf32, #tpu.memory_space<vmem>>, vector<256x1xf32>
      tpu.vector_store %arg14[%c0_35, %c0_36], %45 {strides = array<i32>} : memref<256x1xf32, #tpu.memory_space<vmem>>, vector<256x1xf32>,
      %cst_37 = arith.constant 0.000000e+00 : f32
      %66 = vector.broadcast %cst_37 : f32 to vector<128x128xf32>
      %c0_38 = arith.constant 0 : index
      %c0_39 = arith.constant 0 : index
      %67 = vector.load %arg10[%c0_38, %c0_39] : memref<128x128xf32, #tpu.memory_space<vmem>>, vector<128x128xf32>
      tpu.vector_store %arg10[%c0_38, %c0_39], %66 {strides = array<i32>} : memref<128x128xf32, #tpu.memory_space<vmem>>, vector<128x128xf32>,
    } else {
    }
    %c1_i32 = arith.constant 1 : i32
    %10 = arith.cmpi eq, %arg0, %c1_i32 : i32
    %11 = arith.extui %10 : i1 to i32
    %c0_i32_4 = arith.constant 0 : i32
    %12 = arith.cmpi ne, %11, %c0_i32_4 : i32
    scf.if %12 {
      %13 = arith.index_cast %1 : i32 to index
      %c0 = arith.constant 0 : index
      %14 = vector.load %arg13[%13, %c0] : memref<256x128xf32, #tpu.memory_space<vmem>>, vector<128x128xf32>
      %15 = arith.index_cast %1 : i32 to index
      %c0_5 = arith.constant 0 : index
      %16 = vector.load %arg15[%15, %c0_5] : memref<256x1xf32, #tpu.memory_space<vmem>>, vector<128x1xf32>
      %17 = tpu.reciprocal %16 {approx = true} : vector<128x1xf32> -> vector<128x1xf32>
      %18 = vector.broadcast %17 : vector<128x1xf32> to vector<128x128xf32>
      %19 = arith.mulf %14, %18 : vector<128x128xf32>
      %20 = arith.index_cast %1 : i32 to index
      %c0_6 = arith.constant 0 : index
      %21 = vector.load %arg12[%20, %c0_6] : memref<256x128xbf16, #tpu.memory_space<vmem>>, vector<128x128xbf16>
      %c0_7 = arith.constant 0 : index
      %c0_8 = arith.constant 0 : index
      %22 = vector.load %arg16[%c0_7, %c0_8] : memref<128x256xbf16, #tpu.memory_space<vmem>>, vector<128x128xbf16>
      tpu.vector_store %arg16[%c0_7, %c0_8], %21 {strides = array<i32>} : memref<128x256xbf16, #tpu.memory_space<vmem>>, vector<128x128xbf16>,
      %23 = arith.truncf %19 : vector<128x128xf32> to vector<128x128xbf16>
      %c0_9 = arith.constant 0 : index
      %c128 = arith.constant 128 : index
      %24 = vector.load %arg16[%c0_9, %c128] : memref<128x256xbf16, #tpu.memory_space<vmem>>, vector<128x128xbf16>
      tpu.vector_store %arg16[%c0_9, %c128], %23 {strides = array<i32>} : memref<128x256xbf16, #tpu.memory_space<vmem>>, vector<128x128xbf16>,
      %c0_10 = arith.constant 0 : index
      %c0_11 = arith.constant 0 : index
      %25 = vector.load %arg16[%c0_10, %c0_11] : memref<128x256xbf16, #tpu.memory_space<vmem>>, vector<128x256xbf16>
      %c0_12 = arith.constant 0 : index
      %c0_13 = arith.constant 0 : index
      %26 = vector.load %arg8[%c0_12, %c0_13] : memref<256x128xbf16, #tpu.memory_space<vmem>>, vector<256x128xbf16>
      %cst = arith.constant dense<0.000000e+00> : vector<128x128xf32>
      %27 = tpu.matmul %25, %26, %cst {dimension_numbers = #tpu.dot_dimension_numbers<[1], [0], [0], [1], [0, 0, 1, 1], [], []>} : vector<128x256xbf16>, vector<256x128xbf16>, vector<128x128xf32> -> vector<128x128xf32>
      %c0_14 = arith.constant 0 : index
      %c0_15 = arith.constant 0 : index
      %28 = vector.load %arg9[%c0_14, %c0_15] : memref<1x128xf32, #tpu.memory_space<vmem>>, vector<1x128xf32>
      %29 = vector.broadcast %28 : vector<1x128xf32> to vector<128x128xf32>
      %30 = arith.addf %27, %29 : vector<128x128xf32>
      %c0_16 = arith.constant 0 : index
      %c0_17 = arith.constant 0 : index
      %31 = vector.load %arg10[%c0_16, %c0_17] : memref<128x128xf32, #tpu.memory_space<vmem>>, vector<128x128xf32>
      tpu.vector_store %arg10[%c0_16, %c0_17], %30 {strides = array<i32>} : memref<128x128xf32, #tpu.memory_space<vmem>>, vector<128x128xf32>,
    } else {
    }
    return
  }
  func.func @transform_0(%arg0: i32, %arg1: i32) -> (i32, i32) {
    %c0_i32 = arith.constant 0 : i32
    %c0_i32_0 = arith.constant 0 : i32
    %c0_i32_1 = arith.constant 0 : i32
    return %c0_i32, %c0_i32_0 : i32, i32
  }
  func.func @transform_1(%arg0: i32, %arg1: i32) -> (i32, i32) {
    %c0_i32 = arith.constant 0 : i32
    %c0_i32_0 = arith.constant 0 : i32
    %c0_i32_1 = arith.constant 0 : i32
    return %c0_i32, %c0_i32_0 : i32, i32
  }
  func.func @transform_2(%arg0: i32, %arg1: i32) -> (i32, i32) {
    %c0_i32 = arith.constant 0 : i32
    %c0_i32_0 = arith.constant 0 : i32
    %c0_i32_1 = arith.constant 0 : i32
    return %c0_i32, %c0_i32_0 : i32, i32
  }
  func.func @transform_3(%arg0: i32, %arg1: i32) -> (i32, i32) {
    %c0_i32 = arith.constant 0 : i32
    %c0_i32_0 = arith.constant 0 : i32
    %c0_i32_1 = arith.constant 0 : i32
    return %c0_i32, %c0_i32_0 : i32, i32
  }
  func.func @transform_4(%arg0: i32, %arg1: i32) -> (i32, i32) {
    %c0_i32 = arith.constant 0 : i32
    %c0_i32_0 = arith.constant 0 : i32
    %c0_i32_1 = arith.constant 0 : i32
    return %c0_i32, %c0_i32_0 : i32, i32
  }
  func.func @transform_5(%arg0: i32, %arg1: i32) -> (i32, i32) {
    %c0_i32 = arith.constant 0 : i32
    %c0_i32_0 = arith.constant 0 : i32
    %c0_i32_1 = arith.constant 0 : i32
    return %c0_i32, %c0_i32_0 : i32, i32
  }
  func.func @transform_6(%arg0: i32, %arg1: i32) -> (i32, i32) {
    %c0_i32 = arith.constant 0 : i32
    %c0_i32_0 = arith.constant 0 : i32
    %c0_i32_1 = arith.constant 0 : i32
    return %c0_i32, %c0_i32_0 : i32, i32
  }
  func.func @transform_7(%arg0: i32, %arg1: i32) -> (i32, i32) {
    %c0_i32 = arith.constant 0 : i32
    %c0_i32_0 = arith.constant 0 : i32
    %c0_i32_1 = arith.constant 0 : i32
    return %c0_i32, %c0_i32_0 : i32, i32
  }
  func.func @transform_8(%arg0: i32, %arg1: i32) -> (i32, i32) {
    %0 = arith.muli %arg0, %arg1 : i32
    %c0_i32 = arith.constant 0 : i32
    %c0_i32_0 = arith.constant 0 : i32
    return %0, %c0_i32 : i32, i32
  }
}

</mosaic_0001>

<bundles_post_ra>
// kernel: tpu_custom_call.1
= control target key start
LH: loop header
LB: loop body
LE: loop exit
PB: predicated region body
PF: predicated region fallthrough
CT: control target
= control target key end

     0   :  { %s6656_s0 = inlined_call_operand.hbm [shape: bf16[256,128], index: 0, kind: input, shape index: {}]   ;;  %s6657_s1 = inlined_call_operand.hbm [shape: bf16[256,128], index: 1, kind: input, shape index: {}]   ;;  %s6658_s2 = inlined_call_operand.hbm [shape: bf16[128,128], index: 2, kind: input, shape index: {}]   ;;  %s6659_s3 = inlined_call_operand.vmem [shape: f32[1,128], index: 3, kind: input, shape index: {}]   ;;  %s6660_s4 = inlined_call_operand.hbm [shape: bf16[128,128], index: 4, kind: input, shape index: {}]   ;;  %s6661_s5 = inlined_call_operand.vmem [shape: f32[1,128], index: 5, kind: input, shape index: {}]   ;;  %s6662_s6 = inlined_call_operand.hbm [shape: bf16[256,128], index: 6, kind: input, shape index: {}]   ;;  %s6663_s7 = inlined_call_operand.vmem [shape: f32[1,128], index: 7, kind: input, shape index: {}]   ;;  %s6664_s8 = inlined_call_operand.hbm [shape: f32[256,128], index: 8, kind: output, shape index: {}]  }
   0x1   :  { %6717 = sst [smem:[#allocation65_spill]] %s6657_s1 }
   0x2   :  { %13 = vsyncpa [#allocation9], 0 }
   0x3   :  { %14 = vsyncpa [#allocation12], 0 }
   0x4   :  { %15 = vsyncpa [#allocation15], 0 }
   0x5   :  { %16 = vsyncpa [#allocation10], 0 }
   0x6   :  { %18 = vsyncpa [#allocation10 + $0x1], 0  ;;  %s5078_s27 = smov 0   ;;  %s5080_s28 = smov 0  }
   0x7   :  { %s5082_s29 = smov 0   ;;  %s5084_s30 = smov 0  }
   0x8   :  { %s5086_s9 = smov 0   ;;  %s5088_s10 = smov 0  }
   0x9   :  { %s5090_s11 = smov 0   ;;  %s5092_s12 = smov 0  }
   0xa LB: > { %6718 = sst [smem:[#allocation22_spill]] %s4988_s27  ;;  %s3732_s13 = sadd.s32 4294967295, %s5016_s12   ;;  %s5016_s12 = sphi %s5092_s12, %s24_s12   ;;  %s5012_s11 = sphi %s5090_s11, %s6852_s11   ;;  %s5008_s10 = sphi %s5088_s10, %s6851_s10   ;;  %s5004_s9 = sphi %s5086_s9, %s6850_s9   ;;  %s5000_s30 = sphi %s5084_s30, %s6849_s30   ;;  %s4996_s29 = sphi %s5082_s29, %s6855_s29   ;;  %s4992_s28 = sphi %s5080_s28, %s6854_s28   ;;  %s4988_s27 = sphi %s5078_s27, %s6853_s27  }
   0xb   : > { %6719 = sst [smem:[#allocation23_spill]] %s4996_s29  ;;  %s3733_s14 = sadd.s32 4294967294, %s5016_s12  }
   0xc   : > { %6720 = sst [smem:[#allocation24_spill]] %s5008_s10  ;;  %s33_s15 = sadd.s32 1, %s5008_s10 }
   0xd   : > { %6721 = sst [smem:[#allocation25_spill]] %s5012_s11  ;;  %s36_s16 = sadd.s32 1, %s5012_s11 }
   0xe   : > { %6722 = sst [smem:[#allocation26_spill]] %s5016_s12  ;;  %p34_p0 = scmp.ge.s32.totalorder %s33_s15, 2 }
   0xf   : > { %s208_s17 = smul.u32 %s5008_s10, %s5012_s11  ;;  %s213_s18 = sadd.s32 1, %s4996_s29 }
  0x10   : > { %p223_p1 = scmp.ne.s32.totalorder %s4996_s29, %s4992_s28  ;;  %s6857_s15 = smov (%p34_p0, %s33_s15), 0 }
  0x11   : > { %6723 = sst [smem:[#allocation27_spill]] %s6857_s15  ;;  %s6859_s16 = smov (!%p34_p0, %s36_s16), %s5012_s11 }
  0x12   : > { %p224_p2 = scmp.eq.s32.totalorder %s3732_s13, 3  ;;  %p229_p3 = scmp.ne.s32.totalorder %s4992_s28, %s4988_s27 }
  0x13   : > { %p38_p4 = scmp.ge.s32.totalorder %s6859_s16, 2  ;;  %p230_p5 = scmp.eq.s32.totalorder %s3733_s14, 3 }
  0x14   : > { %p5132_p6 = por %p224_p2, %p223_p1  ;;  %p3734_p7 = scmp.ge.s32.totalorder %s5016_s12, 1 }
  0x15   : > { %s6861_s16 = smov (%p38_p4, %s6859_s16), 0  ;;  %p5139_p8 = por %p230_p5, %p229_p3 }
  0x16   : > { %s6724_s19 = scalar_select %p5132_p6, 1, 0 }
  0x17   : > { %6725 = sst [smem:[#allocation28_spill]] %s6861_s16  ;;  %p237_p9 = scmp.lt.s32.totalorder %s5016_s12, 5 }
  0x18   : > { %s6726_s20 = scalar_select %p5139_p8, 1, 0 }
  0x19   : > { %s209_s21 = smul.u32 %s6861_s16, %s6857_s15  ;;  %p5146_p10 = pnand %p3734_p7, %p237_p9 }
  0x1a   : > { %6727 = sst [smem:[#allocation29_spill]] %s6726_s20  ;;  %p5150_p11 = scmp.eq.s32.totalorder %s3732_s13, 0 }
  0x1b   : > { %s6728_s22 = scalar_select %p5146_p10, 1, 0 }
  0x1c   : > { %s6729_s23 = scalar_select %p5150_p11, 1, 0 }
  0x1d   : > { %s210_s24 = ssub.s32 %s208_s17, %s209_s21  ;;  %p4321_p13 = pneg %p5146_p10 }
  0x1e   : > { %p211_p12 = scmp.eq.s32.totalorder %s210_s24, 0  ;;  %s5018_s14 = smov [#allocation11]  }
  0x1f   : > { %p5161_p0 = pnand %p5150_p11, %p4321_p13  ;;  %s262_s16 = sshll.u32 %s5018_s14, 4  ;;  %s263_s16 = int_to_ptr.vmem [resolvable:$true] %s262_s16 }
  0x20   : > { %s5157_s25 = scalar_select %p211_p12, %s4996_s29, %s213_s18  }
  0x21   : > { %s5019_s13 = smov [#allocation14]   ;;  %s6732_s1 = sld [smem:[#allocation65_spill]] }
  0x22   : > { %6730 = sst [smem:[#allocation30_spill]] %s5157_s25  ;;  %s291_s15 = sshll.u32 %s5019_s13, 4  ;;  %s292_s15 = int_to_ptr.vmem [resolvable:$true] %s291_s15 }
  0x23   : > { %p5173_p2 = pneg %p5161_p0 }
  0x27   : > { %s4770_s17 = scalar_lea.hbm %s6732_s1, 2048 }
  0x28   : > { %p4771_p1 = scmp.ne.s32.totalorder %s6732_s1, %s4770_s17  ;;  %p4777_p5 = scmp.lt.u32.totalorder %s4770_s17, %s6732_s1 }
  0x2a   : > { %p4773_p3 = pnand %p5173_p2, %p4771_p1 }
  0x2c   : > { %p4774_p4 = pneg %p4773_p3 }
  0x2e   : > { %p4779_p7 = pnand %p4777_p5, %p4774_p4 }
  0x30   : > { %4782 = shalt.err (!%p4779_p7)
}
  0x31   : > { %s4783_s10 = scalar_lea.vmem %s263_s16, 2048  ;;  %p4791_p8 = scmp.lt.s32.totalorder %s263_s16, %s263_s16 }
  0x32   : > { %p4784_p9 = scmp.ne.s32.totalorder %s263_s16, %s4783_s10  ;;  %p4792_p6 = scmp.lt.s32.totalorder %s4783_s10, %s4783_s10 }
  0x34   : > { %p4786_p12 = pnand %p4784_p9, %p5173_p2  ;;  %p4793_p11 = por %p4792_p6, %p4791_p8 }
  0x36   : > { %p4787_p13 = pneg %p4786_p12 }
  0x38   : > { %p4794_p10 = pnand %p4793_p11, %p4787_p13 }
  0x3a   : > { %4797 = shalt.err (!%p4794_p10)
}
  0x3b   : > { %s5020_s11 = smov 64   ;;  %s5021_s13 = smov 4  }
  0x3c   : > { %4327 = dma.hbm_to_vmem [thread:$0]  (!%p5161_p0), %s6732_s1, 2048, %s263_s16, [#allocation12], %s5020_s11, %s5020_s11, %s5021_s13  }
  0x3d   : > { %s4798_s14 = scalar_lea.hbm %s6660_s4, 1024 }
  0x3e   : > { %p4799_p6 = scmp.ne.s32.totalorder %s6660_s4, %s4798_s14  ;;  %p4805_p11 = scmp.lt.u32.totalorder %s4798_s14, %s6660_s4 }
  0x40   : > { %p4801_p8 = pnand %p4799_p6, %p5173_p2 }
  0x42   : > { %p4802_p10 = pneg %p4801_p8 }
  0x44   : > { %p4807_p1 = pnand %p4805_p11, %p4802_p10 }
  0x46   : > { %4810 = shalt.err (!%p4807_p1)
}
  0x47   : > { %s4811_s25 = scalar_lea.vmem %s292_s15, 1024  ;;  %p4819_p7 = scmp.lt.s32.totalorder %s292_s15, %s292_s15 }
  0x48   : > { %p4812_p3 = scmp.ne.s32.totalorder %s292_s15, %s4811_s25  ;;  %p4820_p9 = scmp.lt.s32.totalorder %s4811_s25, %s4811_s25 }
  0x4a   : > { %p4814_p4 = pnand %p4812_p3, %p5173_p2  ;;  %p4821_p12 = por %p4820_p9, %p4819_p7 }
  0x4c   : > { %p4815_p5 = pneg %p4814_p4 }
  0x4e   : > { %p4822_p13 = pnand %p4821_p12, %p4815_p5 }
  0x50   : > { %4825 = shalt.err (!%p4822_p13)
}
  0x51   : > { %4333 = dma.hbm_to_vmem [thread:$0]  (!%p5161_p0), %s6660_s4, 1024, %s292_s15, [#allocation15], %s5020_s11, %s5020_s11, %s5021_s13  }
  0x52   : > { %s5022_s16 = smov [#allocation8]   ;;  %s5023_s17 = smov [#allocation13]  }
  0x53   : > { %s249_s20 = sshll.u32 %s5022_s16, 4  ;;  %s275_s21 = sshll.u32 %s5023_s17, 4  ;;  %s250_s20 = int_to_ptr.vmem [resolvable:$true] %s249_s20  ;;  %s276_s21 = int_to_ptr.vmem [resolvable:$true] %s275_s21 }
  0x54   : > { %s4826_s10 = scalar_lea.hbm %s6656_s0, 2048 }
  0x55   : > { %p4827_p6 = scmp.ne.s32.totalorder %s6656_s0, %s4826_s10  ;;  %p4833_p11 = scmp.lt.u32.totalorder %s4826_s10, %s6656_s0 }
  0x57   : > { %p4829_p8 = pnand %p4827_p6, %p5173_p2 }
  0x59   : > { %p4830_p10 = pneg %p4829_p8 }
  0x5b   : > { %p4835_p1 = pnand %p4833_p11, %p4830_p10 }
  0x5d   : > { %4838 = shalt.err (!%p4835_p1)
}
  0x5e   : > { %s4839_s15 = scalar_lea.vmem %s250_s20, 2048  ;;  %p4847_p7 = scmp.lt.s32.totalorder %s250_s20, %s250_s20 }
  0x5f   : > { %p4840_p3 = scmp.ne.s32.totalorder %s250_s20, %s4839_s15  ;;  %p4848_p9 = scmp.lt.s32.totalorder %s4839_s15, %s4839_s15 }
  0x61   : > { %p4842_p4 = pnand %p4840_p3, %p5173_p2  ;;  %p4849_p12 = por %p4848_p9, %p4847_p7 }
  0x63   : > { %p4843_p5 = pneg %p4842_p4 }
  0x65   : > { %p4850_p13 = pnand %p4849_p12, %p4843_p5 }
  0x67   : > { %4853 = shalt.err (!%p4850_p13)
}
  0x68   : > { %4324 = dma.hbm_to_vmem [thread:$0]  (!%p5161_p0), %s6656_s0, 2048, %s250_s20, [#allocation9], %s5020_s11, %s5020_s11, %s5021_s13  }
  0x69   : > { %s4854_s17 = scalar_lea.hbm %s6658_s2, 1024 }
  0x6a   : > { %p4855_p6 = scmp.ne.s32.totalorder %s6658_s2, %s4854_s17  ;;  %p4861_p11 = scmp.lt.u32.totalorder %s4854_s17, %s6658_s2 }
  0x6c   : > { %p4857_p8 = pnand %p4855_p6, %p5173_p2 }
  0x6e   : > { %p4858_p10 = pneg %p4857_p8 }
  0x70   : > { %p4863_p1 = pnand %p4861_p11, %p4858_p10 }
  0x72   : > { %4866 = shalt.err (!%p4863_p1)
}
  0x73   : > { %s4867_s27 = scalar_lea.vmem %s276_s21, 1024  ;;  %p4875_p7 = scmp.lt.s32.totalorder %s276_s21, %s276_s21 }
  0x74   : > { %p4868_p3 = scmp.ne.s32.totalorder %s276_s21, %s4867_s27  ;;  %p4876_p9 = scmp.lt.s32.totalorder %s4867_s27, %s4867_s27 }
  0x76   : > { %p4870_p4 = pnand %p4868_p3, %p5173_p2  ;;  %p4877_p12 = por %p4876_p9, %p4875_p7 }
  0x78   : > { %p4871_p5 = pneg %p4870_p4 }
  0x7a   : > { %p4878_p13 = pnand %p4877_p12, %p4871_p5 }
  0x7c   : > { %4881 = shalt.err (!%p4878_p13)
}
  0x7d   : > { %4330 = dma.hbm_to_vmem [thread:$0]  (!%p5161_p0), %s6658_s2, 1024, %s276_s21, [#allocation12], %s5020_s11, %s5020_s11, %s5021_s13  }
  0x7e   : > { %s5024_s1 = smov [#allocation16]   ;;  %s4882_s17 = scalar_lea.hbm %s6662_s6, 2048 }
  0x7f   : > { %s307_s12 = sshll.u32 %s5024_s1, 4  ;;  %p4883_p6 = scmp.ne.s32.totalorder %s6662_s6, %s4882_s17  ;;  %s308_s12 = int_to_ptr.vmem [resolvable:$true] %s307_s12 }
  0x80   : > { %p4889_p11 = scmp.lt.u32.totalorder %s4882_s17, %s6662_s6 }
  0x81   : > { %p4885_p8 = pnand %p4883_p6, %p5173_p2 }
  0x83   : > { %p4886_p10 = pneg %p4885_p8 }
  0x85   : > { %p4891_p1 = pnand %p4889_p11, %p4886_p10 }
  0x87   : > { %4894 = shalt.err (!%p4891_p1)
}
  0x88   : > { %s4895_s21 = scalar_lea.vmem %s308_s12, 2048  ;;  %p4903_p7 = scmp.lt.s32.totalorder %s308_s12, %s308_s12 }
  0x89   : > { %p4896_p3 = scmp.ne.s32.totalorder %s308_s12, %s4895_s21  ;;  %p4904_p9 = scmp.lt.s32.totalorder %s4895_s21, %s4895_s21 }
  0x8b   : > { %p4898_p4 = pnand %p4896_p3, %p5173_p2  ;;  %p4905_p12 = por %p4904_p9, %p4903_p7 }
  0x8d   : > { %p4899_p5 = pneg %p4898_p4 }
  0x8f   : > { %p4906_p13 = pnand %p4905_p12, %p4899_p5 }
  0x91   : > { %4909 = shalt.err (!%p4906_p13)
}
  0x92   : > { %4336 = dma.hbm_to_vmem [thread:$0]  (!%p5161_p0), %s6662_s6, 2048, %s308_s12, [#allocation15], %s5020_s11, %s5020_s11, %s5021_s13  }
  0x93   : > { %p6734_p6 = scmp.ne.s32.totalorder %s6728_s22, 0 }
  0x94   : > { %p6735_p2 = scmp.ne.s32.totalorder (!%p6734_p6), %s6729_s23, 0 }
  0x95   : > { %326 = sbr.rel (%p6734_p6) target bundleno = 2363 (0x93b), region = 52 }
  0x9c   : > { %4971 = dma.done.wait (%p6735_p2), [#allocation9], 2048  }
  0x9d   : > { %4973 = vsyncadd (%p6735_p2), [#allocation9], 4294965248 }
  0x9e   : > { %4975 = dma.done.wait (%p6735_p2), [#allocation12], 3072  }
  0x9f   : > { %4977 = vsyncadd (%p6735_p2), [#allocation12], 4294964224 }
  0xa0   : > { %4979 = dma.done.wait (%p6735_p2), [#allocation15], 3072  }
  0xa1   : > { %4981 = vsyncadd (%p6735_p2), [#allocation15], 4294964224  ;;  %s368_s22 = sand.u32 1, %s4992_s28   ;;  %s5292_s26 = sshll.u32 %s5000_s30, 7 }
  0xa2   : > { %s3746_s18 = sshll.u32 %s368_s22, 7  ;;  %p375_p0 = scmp.eq.s32.totalorder %s5004_s9, 0 }
  0xa3   : > { %p376_p8 = scmp.eq.s32.totalorder %s5000_s30, 0  ;;  %s5298_s11 = scalar_lea.vmem [#allocation17], %s3746_s18 }
  0xa5   : > { %p377_p10 = pnand %p376_p8, %p375_p0 }
  0xa6   : > { %vm381_vm0 = vcmask (!%p377_p10), 7168   ;;  %v5300_v0 = vld [vmem:[#allocation14] sm:$0xff] (!%p377_p10)   ;;  %v5025_v1 = vmov (!%p377_p10), -inf   ;;  %v5026_v2 = vmov (!%p377_p10), 0.0   ;;  %v4431_v3 = vld [vmem:[#allocation14 + $0x8] sm:$0xff] (!%p377_p10)   ;;  %v4432_v4 = vld [vmem:[#allocation14 + $0x10] sm:$0xff] (!%p377_p10)  }
  0xa7   : > { %380 = sbr.rel (%p377_p10) target bundleno = 443 (0x1bb), region = 76  ;;  %382 = vst.msk [vmem:[#allocation5] sm:$0xff] (!%p377_p10), %vm381_vm0, %v5025_v1  ;;  %383 = vst.msk [vmem:[#allocation5 + $0x8] sm:$0xff] (!%p377_p10), %vm381_vm0, %v5025_v1  ;;  %4091 = vmatprep.subr.bf16.mxu0 (!%p377_p10), %v5300_v0  ;;  %4267 = vmatprep.subr.bf16.mxu1 (!%p377_p10), %v5300_v0  ;;  %v4433_v5 = vld [vmem:[#allocation14 + $0x18] sm:$0xff] (!%p377_p10)   ;;  %v4438_v6 = vld [vmem:[#allocation11] sm:$0xff] (!%p377_p10)  }
  0xa8   : > { %384 = vst.msk [vmem:[#allocation5 + $0x10] sm:$0xff] (!%p377_p10), %vm381_vm0, %v5025_v1  ;;  %385 = vst.msk [vmem:[#allocation5 + $0x18] sm:$0xff] (!%p377_p10), %vm381_vm0, %v5025_v1  ;;  %4092 = vmatpush3.bf16.msra.mxu0 (!%p377_p10), %v5300_v0  ;;  %4275 = vmatpush3.bf16.msra.mxu1 (!%p377_p10), %v5300_v0  ;;  %v4439_v7 = vld [vmem:[#allocation11 + $0x40] sm:$0xff] (!%p377_p10)   ;;  %v4435_v9 = vld [vmem:[#allocation14 + $0x28] sm:$0xff] (!%p377_p10)  }
  0xa9   : > { %386 = vst.msk [vmem:[#allocation5 + $0x20] sm:$0xff] (!%p377_p10), %vm381_vm0, %v5025_v1  ;;  %387 = vst.msk [vmem:[#allocation5 + $0x28] sm:$0xff] (!%p377_p10), %vm381_vm0, %v5025_v1  ;;  %4093 = vmatprep.subr.bf16.mxu0 (!%p377_p10), %v4431_v3  ;;  %4268 = vmatprep.subr.bf16.mxu1 (!%p377_p10), %v4431_v3  ;;  %v4434_v8 = vld [vmem:[#allocation14 + $0x20] sm:$0xff] (!%p377_p10)   ;;  %v4436_v10 = vld [vmem:[#allocation14 + $0x30] sm:$0xff] (!%p377_p10)  }
  0xaa   : > { %388 = vst.msk [vmem:[#allocation5 + $0x30] sm:$0xff] (!%p377_p10), %vm381_vm0, %v5025_v1  ;;  %389 = vst.msk [vmem:[#allocation5 + $0x38] sm:$0xff] (!%p377_p10), %vm381_vm0, %v5025_v1  ;;  %4107 = vmatprep.mubr.bf16.mxu0 (!%p377_p10), %v4438_v6  ;;  %4123 = vmatprep.mubr.bf16.mxu1 (!%p377_p10), %v4439_v7  ;;  %v4437_v11 = vld [vmem:[#allocation14 + $0x38] sm:$0xff] (!%p377_p10)   ;;  %v4440_v12 = vld [vmem:[#allocation11 + $0x8] sm:$0xff] (!%p377_p10)  }
  0xab   : > { %390 = vst.msk [vmem:[#allocation5 + $0x40] sm:$0xff] (!%p377_p10), %vm381_vm0, %v5025_v1  ;;  %391 = vst.msk [vmem:[#allocation5 + $0x48] sm:$0xff] (!%p377_p10), %vm381_vm0, %v5025_v1  ;;  %v4441_v13 = vld [vmem:[#allocation11 + $0x48] sm:$0xff] (!%p377_p10)   ;;  %v4442_v14 = vld [vmem:[#allocation11 + $0x10] sm:$0xff] (!%p377_p10)  }
  0xac   : > { %392 = vst.msk [vmem:[#allocation5 + $0x50] sm:$0xff] (!%p377_p10), %vm381_vm0, %v5025_v1  ;;  %393 = vst.msk [vmem:[#allocation5 + $0x58] sm:$0xff] (!%p377_p10), %vm381_vm0, %v5025_v1  ;;  %4094 = vmatpush3.bf16.msra.mxu0 (!%p377_p10), %v4431_v3  ;;  %4276 = vmatpush3.bf16.msra.mxu1 (!%p377_p10), %v4431_v3  ;;  %v4443_v15 = vld [vmem:[#allocation11 + $0x50] sm:$0xff] (!%p377_p10)   ;;  %v4444_v16 = vld [vmem:[#allocation11 + $0x18] sm:$0xff] (!%p377_p10)  }
  0xad   : > { %394 = vst.msk [vmem:[#allocation5 + $0x60] sm:$0xff] (!%p377_p10), %vm381_vm0, %v5025_v1  ;;  %395 = vst.msk [vmem:[#allocation5 + $0x68] sm:$0xff] (!%p377_p10), %vm381_vm0, %v5025_v1  ;;  %4095 = vmatprep.subr.bf16.mxu0 (!%p377_p10), %v4432_v4  ;;  %4269 = vmatprep.subr.bf16.mxu1 (!%p377_p10), %v4432_v4  ;;  %v4445_v17 = vld [vmem:[#allocation11 + $0x58] sm:$0xff] (!%p377_p10)   ;;  %v4446_v18 = vld [vmem:[#allocation11 + $0x20] sm:$0xff] (!%p377_p10)  }
  0xae   : > { %396 = vst.msk [vmem:[#allocation5 + $0x70] sm:$0xff] %vm381_vm0, %v5025_v1  ;;  %397 = vst.msk [vmem:[#allocation5 + $0x78] sm:$0xff] %vm381_vm0, %v5025_v1  ;;  %v4447_v19 = vld [vmem:[#allocation11 + $0x60] sm:$0xff]   ;;  %v4448_v20 = vld [vmem:[#allocation11 + $0x28] sm:$0xff]  }
  0xaf   : > { %398 = vst.msk [vmem:[#allocation5 + $0x80] sm:$0xff] %vm381_vm0, %v5025_v1  ;;  %399 = vst.msk [vmem:[#allocation5 + $0x88] sm:$0xff] %vm381_vm0, %v5025_v1  ;;  %v4449_v21 = vld [vmem:[#allocation11 + $0x68] sm:$0xff]   ;;  %v4450_v22 = vld [vmem:[#allocation11 + $0x30] sm:$0xff]  }
  0xb0   : > { %400 = vst.msk [vmem:[#allocation5 + $0x90] sm:$0xff] %vm381_vm0, %v5025_v1  ;;  %401 = vst.msk [vmem:[#allocation5 + $0x98] sm:$0xff] %vm381_vm0, %v5025_v1  ;;  %4096 = vmatpush3.bf16.msra.mxu0 %v4432_v4  ;;  %4277 = vmatpush3.bf16.msra.mxu1 %v4432_v4  ;;  %v4451_v23 = vld [vmem:[#allocation11 + $0x70] sm:$0xff]   ;;  %v4452_v24 = vld [vmem:[#allocation11 + $0x38] sm:$0xff]  }
  0xb1   : > { %402 = vst.msk [vmem:[#allocation5 + $0xa0] sm:$0xff] %vm381_vm0, %v5025_v1  ;;  %403 = vst.msk [vmem:[#allocation5 + $0xa8] sm:$0xff] %vm381_vm0, %v5025_v1  ;;  %4097 = vmatprep.subr.bf16.mxu0 %v4433_v5  ;;  %4270 = vmatprep.subr.bf16.mxu1 %v4433_v5  ;;  %v4453_v25 = vld [vmem:[#allocation11 + $0x78] sm:$0xff]   ;;  %v5437_v27 = vld [vmem:[%s6661_s5] ss:$0 sm:$0xff] }
  0xb2   : > { %404 = vst.msk [vmem:[#allocation5 + $0xb0] sm:$0xff] %vm381_vm0, %v5025_v1  ;;  %405 = vst.msk [vmem:[#allocation5 + $0xb8] sm:$0xff] %vm381_vm0, %v5025_v1 }
  0xb3   : > { %406 = vst.msk [vmem:[#allocation5 + $0xc0] sm:$0xff] %vm381_vm0, %v5025_v1  ;;  %407 = vst.msk [vmem:[#allocation5 + $0xc8] sm:$0xff] %vm381_vm0, %v5025_v1 }
  0xb4   : > { %408 = vst.msk [vmem:[#allocation5 + $0xd0] sm:$0xff] %vm381_vm0, %v5025_v1  ;;  %409 = vst.msk [vmem:[#allocation5 + $0xd8] sm:$0xff] %vm381_vm0, %v5025_v1  ;;  %4098 = vmatpush3.bf16.msra.mxu0 %v4433_v5  ;;  %4278 = vmatpush3.bf16.msra.mxu1 %v4433_v5 }
  0xb5   : > { %410 = vst.msk [vmem:[#allocation5 + $0xe0] sm:$0xff] %vm381_vm0, %v5025_v1  ;;  %411 = vst.msk [vmem:[#allocation5 + $0xe8] sm:$0xff] %vm381_vm0, %v5025_v1  ;;  %4099 = vmatprep.subr.bf16.mxu0 %v4434_v8  ;;  %4271 = vmatprep.subr.bf16.mxu1 %v4434_v8 }
  0xb6   : > { %412 = vst.msk [vmem:[#allocation5 + $0xf0] sm:$0xff] %vm381_vm0, %v5025_v1  ;;  %413 = vst.msk [vmem:[#allocation5 + $0xf8] sm:$0xff] %vm381_vm0, %v5025_v1 }
  0xb7   : > { %414 = vst.msk [vmem:[#allocation6] sm:$0xff] %vm381_vm0, %v5026_v2  ;;  %415 = vst.msk [vmem:[#allocation6 + $0x8] sm:$0xff] %vm381_vm0, %v5026_v2 }
  0xb8   : > { %416 = vst.msk [vmem:[#allocation6 + $0x10] sm:$0xff] %vm381_vm0, %v5026_v2  ;;  %417 = vst.msk [vmem:[#allocation6 + $0x18] sm:$0xff] %vm381_vm0, %v5026_v2  ;;  %4100 = vmatpush3.bf16.msra.mxu0 %v4434_v8  ;;  %4279 = vmatpush3.bf16.msra.mxu1 %v4434_v8 }
  0xb9   : > { %418 = vst.msk [vmem:[#allocation6 + $0x20] sm:$0xff] %vm381_vm0, %v5026_v2  ;;  %419 = vst.msk [vmem:[#allocation6 + $0x28] sm:$0xff] %vm381_vm0, %v5026_v2  ;;  %4101 = vmatprep.subr.bf16.mxu0 %v4435_v9  ;;  %4272 = vmatprep.subr.bf16.mxu1 %v4435_v9 }
  0xba   : > { %420 = vst.msk [vmem:[#allocation6 + $0x30] sm:$0xff] %vm381_vm0, %v5026_v2  ;;  %421 = vst.msk [vmem:[#allocation6 + $0x38] sm:$0xff] %vm381_vm0, %v5026_v2 }
  0xbb   : > { %422 = vst.msk [vmem:[#allocation6 + $0x40] sm:$0xff] %vm381_vm0, %v5026_v2  ;;  %423 = vst.msk [vmem:[#allocation6 + $0x48] sm:$0xff] %vm381_vm0, %v5026_v2 }
  0xbc   : > { %424 = vst.msk [vmem:[#allocation6 + $0x50] sm:$0xff] %vm381_vm0, %v5026_v2  ;;  %425 = vst.msk [vmem:[#allocation6 + $0x58] sm:$0xff] %vm381_vm0, %v5026_v2  ;;  %4102 = vmatpush3.bf16.msra.mxu0 %v4435_v9  ;;  %4280 = vmatpush3.bf16.msra.mxu1 %v4435_v9 }
  0xbd   : > { %426 = vst.msk [vmem:[#allocation6 + $0x60] sm:$0xff] %vm381_vm0, %v5026_v2  ;;  %427 = vst.msk [vmem:[#allocation6 + $0x68] sm:$0xff] %vm381_vm0, %v5026_v2  ;;  %4103 = vmatprep.subr.bf16.mxu0 %v4436_v10  ;;  %4273 = vmatprep.subr.bf16.mxu1 %v4436_v10 }
  0xbe   : > { %428 = vst.msk [vmem:[#allocation6 + $0x70] sm:$0xff] %vm381_vm0, %v5026_v2  ;;  %429 = vst.msk [vmem:[#allocation6 + $0x78] sm:$0xff] %vm381_vm0, %v5026_v2 }
  0xbf   : > { %430 = vst.msk [vmem:[#allocation6 + $0x80] sm:$0xff] %vm381_vm0, %v5026_v2  ;;  %431 = vst.msk [vmem:[#allocation6 + $0x88] sm:$0xff] %vm381_vm0, %v5026_v2 }
  0xc0   : > { %432 = vst.msk [vmem:[#allocation6 + $0x90] sm:$0xff] %vm381_vm0, %v5026_v2  ;;  %433 = vst.msk [vmem:[#allocation6 + $0x98] sm:$0xff] %vm381_vm0, %v5026_v2  ;;  %4104 = vmatpush3.bf16.msra.mxu0 %v4436_v10  ;;  %4281 = vmatpush3.bf16.msra.mxu1 %v4436_v10 }
  0xc1   : > { %434 = vst.msk [vmem:[#allocation6 + $0xa0] sm:$0xff] %vm381_vm0, %v5026_v2  ;;  %435 = vst.msk [vmem:[#allocation6 + $0xa8] sm:$0xff] %vm381_vm0, %v5026_v2  ;;  %4105 = vmatprep.subr.bf16.mxu0 %v4437_v11  ;;  %4274 = vmatprep.subr.bf16.mxu1 %v4437_v11 }
  0xc2   : > { %436 = vst.msk [vmem:[#allocation6 + $0xb0] sm:$0xff] %vm381_vm0, %v5026_v2  ;;  %437 = vst.msk [vmem:[#allocation6 + $0xb8] sm:$0xff] %vm381_vm0, %v5026_v2 }
  0xc3   : > { %438 = vst.msk [vmem:[#allocation6 + $0xc0] sm:$0xff] %vm381_vm0, %v5026_v2  ;;  %439 = vst.msk [vmem:[#allocation6 + $0xc8] sm:$0xff] %vm381_vm0, %v5026_v2 }
  0xc4   : > { %440 = vst.msk [vmem:[#allocation6 + $0xd0] sm:$0xff] %vm381_vm0, %v5026_v2  ;;  %441 = vst.msk [vmem:[#allocation6 + $0xd8] sm:$0xff] %vm381_vm0, %v5026_v2  ;;  %4106 = vmatpush3.bf16.msra.mxu0 %v4437_v11  ;;  %4282 = vmatpush3.bf16.msra.mxu1 %v4437_v11 }
  0xc5   : > { %442 = vst.msk [vmem:[#allocation6 + $0xe0] sm:$0xff] %vm381_vm0, %v5026_v2  ;;  %443 = vst.msk [vmem:[#allocation6 + $0xe8] sm:$0xff] %vm381_vm0, %v5026_v2 }
  0xc6   : > { %444 = vst.msk [vmem:[#allocation6 + $0xf0] sm:$0xff] %vm381_vm0, %v5026_v2  ;;  %445 = vst.msk [vmem:[#allocation6 + $0xf8] sm:$0xff] %vm381_vm0, %v5026_v2 }
  0xc7   : > { %446 = vst [vmem:[#allocation4] sm:$0xff] %v5026_v2  ;;  %447 = vst [vmem:[#allocation4 + $0x8] sm:$0xff] %v5026_v2  ;;  %4108 = vmatmul.mubr.bf16.vlgmr.msra.gmra.mrb[0].mxu0 %v4440_v12  ;;  %4124 = vmatmul.mubr.bf16.vlgmr.msra.gmra.mrb[0].mxu1 %v4441_v13 }
  0xc8   : > { %448 = vst [vmem:[#allocation4 + $0x10] sm:$0xff] %v5026_v2  ;;  %449 = vst [vmem:[#allocation4 + $0x18] sm:$0xff] %v5026_v2  ;;  %4111 = vmatprep.mubr.bf16.mxu0 %v4442_v14  ;;  %4127 = vmatprep.mubr.bf16.mxu1 %v4443_v15 }
  0xc9   : > { %450 = vst [vmem:[#allocation4 + $0x20] sm:$0xff] %v5026_v2  ;;  %451 = vst [vmem:[#allocation4 + $0x28] sm:$0xff] %v5026_v2 }
  0xca   : > { %452 = vst [vmem:[#allocation4 + $0x30] sm:$0xff] %v5026_v2  ;;  %453 = vst [vmem:[#allocation4 + $0x38] sm:$0xff] %v5026_v2 }
  0xcb   : > { %454 = vst [vmem:[#allocation4 + $0x40] sm:$0xff] %v5026_v2  ;;  %455 = vst [vmem:[#allocation4 + $0x48] sm:$0xff] %v5026_v2 }
  0xcc   : > { %456 = vst [vmem:[#allocation4 + $0x50] sm:$0xff] %v5026_v2  ;;  %457 = vst [vmem:[#allocation4 + $0x58] sm:$0xff] %v5026_v2 }
  0xcd   : > { %458 = vst [vmem:[#allocation4 + $0x60] sm:$0xff] %v5026_v2  ;;  %459 = vst [vmem:[#allocation4 + $0x68] sm:$0xff] %v5026_v2 }
  0xce   : > { %460 = vst [vmem:[#allocation4 + $0x70] sm:$0xff] %v5026_v2  ;;  %461 = vst [vmem:[#allocation4 + $0x78] sm:$0xff] %v5026_v2 }
  0xcf   : > { %462 = vst [vmem:[#allocation4 + $0x80] sm:$0xff] %v5026_v2  ;;  %463 = vst [vmem:[#allocation4 + $0x88] sm:$0xff] %v5026_v2  ;;  %4112 = vmatmul.mubr.bf16.gmra.mrb[4].mxu0 %v4444_v16  ;;  %4128 = vmatmul.mubr.bf16.gmra.mrb[4].mxu1 %v4445_v17 }
  0xd0   : > { %464 = vst [vmem:[#allocation4 + $0x90] sm:$0xff] %v5026_v2  ;;  %465 = vst [vmem:[#allocation4 + $0x98] sm:$0xff] %v5026_v2  ;;  %4115 = vmatprep.mubr.bf16.mxu0 %v4446_v18  ;;  %4131 = vmatprep.mubr.bf16.mxu1 %v4447_v19 }
  0xd1   : > { %466 = vst [vmem:[#allocation4 + $0xa0] sm:$0xff] %v5026_v2  ;;  %467 = vst [vmem:[#allocation4 + $0xa8] sm:$0xff] %v5026_v2 }
  0xd2   : > { %468 = vst [vmem:[#allocation4 + $0xb0] sm:$0xff] %v5026_v2  ;;  %469 = vst [vmem:[#allocation4 + $0xb8] sm:$0xff] %v5026_v2 }
  0xd3   : > { %470 = vst [vmem:[#allocation4 + $0xc0] sm:$0xff] %v5026_v2  ;;  %471 = vst [vmem:[#allocation4 + $0xc8] sm:$0xff] %v5026_v2 }
  0xd4   : > { %472 = vst [vmem:[#allocation4 + $0xd0] sm:$0xff] %v5026_v2  ;;  %473 = vst [vmem:[#allocation4 + $0xd8] sm:$0xff] %v5026_v2 }
  0xd5   : > { %474 = vst [vmem:[#allocation4 + $0xe0] sm:$0xff] %v5026_v2  ;;  %475 = vst [vmem:[#allocation4 + $0xe8] sm:$0xff] %v5026_v2 }
  0xd6   : > { %476 = vst [vmem:[#allocation4 + $0xf0] sm:$0xff] %v5026_v2  ;;  %477 = vst [vmem:[#allocation4 + $0xf8] sm:$0xff] %v5026_v2 }
  0xd7   : > { %4116 = vmatmul.mubr.bf16.gmra.mrb[8].mxu0 %v4448_v20  ;;  %4132 = vmatmul.mubr.bf16.gmra.mrb[8].mxu1 %v4449_v21 }
  0xd8   : > { %4119 = vmatprep.mubr.bf16.mxu0 %v4450_v22  ;;  %4135 = vmatprep.mubr.bf16.mxu1 %v4451_v23 }
  0xdf   : > { %4120 = vmatmul.mubr.bf16.gmra.mrb[12].mxu0 %v4452_v24  ;;  %4136 = vmatmul.mubr.bf16.gmra.mrb[12].mxu1 %v4453_v25 }
 0x19a   : > { %v4109_v26 = vpop.f32.mrb[0].mxu0  ;;  %v4125_v28 = vpop.f32.mrb[0].mxu1 }
 0x19b   : > { %v711_v29 = vpop.f32.mrb[1].mxu0  ;;  %v775_v30 = vpop.f32.mrb[1].mxu1  ;;  %v720_v33 = vadd.f32 %v4109_v26, %v5437_v27  ;;  %v784_v34 = vadd.f32 %v4125_v28, %v5437_v27 }
 0x19c   : > { %v4110_v31 = vpop.f32.mrb[2].mxu0  ;;  %v4126_v32 = vpop.f32.mrb[2].mxu1  ;;  %v712_v39 = vadd.f32 %v5437_v27, %v711_v29  ;;  %v776_v40 = vadd.f32 %v5437_v27, %v775_v30 }
 0x19d   : > { %v723_v35 = vadd.f32 %v4110_v31, %v5437_v27  ;;  %v787_v36 = vadd.f32 %v4126_v32, %v5437_v27  ;;  %v714_v37 = vpop.f32.mrb[3].mxu0  ;;  %v778_v38 = vpop.f32.mrb[3].mxu1 }
 0x19e   : > { %v715_v41 = vadd.f32 %v5437_v27, %v714_v37  ;;  %v779_v42 = vadd.f32 %v5437_v27, %v778_v38 }
 0x19f   : > { %v839_v43 = vpack.c.bf16 %v723_v35, %v720_v33  ;;  %v847_v44 = vpack.c.bf16 %v787_v36, %v784_v34 }
 0x1a0   : > { %v838_v45 = vpack.c.bf16 %v715_v41, %v712_v39  ;;  %v846_v46 = vpack.c.bf16 %v779_v42, %v776_v40 }
 0x1a1   : > { %855 = vst [vmem:[#allocation2 + $0x8] sm:$0xff] %v839_v43  ;;  %863 = vst [vmem:[#allocation2 + $0x48] sm:$0xff] %v847_v44 }
 0x1a2   : > { %854 = vst [vmem:[#allocation2] sm:$0xff] %v838_v45  ;;  %862 = vst [vmem:[#allocation2 + $0x40] sm:$0xff] %v846_v46  ;;  %v4113_v47 = vpop.f32.mrb[4].mxu0  ;;  %v4129_v48 = vpop.f32.mrb[4].mxu1 }
 0x1a3   : > { %v727_v49 = vpop.f32.mrb[5].mxu0  ;;  %v791_v50 = vpop.f32.mrb[5].mxu1  ;;  %v736_v53 = vadd.f32 %v4113_v47, %v5437_v27  ;;  %v800_v54 = vadd.f32 %v4129_v48, %v5437_v27 }
 0x1a4   : > { %v4114_v51 = vpop.f32.mrb[6].mxu0  ;;  %v4130_v52 = vpop.f32.mrb[6].mxu1  ;;  %v728_v59 = vadd.f32 %v5437_v27, %v727_v49  ;;  %v792_v60 = vadd.f32 %v5437_v27, %v791_v50 }
 0x1a5   : > { %v739_v55 = vadd.f32 %v4114_v51, %v5437_v27  ;;  %v803_v56 = vadd.f32 %v4130_v52, %v5437_v27  ;;  %v730_v57 = vpop.f32.mrb[7].mxu0  ;;  %v794_v58 = vpop.f32.mrb[7].mxu1 }
 0x1a6   : > { %v731_v61 = vadd.f32 %v5437_v27, %v730_v57  ;;  %v795_v62 = vadd.f32 %v5437_v27, %v794_v58 }
 0x1a7   : > { %v841_v63 = vpack.c.bf16 %v739_v55, %v736_v53  ;;  %v849_v0 = vpack.c.bf16 %v803_v56, %v800_v54 }
 0x1a8   : > { %v840_v1 = vpack.c.bf16 %v731_v61, %v728_v59  ;;  %v848_v2 = vpack.c.bf16 %v795_v62, %v792_v60 }
 0x1a9   : > { %857 = vst [vmem:[#allocation2 + $0x18] sm:$0xff] %v841_v63  ;;  %865 = vst [vmem:[#allocation2 + $0x58] sm:$0xff] %v849_v0 }
 0x1aa   : > { %856 = vst [vmem:[#allocation2 + $0x10] sm:$0xff] %v840_v1  ;;  %864 = vst [vmem:[#allocation2 + $0x50] sm:$0xff] %v848_v2  ;;  %v4117_v3 = vpop.f32.mrb[8].mxu0  ;;  %v4133_v4 = vpop.f32.mrb[8].mxu1 }
 0x1ab   : > { %v743_v5 = vpop.f32.mrb[9].mxu0  ;;  %v807_v6 = vpop.f32.mrb[9].mxu1  ;;  %v752_v9 = vadd.f32 %v4117_v3, %v5437_v27  ;;  %v816_v10 = vadd.f32 %v4133_v4, %v5437_v27 }
 0x1ac   : > { %v4118_v7 = vpop.f32.mrb[10].mxu0  ;;  %v4134_v8 = vpop.f32.mrb[10].mxu1  ;;  %v744_v15 = vadd.f32 %v5437_v27, %v743_v5  ;;  %v808_v16 = vadd.f32 %v5437_v27, %v807_v6 }
 0x1ad   : > { %v755_v11 = vadd.f32 %v4118_v7, %v5437_v27  ;;  %v819_v12 = vadd.f32 %v4134_v8, %v5437_v27  ;;  %v746_v13 = vpop.f32.mrb[11].mxu0  ;;  %v810_v14 = vpop.f32.mrb[11].mxu1 }
 0x1ae   : > { %v747_v17 = vadd.f32 %v5437_v27, %v746_v13  ;;  %v811_v18 = vadd.f32 %v5437_v27, %v810_v14 }
 0x1af   : > { %v843_v19 = vpack.c.bf16 %v755_v11, %v752_v9  ;;  %v851_v20 = vpack.c.bf16 %v819_v12, %v816_v10 }
 0x1b0   : > { %v842_v21 = vpack.c.bf16 %v747_v17, %v744_v15  ;;  %v850_v22 = vpack.c.bf16 %v811_v18, %v808_v16 }
 0x1b1   : > { %859 = vst [vmem:[#allocation2 + $0x28] sm:$0xff] %v843_v19  ;;  %867 = vst [vmem:[#allocation2 + $0x68] sm:$0xff] %v851_v20 }
 0x1b2   : > { %858 = vst [vmem:[#allocation2 + $0x20] sm:$0xff] %v842_v21  ;;  %866 = vst [vmem:[#allocation2 + $0x60] sm:$0xff] %v850_v22  ;;  %v4121_v23 = vpop.f32.mrb[12].mxu0  ;;  %v4137_v24 = vpop.f32.mrb[12].mxu1 }
 0x1b3   : > { %v759_v25 = vpop.f32.mrb[13].mxu0  ;;  %v823_v26 = vpop.f32.mrb[13].mxu1  ;;  %v768_v30 = vadd.f32 %v4121_v23, %v5437_v27  ;;  %v832_v31 = vadd.f32 %v4137_v24, %v5437_v27 }
 0x1b4   : > { %v4122_v28 = vpop.f32.mrb[14].mxu0  ;;  %v4138_v29 = vpop.f32.mrb[14].mxu1  ;;  %v760_v36 = vadd.f32 %v5437_v27, %v759_v25  ;;  %v824_v37 = vadd.f32 %v5437_v27, %v823_v26 }
 0x1b5   : > { %v771_v32 = vadd.f32 %v4122_v28, %v5437_v27  ;;  %v835_v33 = vadd.f32 %v4138_v29, %v5437_v27  ;;  %v762_v34 = vpop.f32.mrb[15].mxu0  ;;  %v826_v35 = vpop.f32.mrb[15].mxu1 }
 0x1b6   : > { %v763_v38 = vadd.f32 %v5437_v27, %v762_v34  ;;  %v827_v39 = vadd.f32 %v5437_v27, %v826_v35 }
 0x1b7   : > { %v845_v40 = vpack.c.bf16 %v771_v32, %v768_v30  ;;  %v853_v41 = vpack.c.bf16 %v835_v33, %v832_v31 }
 0x1b8   : > { %v844_v42 = vpack.c.bf16 %v763_v38, %v760_v36  ;;  %v852_v43 = vpack.c.bf16 %v827_v39, %v824_v37 }
 0x1b9   : > { %861 = vst [vmem:[#allocation2 + $0x38] sm:$0xff] %v845_v40  ;;  %869 = vst [vmem:[#allocation2 + $0x78] sm:$0xff] %v853_v41 }
 0x1ba   : > { %860 = vst [vmem:[#allocation2 + $0x30] sm:$0xff] %v844_v42  ;;  %868 = vst [vmem:[#allocation2 + $0x70] sm:$0xff] %v852_v43 }
 0x1bb PF: > { %p3773_p11 = scmp.ne.s32.totalorder %s5004_s9, 0 }
 0x1bd   : > { %872 = sbr.rel (%p3773_p11) target bundleno = 1940 (0x794), region = 80 }
 0x1c4   : > { %v4456_v44 = vld [vmem:[#allocation13] sm:$0xff]   ;;  %s873_s15 = sshra.s32 %s5292_s26, 3  ;;  %v4457_v45 = vld [vmem:[#allocation13 + $0x8] sm:$0xff]   ;;  %v4458_v27 = vld [vmem:[#allocation13 + $0x10] sm:$0xff]   ;;  %s1737_s24 = sshra.s32 %s5292_s26, 4  ;;  %vm2550_vm1 = vcmask 7168  }
 0x1c5   : > { %4139 = vmatprep.subr.bf16.mxu0 %v4456_v44  ;;  %s5473_s1 = sshll.u32 %s873_s15, 2  ;;  %v4459_v46 = vld [vmem:[#allocation13 + $0x18] sm:$0xff]   ;;  %v4460_v48 = vld [vmem:[#allocation13 + $0x20] sm:$0xff]   ;;  %v4461_v49 = vld [vmem:[#allocation13 + $0x28] sm:$0xff]   ;;  %s3809_s14 = sshll.u32 %s1737_s24, 3 }
 0x1c6   : > { %4140 = vmatpush3.bf16.msra.mxu0 %v4456_v44  ;;  %s5476_s12 = scalar_lea.vmem [#allocation8], %s5473_s1  ;;  %v5479_v50 = vld [vmem:[#allocation2 + $0x40] sm:$0xff]  ;;  %v5483_v52 = vld [vmem:[#allocation2 + $0x48] sm:$0xff]  ;;  %v4462_v53 = vld [vmem:[#allocation13 + $0x30] sm:$0xff]   ;;  %s5503_s29 = scalar_lea.vmem [#allocation11], %s5473_s1 }
 0x1c7   : > { %4141 = vmatprep.subr.bf16.mxu0 %v4457_v45  ;;  %v4464_v47 = vld [vmem:[%s5476_s12] sm:$0xff]   ;;  %3883 = vmatprep.subr.bf16.mxu1 %v5479_v50  ;;  %v4463_v54 = vld [vmem:[#allocation13 + $0x38] sm:$0xff]   ;;  %v5488_v55 = vld [vmem:[#allocation2 + $0x8] sm:$0xff]  ;;  %s5733_s10 = scalar_lea.vmem [#allocation3], %s3809_s14 }
 0x1c8   : > { %4155 = vmatprep.mubr.bf16.mxu0 %v4464_v47  ;;  %v5481_v51 = vld [vmem:[#allocation2] sm:$0xff]  ;;  %v5490_v56 = vld [vmem:[#allocation2 + $0x50] sm:$0xff]  ;;  %v4465_v57 = vld [vmem:[%s5476_s12 + $0x8] sm:$0xff]  }
 0x1c9   : > { %3884 = vmatpush3.bf16.xpose.msra.mxu1 %v5481_v51  ;;  %v4472_v58 = vld [vmem:[#allocation8 + $0x40] sm:$0xff]   ;;  %v4466_v59 = vld [vmem:[%s5476_s12 + $0x10] sm:$0xff]   ;;  %v5498_v61 = vld [vmem:[#allocation2 + $0x58] sm:$0xff] }
 0x1ca   : > { %4142 = vmatpush3.bf16.msra.mxu0 %v4457_v45  ;;  %3885 = vmatprep.subr.bf16.mxu1 %v5483_v52  ;;  %v5496_v60 = vld [vmem:[#allocation2 + $0x10] sm:$0xff]  ;;  %6736 = vst [vmem:[#allocation31_spill] sm:$0xff] %v5498_v61  ;;  %v4473_v62 = vld [vmem:[#allocation8] sm:$0xff]   ;;  %v4474_v63 = vld [vmem:[#allocation8 + $0x48] sm:$0xff]  }
 0x1cb   : > { %4143 = vmatprep.subr.bf16.mxu0 %v4458_v27  ;;  %v4475_v0 = vld [vmem:[#allocation8 + $0x8] sm:$0xff]   ;;  %v4476_v1 = vld [vmem:[#allocation8 + $0x50] sm:$0xff]   ;;  %v4467_v2 = vld [vmem:[%s5476_s12 + $0x18] sm:$0xff]  }
 0x1cc   : > { %v4468_v3 = vld [vmem:[%s5476_s12 + $0x20] sm:$0xff]   ;;  %v5507_v4 = vld [vmem:[#allocation2 + $0x18] sm:$0xff]  ;;  %v4477_v6 = vld [vmem:[#allocation8 + $0x10] sm:$0xff]  }
 0x1cd   : > { %v5509_v5 = vld [vmem:[#allocation2 + $0x60] sm:$0xff]  ;;  %v4478_v7 = vld [vmem:[#allocation8 + $0x58] sm:$0xff]   ;;  %v4469_v10 = vld [vmem:[%s5476_s12 + $0x28] sm:$0xff]  }
 0x1ce   : > { %4144 = vmatpush3.bf16.msra.mxu0 %v4458_v27  ;;  %6737 = vst [vmem:[#allocation32_spill] sm:$0xff] %v5509_v5  ;;  %v4479_v8 = vld [vmem:[#allocation8 + $0x18] sm:$0xff]   ;;  %v4480_v9 = vld [vmem:[#allocation8 + $0x60] sm:$0xff]   ;;  %v4470_v11 = vld [vmem:[%s5476_s12 + $0x30] sm:$0xff]  }
 0x1cf   : > { %4145 = vmatprep.subr.bf16.mxu0 %v4459_v46  ;;  %v5515_v12 = vld [vmem:[#allocation2 + $0x20] sm:$0xff]  ;;  %v5517_v13 = vld [vmem:[#allocation2 + $0x68] sm:$0xff]  ;;  %v4471_v17 = vld [vmem:[%s5476_s12 + $0x38] sm:$0xff]  }
 0x1d0   : > { %6738 = vst [vmem:[#allocation33_spill] sm:$0xff] %v5517_v13  ;;  %v4481_v14 = vld [vmem:[#allocation8 + $0x20] sm:$0xff]   ;;  %v4482_v15 = vld [vmem:[#allocation8 + $0x68] sm:$0xff]   ;;  %v5524_v19 = vld [vmem:[#allocation2 + $0x70] sm:$0xff] }
 0x1d1   : > { %3886 = vmatpush3.bf16.xpose.msra.mxu1 %v5488_v55  ;;  %v4483_v16 = vld [vmem:[#allocation8 + $0x28] sm:$0xff]   ;;  %6739 = vst [vmem:[#allocation34_spill] sm:$0xff] %v5524_v19  ;;  %v5528_v20 = vld [vmem:[#allocation2 + $0x30] sm:$0xff]  ;;  %v5531_v21 = vld [vmem:[#allocation2 + $0x78] sm:$0xff] }
 0x1d2   : > { %4146 = vmatpush3.bf16.msra.mxu0 %v4459_v46  ;;  %3887 = vmatprep.subr.bf16.mxu1 %v5490_v56  ;;  %v5522_v18 = vld [vmem:[#allocation2 + $0x28] sm:$0xff]  ;;  %6740 = vst [vmem:[#allocation35_spill] sm:$0xff] %v5531_v21  ;;  %v4484_v22 = vld [vmem:[#allocation8 + $0x70] sm:$0xff]   ;;  %v5534_v23 = vld [vmem:[#allocation2 + $0x38] sm:$0xff] }
 0x1d3   : > { %4147 = vmatprep.subr.bf16.mxu0 %v4460_v48  ;;  %v4485_v24 = vld [vmem:[#allocation8 + $0x30] sm:$0xff]   ;;  %v4486_v25 = vld [vmem:[#allocation8 + $0x78] sm:$0xff]   ;;  %v3776_v29 = vld [vmem:[%s6659_s3] ss:$0 sm:$0xff] }
 0x1d4   : > { %v4487_v26 = vld [vmem:[#allocation8 + $0x38] sm:$0xff]  }
 0x1d6   : > { %4148 = vmatpush3.bf16.msra.mxu0 %v4460_v48 }
 0x1d7   : > { %4149 = vmatprep.subr.bf16.mxu0 %v4461_v49 }
 0x1d9   : > { %3888 = vmatpush3.bf16.xpose.msra.mxu1 %v5496_v60 }
 0x1da   : > { %4150 = vmatpush3.bf16.msra.mxu0 %v4461_v49  ;;  %3889 = vmatprep.subr.bf16.mxu1 %v5498_v61 }
 0x1db   : > { %4151 = vmatprep.subr.bf16.mxu0 %v4462_v53 }
 0x1de   : > { %4152 = vmatpush3.bf16.msra.mxu0 %v4462_v53 }
 0x1df   : > { %4153 = vmatprep.subr.bf16.mxu0 %v4463_v54 }
 0x1e1   : > { %3890 = vmatpush3.bf16.xpose.msra.mxu1 %v5507_v4 }
 0x1e2   : > { %4154 = vmatpush3.bf16.msra.mxu0 %v4463_v54  ;;  %3891 = vmatprep.subr.bf16.mxu1 %v5509_v5 }
 0x1e3   : > { %3915 = vmatprep.subr.bf16.mxu0 %v4472_v58 }
 0x1e5   : > { %4156 = vmatmul.mubr.bf16.vlgmr.msra.gmra.mrb[0].mxu0 %v4465_v57 }
 0x1e6   : > { %4159 = vmatprep.mubr.bf16.mxu0 %v4466_v59  ;;  %3916 = vmatpush3.bf16.msra.mxu0 %v4473_v62 }
 0x1e7   : > { %3917 = vmatprep.subr.bf16.mxu0 %v4474_v63 }
 0x1e9   : > { %3892 = vmatpush3.bf16.xpose.msra.mxu1 %v5515_v12 }
 0x1ea   : > { %3918 = vmatpush3.bf16.msra.mxu0 %v4475_v0  ;;  %3893 = vmatprep.subr.bf16.mxu1 %v5517_v13 }
 0x1eb   : > { %3919 = vmatprep.subr.bf16.mxu0 %v4476_v1 }
 0x1ed   : > { %4160 = vmatmul.mubr.bf16.gmra.mrb[4].mxu0 %v4467_v2 }
 0x1ee   : > { %4163 = vmatprep.mubr.bf16.mxu0 %v4468_v3  ;;  %3920 = vmatpush3.bf16.msra.mxu0 %v4477_v6 }
 0x1ef   : > { %3921 = vmatprep.subr.bf16.mxu0 %v4478_v7 }
 0x1f1   : > { %3894 = vmatpush3.bf16.xpose.msra.mxu1 %v5522_v18 }
 0x1f2   : > { %3922 = vmatpush3.bf16.msra.mxu0 %v4479_v8  ;;  %3895 = vmatprep.subr.bf16.mxu1 %v5524_v19 }
 0x1f3   : > { %3923 = vmatprep.subr.bf16.mxu0 %v4480_v9 }
 0x1f5   : > { %4164 = vmatmul.mubr.bf16.gmra.mrb[8].mxu0 %v4469_v10 }
 0x1f6   : > { %4167 = vmatprep.mubr.bf16.mxu0 %v4470_v11  ;;  %3924 = vmatpush3.bf16.msra.mxu0 %v4481_v14 }
 0x1f7   : > { %3925 = vmatprep.subr.bf16.mxu0 %v4482_v15 }
 0x1f9   : > { %3896 = vmatpush3.bf16.xpose.msra.mxu1 %v5528_v20 }
 0x1fa   : > { %3926 = vmatpush3.bf16.msra.mxu0 %v4483_v16  ;;  %3897 = vmatprep.subr.bf16.mxu1 %v5531_v21 }
 0x1fb   : > { %3927 = vmatprep.subr.bf16.mxu0 %v4484_v22 }
 0x1fd   : > { %4168 = vmatmul.mubr.bf16.gmra.mrb[12].mxu0 %v4471_v17 }
 0x1fe   : > { %3928 = vmatpush3.bf16.msra.mxu0 %v4485_v24 }
 0x1ff   : > { %3929 = vmatprep.subr.bf16.mxu0 %v4486_v25 }
 0x201   : > { %3898 = vmatpush3.bf16.xpose.msra.mxu1 %v5534_v23 }
 0x202   : > { %3930 = vmatpush3.bf16.msra.mxu0 %v4487_v26 }
 0x2b8   : > { %v4157_v28 = vpop.f32.mrb[0].mxu0 }
 0x2b9   : > { %v1064_v30 = vpop.f32.mrb[1].mxu0  ;;  %v1073_v32 = vadd.f32 %v4157_v28, %v3776_v29 }
 0x2ba   : > { %v4158_v31 = vpop.f32.mrb[2].mxu0  ;;  %v1065_v35 = vadd.f32 %v3776_v29, %v1064_v30 }
 0x2bb   : > { %v1076_v33 = vadd.f32 %v4158_v31, %v3776_v29  ;;  %v1067_v34 = vpop.f32.mrb[3].mxu0 }
 0x2bc   : > { %v1068_v36 = vadd.f32 %v3776_v29, %v1067_v34 }
 0x2bd   : > { %v5540_v37 = vpack.c.bf16 %v1076_v33, %v1073_v32 }
 0x2be   : > { %v5542_v38 = vpack.c.bf16 %v1068_v36, %v1065_v35 }
 0x2c0   : > { %3899 = vmatprep.mubr.bf16.mxu1 %v5542_v38  ;;  %4171 = vmatprep.subr.bf16.mxu0 %v5542_v38  ;;  %v4161_v39 = vpop.f32.mrb[4].mxu0 }
 0x2c1   : > { %3900 = vmatmul.mubr.bf16.vlgmr.msra.gmra.mrb[0].mxu1 %v5542_v38  ;;  %v1089_v40 = vadd.f32 %v4161_v39, %v3776_v29  ;;  %v1080_v41 = vpop.f32.mrb[5].mxu0 }
 0x2c2   : > { %3901 = vmatprep.mubr.bf16.mxu1 %v5540_v37  ;;  %v1081_v42 = vadd.f32 %v3776_v29, %v1080_v41  ;;  %v4162_v43 = vpop.f32.mrb[6].mxu0 }
 0x2c3   : > { %v1092_v44 = vadd.f32 %v4162_v43, %v3776_v29  ;;  %v1083_v45 = vpop.f32.mrb[7].mxu0 }
 0x2c4   : > { %v1084_v27 = vadd.f32 %v3776_v29, %v1083_v45 }
 0x2c5   : > { %v5548_v46 = vpack.c.bf16 %v1092_v44, %v1089_v40 }
 0x2c6   : > { %v5550_v47 = vpack.c.bf16 %v1084_v27, %v1081_v42 }
 0x2c8   : > { %v4165_v48 = vpop.f32.mrb[8].mxu0 }
 0x2c9   : > { %3902 = vmatmul.mubr.bf16.gmra.mrb[4].mxu1 %v5540_v37  ;;  %v1105_v49 = vadd.f32 %v4165_v48, %v3776_v29  ;;  %v1096_v53 = vpop.f32.mrb[9].mxu0 }
 0x2ca   : > { %3903 = vmatprep.mubr.bf16.mxu1 %v5550_v47  ;;  %v1097_v54 = vadd.f32 %v3776_v29, %v1096_v53  ;;  %v4166_v57 = vpop.f32.mrb[10].mxu0 }
 0x2cb   : > { %v1108_v58 = vadd.f32 %v4166_v57, %v3776_v29  ;;  %v1099_v59 = vpop.f32.mrb[11].mxu0 }
 0x2cc   : > { %v1100_v62 = vadd.f32 %v3776_v29, %v1099_v59 }
 0x2cd   : > { %v5554_v63 = vpack.c.bf16 %v1108_v58, %v1105_v49 }
 0x2ce   : > { %v5556_v0 = vpack.c.bf16 %v1100_v62, %v1097_v54 }
 0x2d0   : > { %v4169_v1 = vpop.f32.mrb[12].mxu0 }
 0x2d1   : > { %3904 = vmatmul.mubr.bf16.gmra.mrb[8].mxu1 %v5550_v47  ;;  %v1121_v2 = vadd.f32 %v4169_v1, %v3776_v29  ;;  %v1112_v3 = vpop.f32.mrb[13].mxu0 }
 0x2d2   : > { %3905 = vmatprep.mubr.bf16.mxu1 %v5548_v46  ;;  %v1113_v6 = vadd.f32 %v3776_v29, %v1112_v3  ;;  %v4170_v7 = vpop.f32.mrb[14].mxu0 }
 0x2d3   : > { %v1124_v8 = vadd.f32 %v4170_v7, %v3776_v29  ;;  %v1115_v9 = vpop.f32.mrb[15].mxu0 }
 0x2d4   : > { %v1116_v10 = vadd.f32 %v3776_v29, %v1115_v9 }
 0x2d5   : > { %v5560_v11 = vpack.c.bf16 %v1124_v8, %v1121_v2 }
 0x2d6   : > { %v5562_v14 = vpack.c.bf16 %v1116_v10, %v1113_v6 }
 0x2d9   : > { %3906 = vmatmul.mubr.bf16.gmra.mrb[12].mxu1 %v5548_v46 }
 0x2da   : > { %3907 = vmatprep.mubr.bf16.mxu1 %v5556_v0 }
 0x2e1   : > { %3908 = vmatmul.mubr.bf16.gmra.mrb[16].mxu1 %v5556_v0 }
 0x2e2   : > { %3909 = vmatprep.mubr.bf16.mxu1 %v5554_v63 }
 0x2e9   : > { %3910 = vmatmul.mubr.bf16.gmra.mrb[20].mxu1 %v5554_v63 }
 0x2ea   : > { %3911 = vmatprep.mubr.bf16.mxu1 %v5562_v14 }
 0x2f1   : > { %3912 = vmatmul.mubr.bf16.gmra.mrb[24].mxu1 %v5562_v14 }
 0x2f2   : > { %3913 = vmatprep.mubr.bf16.mxu1 %v5560_v11 }
 0x2f9   : > { %3914 = vmatmul.mubr.bf16.gmra.mrb[28].mxu1 %v5560_v11 }
 0x394   : > { %v5573_v15 = vpop.f32.mrb[0].mxu1 }
 0x395   : > { %v5575_v16 = vpop.f32.mrb[1].mxu1 }
 0x396   : > { %v5577_v17 = vpop.f32.mrb[2].mxu1  ;;  %v1264_v22 = vmax.f32 %v5573_v15, %v5575_v16 }
 0x397   : > { %v5581_v24 = vpop.f32.mrb[3].mxu1 }
 0x398   : > { %1265 = vmax.xlane.f32.xlu0 %v1264_v22  ;;  %v1267_v25 = vmax.f32 %v5577_v17, %v5581_v24 }
 0x39c   : > { %1268 = vmax.xlane.f32.xlu0 %v1267_v25  ;;  %v5585_v26 = vpop.f32.mrb[4].mxu1 }
 0x39d   : > { %v5587_v28 = vpop.f32.mrb[5].mxu1 }
 0x39e   : > { %v5589_v29 = vpop.f32.mrb[6].mxu1  ;;  %v1270_v30 = vmax.f32 %v5585_v26, %v5587_v28 }
 0x39f   : > { %v5593_v31 = vpop.f32.mrb[7].mxu1 }
 0x3a0   : > { %1271 = vmax.xlane.f32.xlu1 %v1270_v30  ;;  %v1273_v32 = vmax.f32 %v5589_v29, %v5593_v31 }
 0x3a4   : > { %1274 = vmax.xlane.f32.xlu1 %v1273_v32  ;;  %v5597_v33 = vpop.f32.mrb[8].mxu1 }
 0x3a5   : > { %v5599_v34 = vpop.f32.mrb[9].mxu1 }
 0x3a6   : > { %v5601_v35 = vpop.f32.mrb[10].mxu1  ;;  %v1276_v36 = vmax.f32 %v5597_v33, %v5599_v34 }
 0x3a7   : > { %v5605_v39 = vpop.f32.mrb[11].mxu1 }
 0x3a8   : > { %1277 = vmax.xlane.f32.xlu0 %v1276_v36  ;;  %v1279_v40 = vmax.f32 %v5601_v35, %v5605_v39 }
 0x3aa   : > { %1280 = vmax.xlane.f32.xlu1 %v1279_v40 }
 0x3ac   : > { %v5609_v41 = vpop.f32.mrb[12].mxu1 }
 0x3ad   : > { %v5611_v42 = vpop.f32.mrb[13].mxu1 }
 0x3ae   : > { %v5613_v43 = vpop.f32.mrb[14].mxu1  ;;  %v1282_v44 = vmax.f32 %v5609_v41, %v5611_v42 }
 0x3af   : > { %v5617_v45 = vpop.f32.mrb[15].mxu1 }
 0x3b0   : > { %1283 = vmax.xlane.f32.xlu0 %v1282_v44  ;;  %v1285_v27 = vmax.f32 %v5613_v43, %v5617_v45 }
 0x3b2   : > { %1286 = vmax.xlane.f32.xlu1 %v1285_v27 }
 0x3b4   : > { %v5621_v48 = vpop.f32.mrb[16].mxu1 }
 0x3b5   : > { %v5623_v49 = vpop.f32.mrb[17].mxu1 }
 0x3b6   : > { %v5625_v53 = vpop.f32.mrb[18].mxu1  ;;  %v1288_v54 = vmax.f32 %v5621_v48, %v5623_v49 }
 0x3b7   : > { %v5629_v57 = vpop.f32.mrb[19].mxu1 }
 0x3b8   : > { %1289 = vmax.xlane.f32.xlu0 %v1288_v54  ;;  %v1291_v58 = vmax.f32 %v5625_v53, %v5629_v57 }
 0x3ba   : > { %1292 = vmax.xlane.f32.xlu1 %v1291_v58 }
 0x3bc   : > { %v5633_v59 = vpop.f32.mrb[20].mxu1 }
 0x3bd   : > { %v5635_v62 = vpop.f32.mrb[21].mxu1 }
 0x3be   : > { %v5637_v1 = vpop.f32.mrb[22].mxu1  ;;  %v1294_v2 = vmax.f32 %v5633_v59, %v5635_v62 }
 0x3bf   : > { %v5641_v3 = vpop.f32.mrb[23].mxu1 }
 0x3c0   : > { %1295 = vmax.xlane.f32.xlu0 %v1294_v2  ;;  %v1297_v6 = vmax.f32 %v5637_v1, %v5641_v3 }
 0x3c2   : > { %1298 = vmax.xlane.f32.xlu1 %v1297_v6 }
 0x3c4   : > { %v5645_v7 = vpop.f32.mrb[24].mxu1 }
 0x3c5   : > { %v5647_v8 = vpop.f32.mrb[25].mxu1 }
 0x3c6   : > { %v5649_v9 = vpop.f32.mrb[26].mxu1  ;;  %v1300_v10 = vmax.f32 %v5645_v7, %v5647_v8 }
 0x3c7   : > { %v5653_v22 = vpop.f32.mrb[27].mxu1 }
 0x3c8   : > { %1301 = vmax.xlane.f32.xlu0 %v1300_v10  ;;  %v1303_v25 = vmax.f32 %v5649_v9, %v5653_v22 }
 0x3ca   : > { %1304 = vmax.xlane.f32.xlu1 %v1303_v25 }
 0x3cc   : > { %v5657_v30 = vpop.f32.mrb[28].mxu1 }
 0x3cd   : > { %v5659_v32 = vpop.f32.mrb[29].mxu1 }
 0x3ce   : > { %v5661_v36 = vpop.f32.mrb[30].mxu1  ;;  %v1306_v40 = vmax.f32 %v5657_v30, %v5659_v32 }
 0x3cf   : > { %v5665_v44 = vpop.f32.mrb[31].mxu1 }
 0x3d0   : > { %1307 = vmax.xlane.f32.xlu0 %v1306_v40  ;;  %v1309_v27 = vmax.f32 %v5661_v36, %v5665_v44 }
 0x3d2   : > { %1310 = vmax.xlane.f32.xlu1 %v1309_v27 }
 0x425   : > { %v1266_v54 = vpop.xlane.xlu0 %1265 }
 0x426   : > { %v1312_v58 = vsub.f32 %v5573_v15, %v1266_v54  ;;  %v1313_v2 = vsub.f32 %v5575_v16, %v1266_v54 }
 0x428   : > { %v1344_v6 = vmul.f32 1.442695, %v1312_v58  ;;  %v1346_v10 = vmul.f32 1.442695, %v1313_v2 }
 0x429   : > { %v1269_v25 = vpop.xlane.xlu0 %1268 }
 0x42a   : > { %4496 = vpow2.f32 %v1344_v6  ;;  %v1314_v21 = vsub.f32 %v5577_v17, %v1269_v25  ;;  %v1315_v19 = vsub.f32 %v5581_v24, %v1269_v25 }
 0x42b   : > { %4498 = vpow2.f32 %v1346_v10 }
 0x42c   : > { %v1348_v13 = vmul.f32 1.442695, %v1314_v21  ;;  %v1350_v40 = vmul.f32 1.442695, %v1315_v19 }
 0x42d   : > { %v1272_v5 = vpop.xlane.xlu1 %1271 }
 0x42e   : > { %4500 = vpow2.f32 %v1348_v13  ;;  %v1316_v27 = vsub.f32 %v5585_v26, %v1272_v5  ;;  %v1317_v61 = vsub.f32 %v5587_v28, %v1272_v5 }
 0x42f   : > { %4502 = vpow2.f32 %v1350_v40 }
 0x430   : > { %v1352_v15 = vmul.f32 1.442695, %v1316_v27  ;;  %v1354_v16 = vmul.f32 1.442695, %v1317_v61 }
 0x431   : > { %v1275_v54 = vpop.xlane.xlu1 %1274 }
 0x432   : > { %4504 = vpow2.f32 %v1352_v15  ;;  %v1318_v58 = vsub.f32 %v5589_v29, %v1275_v54  ;;  %v1319_v17 = vsub.f32 %v5593_v31, %v1275_v54 }
 0x433   : > { %4506 = vpow2.f32 %v1354_v16 }
 0x434   : > { %v4497_v24 = vpop.eup %4496  ;;  %v1356_v2 = vmul.f32 1.442695, %v1318_v58  ;;  %v1358_v21 = vmul.f32 1.442695, %v1319_v17 }
 0x435   : > { %v4499_v19 = vpop.eup %4498  ;;  %v1278_v6 = vpop.xlane.xlu0 %1277 }
 0x436   : > { %4508 = vpow2.f32 %v1356_v2  ;;  %v1320_v13 = vsub.f32 %v5597_v33, %v1278_v6  ;;  %v1321_v5 = vsub.f32 %v5599_v34, %v1278_v6  ;;  %v1408_v26 = vadd.f32 %v4499_v19, %v4497_v24 }
 0x437   : > { %4510 = vpow2.f32 %v1358_v21  ;;  %v1281_v61 = vpop.xlane.xlu1 %1280 }
 0x438   : > { %v4501_v28 = vpop.eup %4500  ;;  %v1360_v10 = vmul.f32 1.442695, %v1320_v13  ;;  %v1362_v25 = vmul.f32 1.442695, %v1321_v5  ;;  %v1322_v29 = vsub.f32 %v5601_v35, %v1281_v61  ;;  %v1323_v31 = vsub.f32 %v5605_v39, %v1281_v61  ;;  %1409 = vadd.xlane.f32.xlu0 %v1408_v26 }
 0x439   : > { %v4503_v40 = vpop.eup %4502  ;;  %v1456_v27 = vpack.c.bf16 %v4501_v28, %v4497_v24 }
 0x43a   : > { %4512 = vpow2.f32 %v1360_v10  ;;  %v1364_v15 = vmul.f32 1.442695, %v1322_v29  ;;  %v1366_v16 = vmul.f32 1.442695, %v1323_v31  ;;  %v1457_v54 = vpack.c.bf16 %v4503_v40, %v4499_v19 }
 0x43b   : > { %4514 = vpow2.f32 %v1362_v25  ;;  %v1411_v33 = vadd.f32 %v4503_v40, %v4501_v28 }
 0x43c   : > { %v4505_v34 = vpop.eup %4504  ;;  %4516 = vpow2.f32 %v1364_v15  ;;  %1632 = vmatprep.mubr.bf16.mxu0 %v1457_v54 }
 0x43d   : > { %v4507_v58 = vpop.eup %4506  ;;  %4518 = vpow2.f32 %v1366_v16  ;;  %1412 = vadd.xlane.f32.xlu1 %v1411_v33  ;;  %1633 = vmatmul.mubr.bf16.vlgmr.msra.gmra.mrb[16].mxu0 %v1456_v27  ;;  %v1284_v17 = vpop.xlane.xlu0 %1283 }
 0x43e   : > { %4172 = vmatpush3.bf16.xpose.msra.mxu0 %v5542_v38  ;;  %v1324_v35 = vsub.f32 %v5609_v41, %v1284_v17  ;;  %v1325_v39 = vsub.f32 %v5611_v42, %v1284_v17  ;;  %v1414_v24 = vadd.f32 %v4507_v58, %v4505_v34 }
 0x43f   : > { %4173 = vmatprep.subr.bf16.mxu0 %v5540_v37  ;;  %v1287_v2 = vpop.xlane.xlu1 %1286 }
 0x440   : > { %v4509_v21 = vpop.eup %4508  ;;  %v1368_v19 = vmul.f32 1.442695, %v1324_v35  ;;  %v1370_v6 = vmul.f32 1.442695, %v1325_v39  ;;  %v1326_v13 = vsub.f32 %v5613_v43, %v1287_v2  ;;  %v1327_v5 = vsub.f32 %v5617_v45, %v1287_v2  ;;  %1415 = vadd.xlane.f32.xlu0 %v1414_v24 }
 0x441   : > { %v4511_v26 = vpop.eup %4510  ;;  %v1458_v61 = vpack.c.bf16 %v4509_v21, %v4505_v34 }
 0x442   : > { %4520 = vpow2.f32 %v1368_v19  ;;  %v1372_v38 = vmul.f32 1.442695, %v1326_v13  ;;  %v1374_v28 = vmul.f32 1.442695, %v1327_v5  ;;  %v1459_v41 = vpack.c.bf16 %v4511_v26, %v4507_v58 }
 0x443   : > { %4522 = vpow2.f32 %v1370_v6  ;;  %v1417_v42 = vadd.f32 %v4511_v26, %v4509_v21 }
 0x444   : > { %v4513_v10 = vpop.eup %4512  ;;  %4524 = vpow2.f32 %v1372_v38  ;;  %1640 = vmatprep.mubr.bf16.mxu0 %v1459_v41 }
 0x445   : > { %v4515_v25 = vpop.eup %4514  ;;  %4526 = vpow2.f32 %v1374_v28  ;;  %1418 = vadd.xlane.f32.xlu1 %v1417_v42  ;;  %1641 = vmatmul.mubr.bf16.gmra.mrb[20].mxu0 %v1458_v61  ;;  %v1290_v29 = vpop.xlane.xlu0 %1289 }
 0x446   : > { %v4517_v43 = vpop.eup %4516  ;;  %4174 = vmatpush3.bf16.xpose.msra.mxu0 %v5540_v37  ;;  %v1328_v45 = vsub.f32 %v5621_v48, %v1290_v29  ;;  %v1329_v31 = vsub.f32 %v5623_v49, %v1290_v29  ;;  %v1420_v40 = vadd.f32 %v4515_v25, %v4513_v10 }
 0x447   : > { %v4519_v27 = vpop.eup %4518  ;;  %4175 = vmatprep.subr.bf16.mxu0 %v5550_v47  ;;  %v1293_v15 = vpop.xlane.xlu1 %1292  ;;  %v1460_v16 = vpack.c.bf16 %v4517_v43, %v4513_v10 }
 0x448   : > { %v1376_v54 = vmul.f32 1.442695, %v1328_v45  ;;  %v1378_v33 = vmul.f32 1.442695, %v1329_v31  ;;  %v1330_v34 = vsub.f32 %v5625_v53, %v1293_v15  ;;  %v1331_v58 = vsub.f32 %v5629_v57, %v1293_v15  ;;  %1421 = vadd.xlane.f32.xlu0 %v1420_v40 }
 0x449   : > { %v1461_v17 = vpack.c.bf16 %v4519_v27, %v4515_v25  ;;  %v1423_v35 = vadd.f32 %v4519_v27, %v4517_v43 }
 0x44a   : > { %4528 = vpow2.f32 %v1376_v54  ;;  %v1380_v37 = vmul.f32 1.442695, %v1330_v34  ;;  %v1382_v48 = vmul.f32 1.442695, %v1331_v58 }
 0x44b   : > { %4530 = vpow2.f32 %v1378_v33  ;;  %1648 = vmatprep.mubr.bf16.mxu0 %v1461_v17  ;;  %1424 = vadd.xlane.f32.xlu1 %v1423_v35 }
 0x44c   : > { %v4521_v49 = vpop.eup %4520  ;;  %4532 = vpow2.f32 %v1380_v37 }
 0x44d   : > { %v4523_v39 = vpop.eup %4522  ;;  %4534 = vpow2.f32 %v1382_v48  ;;  %1649 = vmatmul.mubr.bf16.gmra.mrb[24].mxu0 %v1460_v16  ;;  %v1296_v24 = vpop.xlane.xlu0 %1295 }
 0x44e   : > { %v4525_v2 = vpop.eup %4524  ;;  %4176 = vmatpush3.bf16.xpose.msra.mxu0 %v5550_v47  ;;  %v1332_v53 = vsub.f32 %v5633_v59, %v1296_v24  ;;  %v1333_v57 = vsub.f32 %v5635_v62, %v1296_v24  ;;  %v1426_v21 = vadd.f32 %v4523_v39, %v4521_v49 }
 0x44f   : > { %v4527_v19 = vpop.eup %4526  ;;  %4177 = vmatprep.subr.bf16.mxu0 %v5548_v46  ;;  %v1299_v6 = vpop.xlane.xlu1 %1298  ;;  %v1462_v13 = vpack.c.bf16 %v4525_v2, %v4521_v49 }
 0x450   : > { %v1384_v5 = vmul.f32 1.442695, %v1332_v53  ;;  %v1386_v26 = vmul.f32 1.442695, %v1333_v57  ;;  %v1334_v61 = vsub.f32 %v5637_v1, %v1299_v6  ;;  %v1335_v38 = vsub.f32 %v5641_v3, %v1299_v6  ;;  %1427 = vadd.xlane.f32.xlu0 %v1426_v21 }
 0x451   : > { %v1463_v28 = vpack.c.bf16 %v4527_v19, %v4523_v39  ;;  %v1429_v41 = vadd.f32 %v4527_v19, %v4525_v2 }
 0x452   : > { %4536 = vpow2.f32 %v1384_v5  ;;  %v1388_v47 = vmul.f32 1.442695, %v1334_v61  ;;  %v1390_v59 = vmul.f32 1.442695, %v1335_v38 }
 0x453   : > { %4538 = vpow2.f32 %v1386_v26  ;;  %1656 = vmatprep.mubr.bf16.mxu0 %v1463_v28  ;;  %1430 = vadd.xlane.f32.xlu1 %v1429_v41 }
 0x454   : > { %v4529_v62 = vpop.eup %4528  ;;  %4540 = vpow2.f32 %v1388_v47 }
 0x455   : > { %v4531_v42 = vpop.eup %4530  ;;  %4542 = vpow2.f32 %v1390_v59  ;;  %1657 = vmatmul.mubr.bf16.gmra.mrb[28].mxu0 %v1462_v13  ;;  %v1302_v10 = vpop.xlane.xlu0 %1301 }
 0x456   : > { %v4533_v25 = vpop.eup %4532  ;;  %4178 = vmatpush3.bf16.xpose.msra.mxu0 %v5548_v46  ;;  %v1336_v1 = vsub.f32 %v5645_v7, %v1302_v10  ;;  %v1337_v3 = vsub.f32 %v5647_v8, %v1302_v10  ;;  %v1432_v29 = vadd.f32 %v4531_v42, %v4529_v62 }
 0x457   : > { %v4535_v43 = vpop.eup %4534  ;;  %4179 = vmatprep.subr.bf16.mxu0 %v5556_v0  ;;  %v1305_v45 = vpop.xlane.xlu1 %1304  ;;  %v1464_v31 = vpack.c.bf16 %v4533_v25, %v4529_v62 }
 0x458   : > { %v1392_v40 = vmul.f32 1.442695, %v1336_v1  ;;  %v1394_v27 = vmul.f32 1.442695, %v1337_v3  ;;  %v1338_v15 = vsub.f32 %v5649_v9, %v1305_v45  ;;  %v1339_v16 = vsub.f32 %v5653_v22, %v1305_v45  ;;  %1433 = vadd.xlane.f32.xlu0 %v1432_v29 }
 0x459   : > { %v1465_v54 = vpack.c.bf16 %v4535_v43, %v4531_v42  ;;  %v1435_v33 = vadd.f32 %v4535_v43, %v4533_v25 }
 0x45a   : > { %4544 = vpow2.f32 %v1392_v40  ;;  %v1396_v46 = vmul.f32 1.442695, %v1338_v15  ;;  %v1398_v7 = vmul.f32 1.442695, %v1339_v16 }
 0x45b   : > { %4546 = vpow2.f32 %v1394_v27  ;;  %1664 = vmatprep.mubr.bf16.mxu0 %v1465_v54  ;;  %1436 = vadd.xlane.f32.xlu1 %v1435_v33 }
 0x45c   : > { %v4537_v8 = vpop.eup %4536  ;;  %4548 = vpow2.f32 %v1396_v46 }
 0x45d   : > { %v4539_v34 = vpop.eup %4538  ;;  %4550 = vpow2.f32 %v1398_v7  ;;  %1665 = vmatmul.mubr.bf16.gmra.mrb[32].mxu0 %v1464_v31  ;;  %v1308_v58 = vpop.xlane.xlu0 %1307 }
 0x45e   : > { %v4541_v17 = vpop.eup %4540  ;;  %4180 = vmatpush3.bf16.xpose.msra.mxu0 %v5556_v0  ;;  %v1340_v9 = vsub.f32 %v5657_v30, %v1308_v58  ;;  %v1341_v22 = vsub.f32 %v5659_v32, %v1308_v58  ;;  %v1438_v35 = vadd.f32 %v4539_v34, %v4537_v8 }
 0x45f   : > { %v4543_v37 = vpop.eup %4542  ;;  %4181 = vmatprep.subr.bf16.mxu0 %v5554_v63  ;;  %v1311_v48 = vpop.xlane.xlu1 %1310  ;;  %v1466_v49 = vpack.c.bf16 %v4541_v17, %v4537_v8 }
 0x460   : > { %v1400_v39 = vmul.f32 1.442695, %v1340_v9  ;;  %v1402_v24 = vmul.f32 1.442695, %v1341_v22  ;;  %1439 = vadd.xlane.f32.xlu0 %v1438_v35  ;;  %v1342_v2 = vsub.f32 %v5661_v36, %v1311_v48  ;;  %v1343_v53 = vsub.f32 %v5665_v44, %v1311_v48 }
 0x461   : > { %v1467_v57 = vpack.c.bf16 %v4543_v37, %v4539_v34  ;;  %v1441_v21 = vadd.f32 %v4543_v37, %v4541_v17 }
 0x462   : > { %4552 = vpow2.f32 %v1400_v39  ;;  %v1404_v0 = vmul.f32 1.442695, %v1342_v2  ;;  %v1406_v30 = vmul.f32 1.442695, %v1343_v53 }
 0x463   : > { %4554 = vpow2.f32 %v1402_v24  ;;  %1672 = vmatprep.mubr.bf16.mxu0 %v1467_v57  ;;  %1442 = vadd.xlane.f32.xlu1 %v1441_v21 }
 0x464   : > { %v4545_v32 = vpop.eup %4544  ;;  %4556 = vpow2.f32 %v1404_v0 }
 0x465   : > { %v4547_v19 = vpop.eup %4546  ;;  %4558 = vpow2.f32 %v1406_v30  ;;  %1673 = vmatmul.mubr.bf16.gmra.mrb[36].mxu0 %v1466_v49 }
 0x466   : > { %v4549_v6 = vpop.eup %4548  ;;  %4182 = vmatpush3.bf16.xpose.msra.mxu0 %v5554_v63  ;;  %v1444_v13 = vadd.f32 %v4547_v19, %v4545_v32 }
 0x467   : > { %v4551_v36 = vpop.eup %4550  ;;  %4183 = vmatprep.subr.bf16.mxu0 %v5562_v14  ;;  %v1468_v44 = vpack.c.bf16 %v4549_v6, %v4545_v32 }
 0x468   : > { %1445 = vadd.xlane.f32.xlu0 %v1444_v13  ;;  %v1469_v5 = vpack.c.bf16 %v4551_v36, %v4547_v19  ;;  %v1447_v26 = vadd.f32 %v4551_v36, %v4549_v6 }
 0x46a   : > { %1680 = vmatprep.mubr.bf16.mxu0 %v1469_v5  ;;  %1448 = vadd.xlane.f32.xlu1 %v1447_v26 }
 0x46c   : > { %v4553_v61 = vpop.eup %4552 }
 0x46d   : > { %v4555_v38 = vpop.eup %4554  ;;  %1681 = vmatmul.mubr.bf16.gmra.mrb[40].mxu0 %v1468_v44 }
 0x46e   : > { %v4557_v28 = vpop.eup %4556  ;;  %4184 = vmatpush3.bf16.xpose.msra.mxu0 %v5562_v14  ;;  %v1450_v41 = vadd.f32 %v4555_v38, %v4553_v61 }
 0x46f   : > { %v4559_v47 = vpop.eup %4558  ;;  %4185 = vmatprep.subr.bf16.mxu0 %v5560_v11  ;;  %v1470_v63 = vpack.c.bf16 %v4557_v28, %v4553_v61 }
 0x470   : > { %1451 = vadd.xlane.f32.xlu0 %v1450_v41  ;;  %v1471_v59 = vpack.c.bf16 %v4559_v47, %v4555_v38  ;;  %v1453_v62 = vadd.f32 %v4559_v47, %v4557_v28 }
 0x472   : > { %1688 = vmatprep.mubr.bf16.mxu0 %v1471_v59  ;;  %1454 = vadd.xlane.f32.xlu1 %v1453_v62 }
 0x475   : > { %1689 = vmatmul.mubr.bf16.gmra.mrb[44].mxu0 %v1470_v63 }
 0x476   : > { %4186 = vmatpush3.bf16.xpose.msra.mxu0 %v5560_v11  ;;  %4187 = vmatprep.mubr.bf16.mxu0 %v5481_v51  ;;  %v6741_v51 = vld [vmem:[#allocation31_spill] sm:$0xff] }
 0x47d   : > { %4188 = vmatmul.mubr.bf16.vlgmr.msra.gmra.mrb[48].mxu0 %v5488_v55  ;;  %v6742_v55 = vld [vmem:[#allocation32_spill] sm:$0xff] }
 0x47e   : > { %4191 = vmatprep.mubr.bf16.mxu0 %v5496_v60  ;;  %v6743_v60 = vld [vmem:[#allocation33_spill] sm:$0xff] }
 0x485   : > { %4192 = vmatmul.mubr.bf16.gmra.mrb[52].mxu0 %v5507_v4  ;;  %v6744_v4 = vld [vmem:[#allocation34_spill] sm:$0xff] }
 0x486   : > { %4195 = vmatprep.mubr.bf16.mxu0 %v5515_v12  ;;  %v6745_v12 = vld [vmem:[#allocation35_spill] sm:$0xff] }
 0x48d   : > { %4196 = vmatmul.mubr.bf16.gmra.mrb[56].mxu0 %v5522_v18 }
 0x48e   : > { %4199 = vmatprep.mubr.bf16.mxu0 %v5528_v20 }
 0x495   : > { %4200 = vmatmul.mubr.bf16.gmra.mrb[60].mxu0 %v5534_v23 }
 0x496   : > { %4203 = vmatprep.mubr.bf16.mxu0 %v5479_v50 }
 0x49d   : > { %4204 = vmatmul.mubr.bf16.gmra.mrb[64].mxu0 %v5483_v52 }
 0x49e   : > { %4207 = vmatprep.mubr.bf16.mxu0 %v5490_v56 }
 0x4a5   : > { %4208 = vmatmul.mubr.bf16.gmra.mrb[68].mxu0 %v6741_v51 }
 0x4a6   : > { %4211 = vmatprep.mubr.bf16.mxu0 %v6742_v55 }
 0x4ad   : > { %4212 = vmatmul.mubr.bf16.gmra.mrb[72].mxu0 %v6743_v60 }
 0x4ae   : > { %4215 = vmatprep.mubr.bf16.mxu0 %v6744_v4 }
 0x4b5   : > { %4216 = vmatmul.mubr.bf16.gmra.mrb[76].mxu0 %v6745_v12 }
 0x4c5   : > { %v1410_v18 = vpop.xlane.xlu0 %1409 }
 0x4c6   : > { %4560 = vrcp.f32 %v1410_v18 }
 0x4ca   : > { %v1413_v20 = vpop.xlane.xlu1 %1412 }
 0x4cb   : > { %4562 = vrcp.f32 %v1413_v20 }
 0x4cd   : > { %v1416_v50 = vpop.xlane.xlu0 %1415 }
 0x4ce   : > { %4564 = vrcp.f32 %v1416_v50 }
 0x4d0   : > { %v4561_v10 = vpop.eup %4560 }
 0x4d2   : > { %v1419_v23 = vpop.xlane.xlu1 %1418 }
 0x4d3   : > { %4566 = vrcp.f32 %v1419_v23 }
 0x4d5   : > { %v4563_v1 = vpop.eup %4562  ;;  %v1422_v43 = vpop.xlane.xlu0 %1421 }
 0x4d6   : > { %4568 = vrcp.f32 %v1422_v43 }
 0x4d8   : > { %v1425_v45 = vpop.xlane.xlu1 %1424  ;;  %v4565_v33 = vpop.eup %4564 }
 0x4d9   : > { %4570 = vrcp.f32 %v1425_v45 }
 0x4dd   : > { %v4567_v7 = vpop.eup %4566  ;;  %v1428_v58 = vpop.xlane.xlu0 %1427 }
 0x4de   : > { %4572 = vrcp.f32 %v1428_v58 }
 0x4e0   : > { %v1431_v17 = vpop.xlane.xlu1 %1430  ;;  %v4569_v39 = vpop.eup %4568 }
 0x4e1   : > { %4574 = vrcp.f32 %v1431_v17 }
 0x4e3   : > { %v4571_v2 = vpop.eup %4570 }
 0x4e5   : > { %v1434_v21 = vpop.xlane.xlu0 %1433 }
 0x4e6   : > { %4576 = vrcp.f32 %v1434_v21 }
 0x4e8   : > { %v1437_v0 = vpop.xlane.xlu1 %1436  ;;  %v4573_v44 = vpop.eup %4572 }
 0x4e9   : > { %4578 = vrcp.f32 %v1437_v0 }
 0x4eb   : > { %v4575_v26 = vpop.eup %4574 }
 0x4ed   : > { %v1440_v28 = vpop.xlane.xlu0 %1439 }
 0x4ee   : > { %4580 = vrcp.f32 %v1440_v28 }
 0x4f0   : > { %v1443_v41 = vpop.xlane.xlu1 %1442  ;;  %v4577_v60 = vpop.eup %4576 }
 0x4f1   : > { %4582 = vrcp.f32 %v1443_v41 }
 0x4f3   : > { %v4579_v12 = vpop.eup %4578 }
 0x4f5   : > { %v1446_v50 = vpop.xlane.xlu0 %1445 }
 0x4f6   : > { %4584 = vrcp.f32 %v1446_v50 }
 0x4f7   : > { %v1449_v23 = vpop.xlane.xlu1 %1448 }
 0x4f8   : > { %4586 = vrcp.f32 %v1449_v23 }
 0x4fd   : > { %v1452_v45 = vpop.xlane.xlu0 %1451 }
 0x4fe   : > { %4588 = vrcp.f32 %v1452_v45  ;;  %v5845_v45 = vld [vmem:[#allocation5 + $0x18] sm:$0xff] }
 0x510   : > { %v3931_v11 = vpop.f32.mrb[16].mxu0 }
 0x511   : > { %v3932_v52 = vpop.f32.mrb[17].mxu0 }
 0x512   : > { %v3933_v56 = vadd.f32 %v3932_v52, %v3931_v11  ;;  %v3934_v14 = vpop.f32.mrb[18].mxu0 }
 0x513   : > { %v3935_v42 = vpop.f32.mrb[19].mxu0 }
 0x514   : > { %v3936_v25 = vadd.f32 %v3935_v42, %v3934_v14  ;;  %v1713_v3 = vmul.f32 %v4561_v10, %v3933_v56 }
 0x516   : > { %v1714_v29 = vmul.f32 %v4563_v1, %v3936_v25  ;;  %v4581_v25 = vpop.eup %4580 }
 0x518   : > { %v1729_v31 = vpack.c.bf16 %v1714_v29, %v1713_v3  ;;  %v3937_v40 = vpop.f32.mrb[20].mxu0  ;;  %v4583_v3 = vpop.eup %4582 }
 0x519   : > { %v3938_v27 = vpop.f32.mrb[21].mxu0 }
 0x51a   : > { %1741 = vst [vmem:[%s5733_s10] sm:$0xff] %v1729_v31  ;;  %v3939_v15 = vadd.f32 %v3938_v27, %v3937_v40  ;;  %v3940_v16 = vpop.f32.mrb[22].mxu0  ;;  %v1455_v31 = vpop.xlane.xlu1 %1454 }
 0x51b   : > { %v3941_v54 = vpop.f32.mrb[23].mxu0  ;;  %4590 = vrcp.f32 %v1455_v31 }
 0x51c   : > { %v3942_v46 = vadd.f32 %v3941_v54, %v3940_v16  ;;  %v1715_v8 = vmul.f32 %v4565_v33, %v3939_v15 }
 0x51e   : > { %v1716_v34 = vmul.f32 %v4567_v7, %v3942_v46  ;;  %v4585_v46 = vpop.eup %4584 }
 0x520   : > { %v1730_v9 = vpack.c.bf16 %v1716_v34, %v1715_v8  ;;  %v3943_v22 = vpop.f32.mrb[24].mxu0  ;;  %v4587_v8 = vpop.eup %4586 }
 0x521   : > { %v3944_v35 = vpop.f32.mrb[25].mxu0 }
 0x522   : > { %1742 = vst [vmem:[%s5733_s10 + $0x8] sm:$0xff] %v1730_v9  ;;  %v3945_v37 = vadd.f32 %v3944_v35, %v3943_v22  ;;  %v3946_v48 = vpop.f32.mrb[26].mxu0 }
 0x523   : > { %v3947_v49 = vpop.f32.mrb[27].mxu0 }
 0x524   : > { %v3948_v24 = vadd.f32 %v3947_v49, %v3946_v48  ;;  %v1717_v53 = vmul.f32 %v4569_v39, %v3945_v37  ;;  %v4589_v49 = vpop.eup %4588 }
 0x526   : > { %v1718_v57 = vmul.f32 %v4571_v2, %v3948_v24  ;;  %v4591_v24 = vpop.eup %4590 }
 0x528   : > { %v1731_v30 = vpack.c.bf16 %v1718_v57, %v1717_v53  ;;  %v3949_v32 = vpop.f32.mrb[28].mxu0 }
 0x529   : > { %v3950_v19 = vpop.f32.mrb[29].mxu0 }
 0x52a   : > { %1743 = vst [vmem:[%s5733_s10 + $0x10] sm:$0xff] %v1731_v30  ;;  %v3951_v6 = vadd.f32 %v3950_v19, %v3949_v32  ;;  %v3952_v13 = vpop.f32.mrb[30].mxu0 }
 0x52b   : > { %v3953_v36 = vpop.f32.mrb[31].mxu0 }
 0x52c   : > { %v3954_v5 = vadd.f32 %v3953_v36, %v3952_v13  ;;  %v1719_v61 = vmul.f32 %v4573_v44, %v3951_v6 }
 0x52e   : > { %v1720_v38 = vmul.f32 %v4575_v26, %v3954_v5  ;;  %v5027_v26 = vmov 0  }
 0x52f   : > { %4455 = vset.pattern.permute.xlu1 %v5027_v26  ;;  %4454 = vset.pattern.permute.xlu0 %v5027_v26 }
 0x530   : > { %v1732_v47 = vpack.c.bf16 %v1720_v38, %v1719_v61  ;;  %v3955_v63 = vpop.f32.mrb[32].mxu0 }
 0x531   : > { %v3956_v59 = vpop.f32.mrb[33].mxu0 }
 0x532   : > { %1744 = vst [vmem:[%s5733_s10 + $0x18] sm:$0xff] %v1732_v47  ;;  %v3957_v62 = vadd.f32 %v3956_v59, %v3955_v63  ;;  %v3958_v51 = vpop.f32.mrb[34].mxu0 }
 0x533   : > { %v3959_v55 = vpop.f32.mrb[35].mxu0 }
 0x534   : > { %v3960_v4 = vadd.f32 %v3959_v55, %v3958_v51  ;;  %v1721_v18 = vmul.f32 %v4577_v60, %v3957_v62 }
 0x536   : > { %v1722_v20 = vmul.f32 %v4579_v12, %v3960_v4 }
 0x538   : > { %v1733_v11 = vpack.c.bf16 %v1722_v20, %v1721_v18  ;;  %v3961_v52 = vpop.f32.mrb[36].mxu0 }
 0x539   : > { %v3962_v56 = vpop.f32.mrb[37].mxu0 }
 0x53a   : > { %1745 = vst [vmem:[%s5733_s10 + $0x20] sm:$0xff] %v1733_v11  ;;  %v3963_v14 = vadd.f32 %v3962_v56, %v3961_v52  ;;  %v3964_v42 = vpop.f32.mrb[38].mxu0 }
 0x53b   : > { %v3965_v10 = vpop.f32.mrb[39].mxu0 }
 0x53c   : > { %v3966_v1 = vadd.f32 %v3965_v10, %v3964_v42  ;;  %v1723_v29 = vmul.f32 %v4581_v25, %v3963_v14  ;;  %v4488_v10 = vld [vmem:[%s5503_s29] sm:$0xff]   ;;  %v4489_v25 = vld [vmem:[%s5503_s29 + $0x8] sm:$0xff]  }
 0x53d   : > { %4219 = vmatprep.subr.bf16.mxu1 %v4488_v10 }
 0x53e   : > { %v1724_v43 = vmul.f32 %v4583_v3, %v3966_v1  ;;  %4220 = vmatpush3.bf16.msra.mxu1 %v4488_v10  ;;  %v4490_v1 = vld [vmem:[%s5503_s29 + $0x10] sm:$0xff]   ;;  %v4491_v3 = vld [vmem:[%s5503_s29 + $0x18] sm:$0xff]   ;;  %v4493_v10 = vld [vmem:[%s5503_s29 + $0x28] sm:$0xff]  }
 0x53f   : > { %4221 = vmatprep.subr.bf16.mxu1 %v4489_v25 }
 0x540   : > { %v1734_v40 = vpack.c.bf16 %v1724_v43, %v1723_v29  ;;  %v3967_v27 = vpop.f32.mrb[40].mxu0  ;;  %v5843_v29 = vld [vmem:[#allocation5 + $0x10] sm:$0xff] }
 0x541   : > { %v3968_v15 = vpop.f32.mrb[41].mxu0 }
 0x542   : > { %1746 = vst [vmem:[%s5733_s10 + $0x28] sm:$0xff] %v1734_v40  ;;  %v3969_v16 = vadd.f32 %v3968_v15, %v3967_v27  ;;  %v3970_v54 = vpop.f32.mrb[42].mxu0  ;;  %4222 = vmatpush3.bf16.msra.mxu1 %v4489_v25  ;;  %v5850_v27 = vld [vmem:[#allocation5] sm:$0xff] }
 0x543   : > { %v3971_v33 = vpop.f32.mrb[43].mxu0  ;;  %4223 = vmatprep.subr.bf16.mxu1 %v4490_v1 }
 0x544   : > { %v3972_v7 = vadd.f32 %v3971_v33, %v3970_v54  ;;  %v1725_v34 = vmul.f32 %v4585_v46, %v3969_v16  ;;  %v5860_v33 = vld [vmem:[#allocation5 + $0x8] sm:$0xff] }
 0x546   : > { %v1726_v58 = vmul.f32 %v4587_v8, %v3972_v7  ;;  %4224 = vmatpush3.bf16.msra.mxu1 %v4490_v1  ;;  %v5867_v8 = vld [vmem:[#allocation5 + $0x30] sm:$0xff]  ;;  %v5910_v1 = vld [vmem:[#allocation5 + $0x58] sm:$0xff] }
 0x547   : > { %4225 = vmatprep.subr.bf16.mxu1 %v4491_v3 }
 0x548   : > { %v1735_v17 = vpack.c.bf16 %v1726_v58, %v1725_v34  ;;  %v3973_v9 = vpop.f32.mrb[44].mxu0  ;;  %v4492_v58 = vld [vmem:[%s5503_s29 + $0x20] sm:$0xff]  }
 0x549   : > { %v3974_v22 = vpop.f32.mrb[45].mxu0 }
 0x54a   : > { %1747 = vst [vmem:[%s5733_s10 + $0x30] sm:$0xff] %v1735_v17  ;;  %v3975_v35 = vadd.f32 %v3974_v22, %v3973_v9  ;;  %v3976_v37 = vpop.f32.mrb[46].mxu0  ;;  %4226 = vmatpush3.bf16.msra.mxu1 %v4491_v3  ;;  %v5877_v9 = vld [vmem:[#allocation5 + $0x38] sm:$0xff] }
 0x54b   : > { %v3977_v48 = vpop.f32.mrb[47].mxu0  ;;  %4227 = vmatprep.subr.bf16.mxu1 %v4492_v58 }
 0x54c   : > { %v3978_v39 = vadd.f32 %v3977_v48, %v3976_v37  ;;  %v1727_v2 = vmul.f32 %v4589_v49, %v3975_v35  ;;  %v5884_v37 = vld [vmem:[#allocation5 + $0x20] sm:$0xff]  ;;  %v4495_v48 = vld [vmem:[%s5503_s29 + $0x38] sm:$0xff]  }
 0x54e   : > { %v1728_v53 = vmul.f32 %v4591_v24, %v3978_v39  ;;  %4228 = vmatpush3.bf16.msra.mxu1 %v4492_v58  ;;  %v5894_v24 = vld [vmem:[#allocation5 + $0x28] sm:$0xff] }
 0x54f   : > { %4229 = vmatprep.subr.bf16.mxu1 %v4493_v10 }
 0x550   : > { %v1736_v57 = vpack.c.bf16 %v1728_v53, %v1727_v2  ;;  %v5742_v21 = vpop.f32.mrb[48].mxu0 }
 0x551   : > { %6746 = vst [vmem:[#allocation31_spill] sm:$0xff] %v5742_v21  ;;  %1914 = vmax.xlane.f32.xlu0 %v5742_v21  ;;  %v5745_v0 = vpop.f32.mrb[49].mxu0 }
 0x552   : > { %6747 = vst [vmem:[#allocation32_spill] sm:$0xff] %v5745_v0  ;;  %1748 = vst [vmem:[%s5733_s10 + $0x38] sm:$0xff] %v1736_v57  ;;  %v5748_v30 = vpop.f32.mrb[50].mxu0  ;;  %v5901_v57 = vld [vmem:[#allocation5 + $0x50] sm:$0xff]  ;;  %4230 = vmatpush3.bf16.msra.mxu1 %v4493_v10 }
 0x553   : > { %6748 = vst [vmem:[#allocation33_spill] sm:$0xff] %v5748_v30  ;;  %v5750_v32 = vpop.f32.mrb[51].mxu0  ;;  %1916 = vmax.xlane.f32.xlu1 %v5748_v30  ;;  %v5935_v10 = vld [vmem:[#allocation5 + $0x70] sm:$0xff]  ;;  %v6080_v30 = vld [vmem:[#allocation5 + $0xf8] sm:$0xff] }
 0x554   : > { %6749 = vst [vmem:[#allocation34_spill] sm:$0xff] %v5750_v32 }
 0x555   : > { %1910 = vmax.xlane.f32.xlu0 %v5745_v0 }
 0x557   : > { %1912 = vmax.xlane.f32.xlu1 %v5750_v32 }
 0x558   : > { %v5755_v19 = vpop.f32.mrb[52].mxu0 }
 0x559   : > { %6750 = vst [vmem:[#allocation35_spill] sm:$0xff] %v5755_v19  ;;  %1922 = vmax.xlane.f32.xlu0 %v5755_v19  ;;  %v5758_v6 = vpop.f32.mrb[53].mxu0 }
 0x55a   : > { %6751 = vst [vmem:[#allocation36_spill] sm:$0xff] %v5758_v6  ;;  %v5760_v13 = vpop.f32.mrb[54].mxu0 }
 0x55b   : > { %6752 = vst [vmem:[#allocation37_spill] sm:$0xff] %v5760_v13  ;;  %1924 = vmax.xlane.f32.xlu1 %v5760_v13  ;;  %v5763_v36 = vpop.f32.mrb[55].mxu0 }
 0x55c   : > { %6753 = vst [vmem:[#allocation38_spill] sm:$0xff] %v5763_v36 }
 0x55d   : > { %1918 = vmax.xlane.f32.xlu0 %v5758_v6  ;;  %v6072_v6 = vld [vmem:[#allocation5 + $0xf0] sm:$0xff] }
 0x55f   : > { %1920 = vmax.xlane.f32.xlu1 %v5763_v36 }
 0x560   : > { %v5767_v44 = vpop.f32.mrb[56].mxu0 }
 0x561   : > { %6754 = vst [vmem:[#allocation39_spill] sm:$0xff] %v5767_v44  ;;  %v5769_v5 = vpop.f32.mrb[57].mxu0  ;;  %1930 = vmax.xlane.f32.xlu0 %v5767_v44 }
 0x562   : > { %6755 = vst [vmem:[#allocation40_spill] sm:$0xff] %v5769_v5  ;;  %v5772_v61 = vpop.f32.mrb[58].mxu0 }
 0x563   : > { %6756 = vst [vmem:[#allocation41_spill] sm:$0xff] %v5772_v61  ;;  %1932 = vmax.xlane.f32.xlu1 %v5772_v61  ;;  %v5775_v38 = vpop.f32.mrb[59].mxu0  ;;  %v6054_v61 = vld [vmem:[#allocation5 + $0xc0] sm:$0xff] }
 0x564   : > { %6757 = vst [vmem:[#allocation42_spill] sm:$0xff] %v5775_v38  ;;  %6779 = vst [vmem:[#allocation64_spill] sm:$0xff] %v6054_v61 }
 0x565   : > { %1926 = vmax.xlane.f32.xlu0 %v5769_v5 }
 0x567   : > { %1928 = vmax.xlane.f32.xlu1 %v5775_v38  ;;  %v6062_v38 = vld [vmem:[#allocation5 + $0xc8] sm:$0xff] }
 0x568   : > { %v5779_v28 = vpop.f32.mrb[60].mxu0 }
 0x569   : > { %6758 = vst [vmem:[#allocation43_spill] sm:$0xff] %v5779_v28  ;;  %v5781_v41 = vpop.f32.mrb[61].mxu0  ;;  %1938 = vmax.xlane.f32.xlu0 %v5779_v28 }
 0x56a   : > { %6759 = vst [vmem:[#allocation44_spill] sm:$0xff] %v5781_v41  ;;  %v5784_v47 = vpop.f32.mrb[62].mxu0 }
 0x56b   : > { %6760 = vst [vmem:[#allocation45_spill] sm:$0xff] %v5784_v47  ;;  %1940 = vmax.xlane.f32.xlu1 %v5784_v47  ;;  %v5787_v63 = vpop.f32.mrb[63].mxu0  ;;  %v6038_v47 = vld [vmem:[#allocation5 + $0xd0] sm:$0xff] }
 0x56c   : > { %6761 = vst [vmem:[#allocation46_spill] sm:$0xff] %v5787_v63  ;;  %6778 = vst [vmem:[#allocation63_spill] sm:$0xff] %v6038_v47 }
 0x56d   : > { %1934 = vmax.xlane.f32.xlu0 %v5781_v41  ;;  %v6030_v41 = vld [vmem:[#allocation5 + $0xa8] sm:$0xff] }
 0x56f   : > { %1936 = vmax.xlane.f32.xlu1 %v5787_v63  ;;  %v6046_v63 = vld [vmem:[#allocation5 + $0xd8] sm:$0xff] }
 0x570   : > { %v5791_v59 = vpop.f32.mrb[64].mxu0 }
 0x571   : > { %6762 = vst [vmem:[#allocation47_spill] sm:$0xff] %v5791_v59  ;;  %v5793_v62 = vpop.f32.mrb[65].mxu0  ;;  %1946 = vmax.xlane.f32.xlu0 %v5791_v59 }
 0x572   : > { %6763 = vst [vmem:[#allocation48_spill] sm:$0xff] %v5793_v62  ;;  %v5796_v51 = vpop.f32.mrb[66].mxu0 }
 0x573   : > { %6764 = vst [vmem:[#allocation49_spill] sm:$0xff] %v5796_v51  ;;  %1948 = vmax.xlane.f32.xlu1 %v5796_v51  ;;  %v5799_v55 = vpop.f32.mrb[67].mxu0  ;;  %v6020_v51 = vld [vmem:[#allocation5 + $0xa0] sm:$0xff] }
 0x574   : > { %6765 = vst [vmem:[#allocation50_spill] sm:$0xff] %v5799_v55 }
 0x575   : > { %1942 = vmax.xlane.f32.xlu0 %v5793_v62 }
 0x577   : > { %1944 = vmax.xlane.f32.xlu1 %v5799_v55 }
 0x578   : > { %v5803_v60 = vpop.f32.mrb[68].mxu0 }
 0x579   : > { %6766 = vst [vmem:[#allocation51_spill] sm:$0xff] %v5803_v60  ;;  %v5805_v4 = vpop.f32.mrb[69].mxu0  ;;  %1954 = vmax.xlane.f32.xlu0 %v5803_v60 }
 0x57a   : > { %6767 = vst [vmem:[#allocation52_spill] sm:$0xff] %v5805_v4  ;;  %v5808_v12 = vpop.f32.mrb[70].mxu0 }
 0x57b   : > { %6768 = vst [vmem:[#allocation53_spill] sm:$0xff] %v5808_v12  ;;  %1956 = vmax.xlane.f32.xlu1 %v5808_v12  ;;  %v5811_v18 = vpop.f32.mrb[71].mxu0  ;;  %v6004_v12 = vld [vmem:[#allocation5 + $0xb0] sm:$0xff] }
 0x57c   : > { %6769 = vst [vmem:[#allocation54_spill] sm:$0xff] %v5811_v18 }
 0x57d   : > { %1950 = vmax.xlane.f32.xlu0 %v5805_v4  ;;  %v5996_v4 = vld [vmem:[#allocation5 + $0x88] sm:$0xff] }
 0x57f   : > { %1952 = vmax.xlane.f32.xlu1 %v5811_v18  ;;  %v6012_v18 = vld [vmem:[#allocation5 + $0xb8] sm:$0xff] }
 0x580   : > { %v5815_v20 = vpop.f32.mrb[72].mxu0 }
 0x581   : > { %6770 = vst [vmem:[#allocation55_spill] sm:$0xff] %v5815_v20  ;;  %v5817_v50 = vpop.f32.mrb[73].mxu0  ;;  %1962 = vmax.xlane.f32.xlu0 %v5815_v20  ;;  %v5970_v20 = vld [vmem:[#allocation5 + $0x90] sm:$0xff] }
 0x582   : > { %6771 = vst [vmem:[#allocation56_spill] sm:$0xff] %v5817_v50  ;;  %v5820_v23 = vpop.f32.mrb[74].mxu0 }
 0x583   : > { %6772 = vst [vmem:[#allocation57_spill] sm:$0xff] %v5820_v23  ;;  %1964 = vmax.xlane.f32.xlu1 %v5820_v23  ;;  %v5823_v11 = vpop.f32.mrb[75].mxu0  ;;  %v5986_v23 = vld [vmem:[#allocation5 + $0x80] sm:$0xff] }
 0x584   : > { %6773 = vst [vmem:[#allocation58_spill] sm:$0xff] %v5823_v11 }
 0x585   : > { %1958 = vmax.xlane.f32.xlu0 %v5817_v50 }
 0x587   : > { %1960 = vmax.xlane.f32.xlu1 %v5823_v11 }
 0x588   : > { %v5827_v52 = vpop.f32.mrb[76].mxu0 }
 0x589   : > { %6774 = vst [vmem:[#allocation59_spill] sm:$0xff] %v5827_v52  ;;  %v5829_v56 = vpop.f32.mrb[77].mxu0  ;;  %1970 = vmax.xlane.f32.xlu0 %v5827_v52  ;;  %v5952_v52 = vld [vmem:[#allocation5 + $0x60] sm:$0xff] }
 0x58a   : > { %6775 = vst [vmem:[#allocation60_spill] sm:$0xff] %v5829_v56  ;;  %v5832_v14 = vpop.f32.mrb[78].mxu0 }
 0x58b   : > { %6776 = vst [vmem:[#allocation61_spill] sm:$0xff] %v5832_v14  ;;  %1972 = vmax.xlane.f32.xlu1 %v5832_v14  ;;  %v5835_v42 = vpop.f32.mrb[79].mxu0  ;;  %v5962_v14 = vld [vmem:[#allocation5 + $0x68] sm:$0xff] }
 0x58c   : > { %6777 = vst [vmem:[#allocation62_spill] sm:$0xff] %v5835_v42 }
 0x58d   : > { %1966 = vmax.xlane.f32.xlu0 %v5829_v56 }
 0x58f   : > { %1968 = vmax.xlane.f32.xlu1 %v5835_v42  ;;  %v5978_v42 = vld [vmem:[#allocation5 + $0x98] sm:$0xff] }
 0x5de   : > { %v1915_v43 = vpop.xlane.xlu0 %1914 }
 0x5df   : > { %v5848_v31 = vmax.f32 %v5843_v29, %v1915_v43 }
 0x5e0   : > { %v1917_v40 = vpop.xlane.xlu1 %1916 }
 0x5e1   : > { %3098 = vst.msk [vmem:[#allocation5 + $0x10] sm:$0xff] %vm2550_vm1, %v5848_v31  ;;  %v5857_v16 = vmax.f32 %v5845_v45, %v1917_v40  ;;  %2146 = vperm.xlu1 %4455, %v5848_v31   ;;  %v5917_v40 = vld [vmem:[#allocation5 + $0x40] sm:$0xff] }
 0x5e2   : > { %v1911_v54 = vpop.xlane.xlu0 %1910 }
 0x5e3   : > { %3099 = vst.msk [vmem:[#allocation5 + $0x18] sm:$0xff] %vm2550_vm1, %v5857_v16  ;;  %v5865_v46 = vmax.f32 %v5850_v27, %v1911_v54  ;;  %v5943_v54 = vld [vmem:[#allocation5 + $0x78] sm:$0xff] }
 0x5e4   : > { %v1913_v7 = vpop.xlane.xlu1 %1912 }
 0x5e5   : > { %3096 = vst.msk [vmem:[#allocation5] sm:$0xff] %vm2550_vm1, %v5865_v46  ;;  %v5872_v34 = vmax.f32 %v5860_v33, %v1913_v7  ;;  %2136 = vperm.xlu0 %4454, %v5865_v46   ;;  %2151 = vperm.xlu1 %4455, %v5857_v16   ;;  %v2038_v36 = vsub.f32 %v5850_v27, %v5865_v46 }
 0x5e6   : > { %v1923_v17 = vpop.xlane.xlu0 %1922  ;;  %v2041_v27 = vsub.f32 %v5845_v45, %v5857_v16  ;;  %v6102_v45 = vld [vmem:[#allocation5 + $0xe8] sm:$0xff] }
 0x5e7   : > { %3097 = vst.msk [vmem:[#allocation5 + $0x8] sm:$0xff] %vm2550_vm1, %v5872_v34  ;;  %v5882_v22 = vmax.f32 %v5867_v8, %v1923_v17  ;;  %v5927_v17 = vld [vmem:[#allocation5 + $0x48] sm:$0xff]  ;;  %v2070_v46 = vmul.f32 1.442695, %v2038_v36 }
 0x5e8   : > { %v1925_v35 = vpop.xlane.xlu1 %1924 }
 0x5e9   : > { %3102 = vst.msk [vmem:[#allocation5 + $0x30] sm:$0xff] %vm2550_vm1, %v5882_v22  ;;  %v5891_v49 = vmax.f32 %v5877_v9, %v1925_v35  ;;  %2141 = vperm.xlu1 %4455, %v5872_v34   ;;  %v4494_v35 = vld [vmem:[%s5503_s29 + $0x30] sm:$0xff]   ;;  %4592 = vpow2.f32 %v2070_v46 }
 0x5ea   : > { %v1919_v39 = vpop.xlane.xlu0 %1918  ;;  %4231 = vmatprep.subr.bf16.mxu1 %v4494_v35 }
 0x5eb   : > { %3103 = vst.msk [vmem:[#allocation5 + $0x38] sm:$0xff] %vm2550_vm1, %v5891_v49  ;;  %v5899_v2 = vmax.f32 %v5884_v37, %v1919_v39  ;;  %4232 = vmatpush3.bf16.msra.mxu1 %v4494_v35 }
 0x5ec   : > { %v1921_v53 = vpop.xlane.xlu1 %1920  ;;  %4233 = vmatprep.subr.bf16.mxu1 %v4495_v48 }
 0x5ed   : > { %3100 = vst.msk [vmem:[#allocation5 + $0x20] sm:$0xff] %vm2550_vm1, %v5899_v2  ;;  %v5906_v26 = vmax.f32 %v5894_v24, %v1921_v53  ;;  %2166 = vperm.xlu1 %4455, %v5882_v22   ;;  %v2042_v46 = vsub.f32 %v5884_v37, %v5899_v2 }
 0x5ee   : > { %v1931_v25 = vpop.xlane.xlu0 %1930 }
 0x5ef   : > { %3101 = vst.msk [vmem:[#allocation5 + $0x28] sm:$0xff] %vm2550_vm1, %v5906_v26  ;;  %v5915_v3 = vmax.f32 %v5901_v57, %v1931_v25  ;;  %4234 = vmatpush3.bf16.msra.mxu1 %v4495_v48  ;;  %v2043_v21 = vsub.f32 %v5894_v24, %v5906_v26 }
 0x5f0   : > { %v1933_v43 = vpop.xlane.xlu1 %1932 }
 0x5f1   : > { %3106 = vst.msk [vmem:[#allocation5 + $0x50] sm:$0xff] %vm2550_vm1, %v5915_v3  ;;  %v5924_v7 = vmax.f32 %v5910_v1, %v1933_v43  ;;  %2156 = vperm.xlu1 %4455, %v5899_v2   ;;  %v2080_v24 = vmul.f32 1.442695, %v2043_v21 }
 0x5f2   : > { %v1927_v58 = vpop.xlane.xlu0 %1926 }
 0x5f3   : > { %3107 = vst.msk [vmem:[#allocation5 + $0x58] sm:$0xff] %vm2550_vm1, %v5924_v7  ;;  %v5933_v39 = vmax.f32 %v5917_v40, %v1927_v58  ;;  %v6135_v21 = vpop.eup %4592 }
 0x5f4   : > { %v1929_v53 = vpop.xlane.xlu1 %1928 }
 0x5f5   : > { %3104 = vst.msk [vmem:[#allocation5 + $0x40] sm:$0xff] %vm2550_vm1, %v5933_v39  ;;  %v5940_v25 = vmax.f32 %v5927_v17, %v1929_v53  ;;  %2161 = vperm.xlu1 %4455, %v5906_v26   ;;  %v6780_v26 = vsub.f32 %v5843_v29, %v5848_v31  ;;  %v2049_v29 = vsub.f32 %v5910_v1, %v5924_v7 }
 0x5f6   : > { %v1939_v43 = vpop.xlane.xlu0 %1938 }
 0x5f7   : > { %3105 = vst.msk [vmem:[#allocation5 + $0x48] sm:$0xff] %vm2550_vm1, %v5940_v25  ;;  %2181 = vperm.xlu0 %4454, %v5940_v25   ;;  %v5950_v58 = vmax.f32 %v5935_v10, %v1939_v43 }
 0x5f8   : > { %v1941_v15 = vpop.xlane.xlu1 %1940 }
 0x5f9   : > { %3110 = vst.msk [vmem:[#allocation5 + $0x70] sm:$0xff] %vm2550_vm1, %v5950_v58  ;;  %v5959_v35 = vmax.f32 %v5943_v54, %v1941_v15  ;;  %2171 = vperm.xlu1 %4455, %v5891_v49  }
 0x5fa   : > { %v1935_v56 = vpop.xlane.xlu0 %1934 }
 0x5fb   : > { %3111 = vst.msk [vmem:[#allocation5 + $0x78] sm:$0xff] %vm2550_vm1, %v5959_v35  ;;  %2191 = vperm.xlu0 %4454, %v5924_v7   ;;  %v5968_v43 = vmax.f32 %v5952_v52, %v1935_v56 }
 0x5fc   : > { %v1937_v53 = vpop.xlane.xlu1 %1936 }
 0x5fd   : > { %3108 = vst.msk [vmem:[#allocation5 + $0x60] sm:$0xff] %vm2550_vm1, %v5968_v43  ;;  %v5975_v15 = vmax.f32 %v5962_v14, %v1937_v53  ;;  %2176 = vperm.xlu1 %4455, %v5933_v39  }
 0x5fe   : > { %v1947_v48 = vpop.xlane.xlu0 %1946 }
 0x5ff   : > { %3109 = vst.msk [vmem:[#allocation5 + $0x68] sm:$0xff] %vm2550_vm1, %v5975_v15  ;;  %2201 = vperm.xlu0 %4454, %v5975_v15   ;;  %v5984_v56 = vmax.f32 %v5970_v20, %v1947_v48  ;;  %v2051_v1 = vsub.f32 %v5962_v14, %v5975_v15  ;;  %v6782_v14 = vsub.f32 %v5901_v57, %v5915_v3 }
 0x600   : > { %v1949_v50 = vpop.xlane.xlu1 %1948 }
 0x601   : > { %3114 = vst.msk [vmem:[#allocation5 + $0x90] sm:$0xff] %vm2550_vm1, %v5984_v56  ;;  %v5993_v60 = vmax.f32 %v5978_v42, %v1949_v50  ;;  %2186 = vperm.xlu1 %4455, %v5915_v3   ;;  %v2090_v15 = vmul.f32 1.442695, %v6782_v14 }
 0x602   : > { %v1943_v11 = vpop.xlane.xlu0 %1942 }
 0x603   : > { %3115 = vst.msk [vmem:[#allocation5 + $0x98] sm:$0xff] %vm2550_vm1, %v5993_v60  ;;  %2211 = vperm.xlu0 %4454, %v5959_v35   ;;  %v6002_v48 = vmax.f32 %v5986_v23, %v1943_v11 }
 0x604   : > { %v1945_v53 = vpop.xlane.xlu1 %1944 }
 0x605   : > { %3112 = vst.msk [vmem:[#allocation5 + $0x80] sm:$0xff] %vm2550_vm1, %v6002_v48  ;;  %v6009_v50 = vmax.f32 %v5996_v4, %v1945_v53  ;;  %2196 = vperm.xlu1 %4455, %v5968_v43  }
 0x606   : > { %v1955_v59 = vpop.xlane.xlu0 %1954 }
 0x607   : > { %3113 = vst.msk [vmem:[#allocation5 + $0x88] sm:$0xff] %vm2550_vm1, %v6009_v50  ;;  %2221 = vperm.xlu0 %4454, %v6009_v50   ;;  %v6018_v11 = vmax.f32 %v6004_v12, %v1955_v59 }
 0x608   : > { %v1957_v62 = vpop.xlane.xlu1 %1956 }
 0x609   : > { %3118 = vst.msk [vmem:[#allocation5 + $0xb0] sm:$0xff] %vm2550_vm1, %v6018_v11  ;;  %v6027_v28 = vmax.f32 %v6012_v18, %v1957_v62  ;;  %2206 = vperm.xlu1 %4455, %v5950_v58  }
 0x60a   : > { %v1951_v55 = vpop.xlane.xlu0 %1950 }
 0x60b   : > { %3119 = vst.msk [vmem:[#allocation5 + $0xb8] sm:$0xff] %vm2550_vm1, %v6027_v28  ;;  %2231 = vperm.xlu0 %4454, %v5993_v60   ;;  %v6036_v59 = vmax.f32 %v6020_v51, %v1951_v55 }
 0x60c   : > { %v1953_v53 = vpop.xlane.xlu1 %1952 }
 0x60d   : > { %3116 = vst.msk [vmem:[#allocation5 + $0xa0] sm:$0xff] %vm2550_vm1, %v6036_v59  ;;  %v6043_v62 = vmax.f32 %v6030_v41, %v1953_v53  ;;  %2216 = vperm.xlu1 %4455, %v6002_v48  }
 0x60e   : > { %v1963_v44 = vpop.xlane.xlu0 %1962 }
 0x60f   : > { %3117 = vst.msk [vmem:[#allocation5 + $0xa8] sm:$0xff] %vm2550_vm1, %v6043_v62  ;;  %2241 = vperm.xlu0 %4454, %v6043_v62   ;;  %v6052_v55 = vmax.f32 %v6038_v47, %v1963_v44 }
 0x610   : > { %v1965_v5 = vpop.xlane.xlu1 %1964 }
 0x611   : > { %3122 = vst.msk [vmem:[#allocation5 + $0xd0] sm:$0xff] %vm2550_vm1, %v6052_v55  ;;  %v6059_v53 = vmax.f32 %v6046_v63, %v1965_v5  ;;  %2226 = vperm.xlu1 %4455, %v5984_v56  }
 0x612   : > { %v1959_v13 = vpop.xlane.xlu0 %1958 }
 0x613   : > { %3123 = vst.msk [vmem:[#allocation5 + $0xd8] sm:$0xff] %vm2550_vm1, %v6059_v53  ;;  %2251 = vperm.xlu0 %4454, %v6027_v28   ;;  %v6068_v44 = vmax.f32 %v6054_v61, %v1959_v13 }
 0x614   : > { %v1961_v19 = vpop.xlane.xlu1 %1960 }
 0x615   : > { %3120 = vst.msk [vmem:[#allocation5 + $0xc0] sm:$0xff] %vm2550_vm1, %v6068_v44  ;;  %v6077_v5 = vmax.f32 %v6062_v38, %v1961_v19  ;;  %2236 = vperm.xlu1 %4455, %v6036_v59   ;;  %v6090_v19 = vld [vmem:[#allocation5 + $0xe0] sm:$0xff] }
 0x616   : > { %v1971_v32 = vpop.xlane.xlu0 %1970 }
 0x617   : > { %3121 = vst.msk [vmem:[#allocation5 + $0xc8] sm:$0xff] %vm2550_vm1, %v6077_v5  ;;  %2261 = vperm.xlu0 %4454, %v6077_v5   ;;  %v6086_v13 = vmax.f32 %v6072_v6, %v1971_v32  ;;  %v2039_v32 = vsub.f32 %v5860_v33, %v5872_v34 }
 0x618   : > { %v1973_v0 = vpop.xlane.xlu1 %1972 }
 0x619   : > { %3126 = vst.msk [vmem:[#allocation5 + $0xf0] sm:$0xff] %vm2550_vm1, %v6086_v13  ;;  %v6097_v61 = vmax.f32 %v6080_v30, %v1973_v0  ;;  %2246 = vperm.xlu1 %4455, %v6018_v11   ;;  %v2076_v0 = vmul.f32 1.442695, %v2041_v27  ;;  %v2072_v36 = vmul.f32 1.442695, %v2039_v32 }
 0x61a   : > { %v1967_v47 = vpop.xlane.xlu0 %1966  ;;  %v2074_v27 = vmul.f32 1.442695, %v6780_v26 }
 0x61b   : > { %3127 = vst.msk [vmem:[#allocation5 + $0xf8] sm:$0xff] %vm2550_vm1, %v6097_v61  ;;  %2271 = vperm.xlu0 %4454, %v6059_v53   ;;  %v6110_v16 = vmax.f32 %v6090_v19, %v1967_v47  ;;  %4594 = vpow2.f32 %v2076_v0  ;;  %v2045_v47 = vsub.f32 %v5877_v9, %v5891_v49  ;;  %v2047_v0 = vsub.f32 %v5927_v17, %v5940_v25 }
 0x61c   : > { %v1969_v33 = vpop.xlane.xlu1 %1968  ;;  %4596 = vpow2.f32 %v2072_v36  ;;  %v2078_v9 = vmul.f32 1.442695, %v2042_v46  ;;  %v6781_v49 = vsub.f32 %v5867_v8, %v5882_v22  ;;  %v2046_v17 = vsub.f32 %v5917_v40, %v5933_v39 }
 0x61d   : > { %3124 = vst.msk [vmem:[#allocation5 + $0xe0] sm:$0xff] %vm2550_vm1, %v6110_v16  ;;  %v6117_v34 = vmax.f32 %v6102_v45, %v1969_v33  ;;  %2256 = vperm.xlu1 %4455, %v6068_v44   ;;  %v2084_v32 = vmul.f32 1.442695, %v2045_v47  ;;  %4598 = vpow2.f32 %v2080_v24  ;;  %v2088_v31 = vmul.f32 1.442695, %v2047_v0 }
 0x61e   : > { %4600 = vpow2.f32 %v2074_v27  ;;  %v2082_v2 = vmul.f32 1.442695, %v6781_v49  ;;  %v2092_v36 = vmul.f32 1.442695, %v2049_v29  ;;  %v2086_v8 = vmul.f32 1.442695, %v2046_v17 }
 0x61f   : > { %3125 = vst.msk [vmem:[#allocation5 + $0xe8] sm:$0xff] %vm2550_vm1, %v6117_v34  ;;  %2281 = vperm.xlu0 %4454, %v6117_v34   ;;  %4602 = vpow2.f32 %v2084_v32  ;;  %v2053_v40 = vsub.f32 %v5943_v54, %v5959_v35  ;;  %v2096_v39 = vmul.f32 1.442695, %v2051_v1  ;;  %v2050_v47 = vsub.f32 %v5952_v52, %v5968_v43  ;;  %v6786_v17 = vld [vmem:[#allocation63_spill] sm:$0xff] }
 0x620   : > { %4604 = vpow2.f32 %v2078_v9  ;;  %v2055_v54 = vsub.f32 %v5996_v4, %v6009_v50  ;;  %v2057_v52 = vsub.f32 %v5978_v42, %v5993_v60  ;;  %v6783_v4 = vsub.f32 %v5935_v10, %v5950_v58 }
 0x621   : > { %2266 = vperm.xlu1 %4455, %v6052_v55   ;;  %4606 = vpow2.f32 %v2088_v31  ;;  %v2100_v26 = vmul.f32 1.442695, %v2053_v40  ;;  %v2094_v57 = vmul.f32 1.442695, %v2050_v47  ;;  %v2054_v46 = vsub.f32 %v5986_v23, %v6002_v48 }
 0x622   : > { %4608 = vpow2.f32 %v2082_v2  ;;  %v2104_v43 = vmul.f32 1.442695, %v2055_v54  ;;  %v2098_v50 = vmul.f32 1.442695, %v6783_v4  ;;  %v2108_v0 = vmul.f32 1.442695, %v2057_v52 }
 0x623   : > { %2291 = vperm.xlu0 %4454, %v6097_v61   ;;  %4610 = vpow2.f32 %v2092_v36  ;;  %v2059_v60 = vsub.f32 %v6030_v41, %v6043_v62  ;;  %v2102_v10 = vmul.f32 1.442695, %v2054_v46  ;;  %v2061_v23 = vsub.f32 %v6012_v18, %v6027_v28 }
 0x624   : > { %4612 = vpow2.f32 %v2086_v8  ;;  %v6784_v41 = vsub.f32 %v5970_v20, %v5984_v56  ;;  %v2058_v29 = vsub.f32 %v6020_v51, %v6036_v59  ;;  %v2065_v28 = vsub.f32 %v6046_v63, %v6059_v53 }
 0x625   : > { %2276 = vperm.xlu1 %4455, %v6110_v16   ;;  %v6141_v37 = vpop.eup %4594  ;;  %4614 = vpow2.f32 %v2096_v39  ;;  %v2112_v48 = vmul.f32 1.442695, %v2059_v60  ;;  %v2116_v49 = vmul.f32 1.442695, %v2061_v23  ;;  %v2063_v59 = vsub.f32 %v6062_v38, %v6077_v5 }
 0x626   : > { %v6149_v25 = vpop.eup %4596  ;;  %4616 = vpow2.f32 %v2090_v15  ;;  %v2106_v62 = vmul.f32 1.442695, %v6784_v41  ;;  %v2110_v20 = vmul.f32 1.442695, %v2058_v29  ;;  %v2124_v51 = vmul.f32 1.442695, %v2065_v28 }
 0x627   : > { %2617 = vperm.xlu0 %4454, %v6135_v21   ;;  %v6154_v7 = vpop.eup %4598  ;;  %4618 = vpow2.f32 %v2100_v26  ;;  %v6785_v63 = vsub.f32 %v6004_v12, %v6018_v11  ;;  %v2064_v36 = vsub.f32 %v6786_v17, %v6052_v55  ;;  %v2120_v8 = vmul.f32 1.442695, %v2063_v59  ;;  %v6787_v11 = vld [vmem:[#allocation64_spill] sm:$0xff]  ;;  %v6791_v28 = vld [vmem:[#allocation34_spill] sm:$0xff] }
 0x628   : > { %v6157_v22 = vpop.eup %4600  ;;  %4620 = vpow2.f32 %v2094_v57  ;;  %v2067_v38 = vsub.f32 %v6102_v45, %v6117_v34  ;;  %v2062_v40 = vsub.f32 %v6787_v11, %v6068_v44  ;;  %v2066_v34 = vsub.f32 %v6090_v19, %v6110_v16 }
 0x629   : > { %2286 = vperm.xlu1 %4455, %v6086_v13   ;;  %v6162_v33 = vpop.eup %4602  ;;  %4622 = vpow2.f32 %v2104_v43  ;;  %v2114_v53 = vmul.f32 1.442695, %v6785_v63  ;;  %v2122_v12 = vmul.f32 1.442695, %v2064_v36  ;;  %v6788_v43 = vld [vmem:[#allocation31_spill] sm:$0xff] }
 0x62a   : > { %v6170_v24 = vpop.eup %4604  ;;  %4624 = vpow2.f32 %v2098_v50  ;;  %v2128_v39 = vmul.f32 1.442695, %v2067_v38  ;;  %v2118_v45 = vmul.f32 1.442695, %v2062_v40  ;;  %v2126_v47 = vmul.f32 1.442695, %v2066_v34 }
 0x62b   : > { %2632 = vperm.xlu0 %4454, %v6141_v37   ;;  %v6175_v35 = vpop.eup %4606  ;;  %4626 = vpow2.f32 %v2108_v0 }
 0x62c   : > { %v6178_v3 = vpop.eup %4608  ;;  %4628 = vpow2.f32 %v2102_v10  ;;  %v6789_v10 = vld [vmem:[#allocation32_spill] sm:$0xff] }
 0x62d   : > { %2622 = vperm.xlu1 %4455, %v6149_v25   ;;  %v6183_v27 = vpop.eup %4610  ;;  %4630 = vpow2.f32 %v2112_v48  ;;  %v6790_v48 = vld [vmem:[#allocation33_spill] sm:$0xff] }
 0x62e   : > { %v6191_v32 = vpop.eup %4612  ;;  %4632 = vpow2.f32 %v2106_v62 }
 0x62f   : > { %2642 = vperm.xlu0 %4454, %v6154_v7   ;;  %v6196_v42 = vpop.eup %4614  ;;  %4634 = vpow2.f32 %v2116_v49 }
 0x630   : > { %v6199_v58 = vpop.eup %4616  ;;  %4636 = vpow2.f32 %v2110_v20 }
 0x631   : > { %2627 = vperm.xlu1 %4455, %v6157_v22   ;;  %v6204_v9 = vpop.eup %4618  ;;  %4638 = vpow2.f32 %v2124_v51 }
 0x632   : > { %v6212_v31 = vpop.eup %4620  ;;  %4640 = vpow2.f32 %v2114_v53  ;;  %v6792_v53 = vld [vmem:[#allocation36_spill] sm:$0xff] }
 0x633   : > { %2652 = vperm.xlu0 %4454, %v6162_v33   ;;  %v6217_v18 = vpop.eup %4622  ;;  %4642 = vpow2.f32 %v2120_v8  ;;  %v6793_v8 = vld [vmem:[#allocation35_spill] sm:$0xff] }
 0x634   : > { %v6220_v56 = vpop.eup %4624  ;;  %4644 = vpow2.f32 %v2122_v12 }
 0x635   : > { %2637 = vperm.xlu1 %4455, %v6170_v24   ;;  %v6225_v2 = vpop.eup %4626  ;;  %4646 = vpow2.f32 %v2128_v39  ;;  %v6794_v39 = vld [vmem:[#allocation38_spill] sm:$0xff] }
 0x636   : > { %v6233_v1 = vpop.eup %4628  ;;  %4648 = vpow2.f32 %v2118_v45 }
 0x637   : > { %2662 = vperm.xlu0 %4454, %v6175_v35   ;;  %v6238_v5 = vpop.eup %4630  ;;  %4650 = vpow2.f32 %v2126_v47 }
 0x638   : > { %v6243_v55 = vpop.eup %4632 }
 0x639   : > { %2647 = vperm.xlu1 %4455, %v6178_v3   ;;  %v6246_v14 = vpop.eup %4634 }
 0x63a   : > { %v6251_v15 = vpop.eup %4636 }
 0x63b   : > { %2672 = vperm.xlu0 %4454, %v6183_v27   ;;  %v6254_v44 = vpop.eup %4638 }
 0x63c   : > { %v6257_v26 = vpop.eup %4640 }
 0x63d   : > { %2657 = vperm.xlu1 %4455, %v6191_v32   ;;  %v6260_v54 = vpop.eup %4642 }
 0x63e   : > { %v6263_v19 = vpop.eup %4644 }
 0x63f   : > { %2682 = vperm.xlu0 %4454, %v6196_v42   ;;  %v6266_v16 = vpop.eup %4646 }
 0x640   : > { %v6269_v57 = vpop.eup %4648 }
 0x641   : > { %2667 = vperm.xlu1 %4455, %v6199_v58   ;;  %v6273_v50 = vpop.eup %4650 }
 0x643   : > { %2692 = vperm.xlu0 %4454, %v6204_v9  }
 0x645   : > { %2677 = vperm.xlu1 %4455, %v6212_v31  }
 0x647   : > { %2702 = vperm.xlu0 %4454, %v6217_v18  }
 0x649   : > { %2687 = vperm.xlu1 %4455, %v6220_v56  }
 0x64b   : > { %2712 = vperm.xlu0 %4454, %v6225_v2  }
 0x64d   : > { %2697 = vperm.xlu1 %4455, %v6233_v1  }
 0x64f   : > { %2722 = vperm.xlu0 %4454, %v6238_v5  }
 0x651   : > { %2707 = vperm.xlu1 %4455, %v6243_v55  }
 0x653   : > { %2732 = vperm.xlu0 %4454, %v6246_v14  }
 0x655   : > { %2717 = vperm.xlu1 %4455, %v6251_v15  }
 0x657   : > { %2752 = vperm.xlu0 %4454, %v6254_v44  }
 0x659   : > { %2727 = vperm.xlu1 %4455, %v6257_v26  }
 0x65b   : > { %2742 = vperm.xlu0 %4454, %v6260_v54  }
 0x65d   : > { %2747 = vperm.xlu1 %4455, %v6263_v19  }
 0x65f   : > { %2762 = vperm.xlu0 %4454, %v6266_v16  }
 0x660   : > { %v2147_v52 = vpop.permute.xlu1 %2146 }
 0x661   : > { %v2296_v4 = vsub.f32 %v6788_v43, %v2147_v52  ;;  %2737 = vperm.xlu1 %4455, %v6269_v57  }
 0x663   : > { %v2330_v60 = vmul.f32 1.442695, %v2296_v4 }
 0x664   : > { %v2137_v46 = vpop.permute.xlu0 %2136  ;;  %v2152_v0 = vpop.permute.xlu1 %2151 }
 0x665   : > { %v2294_v23 = vsub.f32 %v6789_v10, %v2137_v46  ;;  %v2297_v41 = vsub.f32 %v6790_v48, %v2152_v0  ;;  %2757 = vperm.xlu1 %4455, %v6273_v50   ;;  %4652 = vpow2.f32 %v2330_v60  ;;  %v6795_v0 = vld [vmem:[#allocation42_spill] sm:$0xff]  ;;  %v6796_v48 = vld [vmem:[#allocation37_spill] sm:$0xff] }
 0x667   : > { %v2332_v62 = vmul.f32 1.442695, %v2297_v41  ;;  %v2326_v29 = vmul.f32 1.442695, %v2294_v23 }
 0x668   : > { %v2142_v49 = vpop.permute.xlu1 %2141 }
 0x669   : > { %v2295_v20 = vsub.f32 %v6791_v28, %v2142_v49  ;;  %4654 = vpow2.f32 %v2332_v62  ;;  %v6797_v28 = vld [vmem:[#allocation41_spill] sm:$0xff] }
 0x66a   : > { %4656 = vpow2.f32 %v2326_v29 }
 0x66b   : > { %v2328_v51 = vmul.f32 1.442695, %v2295_v20 }
 0x66c   : > { %v2167_v59 = vpop.permute.xlu1 %2166 }
 0x66d   : > { %4658 = vpow2.f32 %v2328_v51  ;;  %v2300_v38 = vsub.f32 %v6793_v8, %v2167_v59  ;;  %v6798_v59 = vld [vmem:[#allocation40_spill] sm:$0xff] }
 0x66f   : > { %v4653_v36 = vpop.eup %4652  ;;  %v2338_v4 = vmul.f32 1.442695, %v2300_v38  ;;  %v6799_v38 = vld [vmem:[#allocation46_spill] sm:$0xff] }
 0x670   : > { %v2157_v63 = vpop.permute.xlu1 %2156 }
 0x671   : > { %v2298_v17 = vsub.f32 %v6792_v53, %v2157_v63 }
 0x673   : > { %v6281_v12 = vpop.eup %4654  ;;  %v2334_v11 = vmul.f32 1.442695, %v2298_v17 }
 0x674   : > { %v2162_v40 = vpop.permute.xlu1 %2161  ;;  %v2808_v34 = vpack.c.bf16 %v6281_v12, %v4653_v36  ;;  %v4657_v47 = vpop.eup %4656 }
 0x675   : > { %v2299_v45 = vsub.f32 %v6794_v39, %v2162_v40  ;;  %4660 = vpow2.f32 %v2334_v11  ;;  %v6800_v39 = vld [vmem:[#allocation39_spill] sm:$0xff] }
 0x676   : > { %v2182_v52 = vpop.permute.xlu0 %2181 }
 0x677   : > { %v4659_v43 = vpop.eup %4658  ;;  %v2336_v46 = vmul.f32 1.442695, %v2299_v45  ;;  %v2303_v60 = vsub.f32 %v6795_v0, %v2182_v52 }
 0x678   : > { %v2172_v10 = vpop.permute.xlu1 %2171  ;;  %v2807_v23 = vpack.c.bf16 %v4659_v43, %v4657_v47 }
 0x679   : > { %4662 = vpow2.f32 %v2336_v46  ;;  %v2301_v41 = vsub.f32 %v6796_v48, %v2172_v10  ;;  %v2344_v49 = vmul.f32 1.442695, %v2303_v60  ;;  %v6801_v60 = vld [vmem:[#allocation45_spill] sm:$0xff] }
 0x67a   : > { %v2192_v62 = vpop.permute.xlu0 %2191  ;;  %4235 = vmatprep.mubr.bf16.mxu1 %v2807_v23  ;;  %4664 = vpow2.f32 %v2338_v4 }
 0x67b   : > { %v2340_v29 = vmul.f32 1.442695, %v2301_v41  ;;  %4236 = vmatmul.mubr.bf16.vlgmr.msra.gmra.mrb[32].mxu1 %v2808_v34  ;;  %v2305_v20 = vsub.f32 %v6797_v28, %v2192_v62  ;;  %v6802_v41 = vld [vmem:[#allocation44_spill] sm:$0xff] }
 0x67c   : > { %v2177_v51 = vpop.permute.xlu1 %2176 }
 0x67d   : > { %4666 = vpow2.f32 %v2340_v29  ;;  %v2302_v63 = vsub.f32 %v6798_v59, %v2177_v51  ;;  %v2348_v8 = vmul.f32 1.442695, %v2305_v20  ;;  %v6803_v20 = vld [vmem:[#allocation50_spill] sm:$0xff] }
 0x67e   : > { %v2202_v53 = vpop.permute.xlu0 %2201  ;;  %2458 = vadd.xlane.f32.xlu0 %v4653_v36  ;;  %4668 = vpow2.f32 %v2344_v49 }
 0x67f   : > { %v2342_v17 = vmul.f32 1.442695, %v2302_v63  ;;  %v2307_v11 = vsub.f32 %v6799_v38, %v2202_v53  ;;  %v4661_v52 = vpop.eup %4660  ;;  %v6804_v53 = vld [vmem:[#allocation43_spill] sm:$0xff] }
 0x680   : > { %v2187_v40 = vpop.permute.xlu1 %2186 }
 0x681   : > { %4670 = vpow2.f32 %v2342_v17  ;;  %v2304_v45 = vsub.f32 %v6800_v39, %v2187_v40  ;;  %v2352_v0 = vmul.f32 1.442695, %v2307_v11 }
 0x682   : > { %v2212_v34 = vpop.permute.xlu0 %2211  ;;  %2456 = vadd.xlane.f32.xlu0 %v4659_v43  ;;  %4672 = vpow2.f32 %v2348_v8 }
 0x683   : > { %v6291_v4 = vpop.eup %4662  ;;  %v2346_v46 = vmul.f32 1.442695, %v2304_v45  ;;  %v2309_v10 = vsub.f32 %v6801_v60, %v2212_v34  ;;  %v6805_v45 = vld [vmem:[#allocation49_spill] sm:$0xff]  ;;  %v6806_v60 = vld [vmem:[#allocation48_spill] sm:$0xff] }
 0x684   : > { %v2197_v36 = vpop.permute.xlu1 %2196  ;;  %v2809_v23 = vpack.c.bf16 %v6291_v4, %v4661_v52  ;;  %v4665_v48 = vpop.eup %4664 }
 0x685   : > { %4674 = vpow2.f32 %v2346_v46  ;;  %v2306_v62 = vsub.f32 %v6802_v41, %v2197_v36  ;;  %v2356_v43 = vmul.f32 1.442695, %v2309_v10  ;;  %v6807_v41 = vld [vmem:[#allocation54_spill] sm:$0xff] }
 0x686   : > { %v2222_v29 = vpop.permute.xlu0 %2221  ;;  %2466 = vadd.xlane.f32.xlu0 %v4665_v48  ;;  %4239 = vmatprep.mubr.bf16.mxu1 %v2809_v23  ;;  %4676 = vpow2.f32 %v2352_v0 }
 0x687   : > { %v4667_v49 = vpop.eup %4666  ;;  %v2350_v28 = vmul.f32 1.442695, %v2306_v62  ;;  %v2311_v51 = vsub.f32 %v6803_v20, %v2222_v29 }
 0x688   : > { %v2207_v59 = vpop.permute.xlu1 %2206  ;;  %v2810_v63 = vpack.c.bf16 %v4667_v49, %v4665_v48  ;;  %v6298_v8 = vpop.eup %4668 }
 0x689   : > { %4678 = vpow2.f32 %v2350_v28  ;;  %v2308_v17 = vsub.f32 %v6804_v53, %v2207_v59  ;;  %2454 = vadd.xlane.f32.xlu1 %v4657_v47  ;;  %v2360_v39 = vmul.f32 1.442695, %v2311_v51 }
 0x68a   : > { %v2232_v38 = vpop.permute.xlu0 %2231  ;;  %2462 = vadd.xlane.f32.xlu0 %v4661_v52  ;;  %4240 = vmatmul.mubr.bf16.gmra.mrb[36].mxu1 %v2810_v63  ;;  %4680 = vpow2.f32 %v2356_v43  ;;  %v6808_v43 = vld [vmem:[#allocation47_spill] sm:$0xff] }
 0x68b   : > { %v4671_v11 = vpop.eup %4670  ;;  %v2354_v40 = vmul.f32 1.442695, %v2308_v17  ;;  %v2313_v34 = vsub.f32 %v6805_v45, %v2232_v38  ;;  %v6809_v17 = vld [vmem:[#allocation53_spill] sm:$0xff]  ;;  %v6810_v45 = vld [vmem:[#allocation52_spill] sm:$0xff] }
 0x68c   : > { %v2217_v46 = vpop.permute.xlu1 %2216  ;;  %v2811_v0 = vpack.c.bf16 %v6298_v8, %v4671_v11  ;;  %v4673_v47 = vpop.eup %4672 }
 0x68d   : > { %4682 = vpow2.f32 %v2354_v40  ;;  %v2310_v10 = vsub.f32 %v6806_v60, %v2217_v46  ;;  %2460 = vadd.xlane.f32.xlu1 %v6281_v12  ;;  %v2364_v48 = vmul.f32 1.442695, %v2313_v34 }
 0x68e   : > { %v2242_v36 = vpop.permute.xlu0 %2241  ;;  %4243 = vmatprep.mubr.bf16.mxu1 %v2811_v0  ;;  %4684 = vpow2.f32 %v2360_v39 }
 0x68f   : > { %v4675_v23 = vpop.eup %4674  ;;  %v2358_v52 = vmul.f32 1.442695, %v2310_v10  ;;  %v2315_v62 = vsub.f32 %v6807_v41, %v2242_v36  ;;  %v6811_v36 = vld [vmem:[#allocation58_spill] sm:$0xff] }
 0x690   : > { %2474 = vadd.xlane.f32.xlu0 %v4675_v23  ;;  %v2227_v29 = vpop.permute.xlu1 %2226  ;;  %v2812_v28 = vpack.c.bf16 %v4673_v47, %v4675_v23  ;;  %v6306_v51 = vpop.eup %4676 }
 0x691   : > { %4686 = vpow2.f32 %v2358_v52  ;;  %v2312_v20 = vsub.f32 %v6808_v43, %v2227_v29  ;;  %2468 = vadd.xlane.f32.xlu1 %v4667_v49  ;;  %v2368_v53 = vmul.f32 1.442695, %v2315_v62 }
 0x692   : > { %v2252_v59 = vpop.permute.xlu0 %2251  ;;  %4244 = vmatmul.mubr.bf16.gmra.mrb[40].mxu1 %v2812_v28  ;;  %4688 = vpow2.f32 %v2364_v48  ;;  %v6812_v48 = vld [vmem:[#allocation51_spill] sm:$0xff] }
 0x693   : > { %v4679_v12 = vpop.eup %4678  ;;  %v2362_v63 = vmul.f32 1.442695, %v2312_v20  ;;  %v2317_v38 = vsub.f32 %v6809_v17, %v2252_v59  ;;  %v6813_v20 = vld [vmem:[#allocation57_spill] sm:$0xff]  ;;  %v6814_v17 = vld [vmem:[#allocation56_spill] sm:$0xff] }
 0x694   : > { %2470 = vadd.xlane.f32.xlu0 %v4671_v11  ;;  %v2237_v40 = vpop.permute.xlu1 %2236  ;;  %v2813_v39 = vpack.c.bf16 %v6306_v51, %v4679_v12  ;;  %v4681_v49 = vpop.eup %4680 }
 0x695   : > { %4690 = vpow2.f32 %v2362_v63  ;;  %v2314_v34 = vsub.f32 %v6810_v45, %v2237_v40  ;;  %2464 = vadd.xlane.f32.xlu1 %v6291_v4  ;;  %v2372_v10 = vmul.f32 1.442695, %v2317_v38 }
 0x696   : > { %v2262_v46 = vpop.permute.xlu0 %2261  ;;  %4247 = vmatprep.mubr.bf16.mxu1 %v2813_v39  ;;  %4692 = vpow2.f32 %v2368_v53 }
 0x697   : > { %v4683_v0 = vpop.eup %4682  ;;  %v2366_v60 = vmul.f32 1.442695, %v2314_v34  ;;  %v2319_v23 = vsub.f32 %v6811_v36, %v2262_v46  ;;  %v6815_v46 = vld [vmem:[#allocation62_spill] sm:$0xff] }
 0x698   : > { %2482 = vadd.xlane.f32.xlu0 %v4683_v0  ;;  %v2247_v52 = vpop.permute.xlu1 %2246  ;;  %v2814_v11 = vpack.c.bf16 %v4681_v49, %v4683_v0  ;;  %v4685_v62 = vpop.eup %4684 }
 0x699   : > { %4694 = vpow2.f32 %v2366_v60  ;;  %v2316_v41 = vsub.f32 %v6812_v48, %v2247_v52  ;;  %2476 = vadd.xlane.f32.xlu1 %v4673_v47  ;;  %v2376_v43 = vmul.f32 1.442695, %v2319_v23 }
 0x69a   : > { %v2272_v29 = vpop.permute.xlu0 %2271  ;;  %4248 = vmatmul.mubr.bf16.gmra.mrb[44].mxu1 %v2814_v11  ;;  %4696 = vpow2.f32 %v2372_v10 }
 0x69b   : > { %v4687_v4 = vpop.eup %4686  ;;  %v2370_v28 = vmul.f32 1.442695, %v2316_v41  ;;  %v2321_v59 = vsub.f32 %v6813_v20, %v2272_v29  ;;  %v6817_v41 = vld [vmem:[#allocation61_spill] sm:$0xff]  ;;  %v6818_v20 = vld [vmem:[#allocation60_spill] sm:$0xff] }
 0x69c   : > { %2478 = vadd.xlane.f32.xlu0 %v4679_v12  ;;  %v2257_v63 = vpop.permute.xlu1 %2256  ;;  %v2815_v53 = vpack.c.bf16 %v4685_v62, %v4687_v4  ;;  %v4689_v40 = vpop.eup %4688  ;;  %v6816_v12 = vld [vmem:[#allocation55_spill] sm:$0xff] }
 0x69d   : > { %4698 = vpow2.f32 %v2370_v28  ;;  %v2318_v38 = vsub.f32 %v6814_v17, %v2257_v63  ;;  %2472 = vadd.xlane.f32.xlu1 %v6298_v8  ;;  %v2380_v34 = vmul.f32 1.442695, %v2321_v59 }
 0x69e   : > { %v2282_v39 = vpop.permute.xlu0 %2281  ;;  %4251 = vmatprep.mubr.bf16.mxu1 %v2815_v53  ;;  %4700 = vpow2.f32 %v2376_v43 }
 0x69f   : > { %v4691_v47 = vpop.eup %4690  ;;  %v2374_v45 = vmul.f32 1.442695, %v2318_v38  ;;  %v2323_v0 = vsub.f32 %v6815_v46, %v2282_v39 }
 0x6a0   : > { %2490 = vadd.xlane.f32.xlu0 %v4691_v47  ;;  %v2267_v60 = vpop.permute.xlu1 %2266  ;;  %v2816_v10 = vpack.c.bf16 %v4689_v40, %v4691_v47  ;;  %v4693_v23 = vpop.eup %4692  ;;  %v6819_v47 = vld [vmem:[#allocation59_spill] sm:$0xff] }
 0x6a1   : > { %4702 = vpow2.f32 %v2374_v45  ;;  %v2320_v36 = vsub.f32 %v6816_v12, %v2267_v60  ;;  %2484 = vadd.xlane.f32.xlu1 %v4681_v49  ;;  %v2384_v48 = vmul.f32 1.442695, %v2323_v0 }
 0x6a2   : > { %v2292_v52 = vpop.permute.xlu0 %2291  ;;  %4252 = vmatmul.mubr.bf16.gmra.mrb[48].mxu1 %v2816_v10  ;;  %4704 = vpow2.f32 %v2380_v34 }
 0x6a3   : > { %v4695_v8 = vpop.eup %4694  ;;  %v2378_v11 = vmul.f32 1.442695, %v2320_v36  ;;  %v2325_v29 = vsub.f32 %v6817_v41, %v2292_v52 }
 0x6a4   : > { %2486 = vadd.xlane.f32.xlu0 %v4687_v4  ;;  %v2277_v28 = vpop.permute.xlu1 %2276  ;;  %v2817_v43 = vpack.c.bf16 %v4693_v23, %v4695_v8  ;;  %v4697_v63 = vpop.eup %4696 }
 0x6a5   : > { %4706 = vpow2.f32 %v2378_v11  ;;  %v2322_v59 = vsub.f32 %v6818_v20, %v2277_v28  ;;  %2480 = vadd.xlane.f32.xlu1 %v6306_v51  ;;  %v2388_v17 = vmul.f32 1.442695, %v2325_v29  ;;  %v6820_v28 = vsub.f32 %v6080_v30, %v6097_v61 }
 0x6a6   : > { %4255 = vmatprep.mubr.bf16.mxu1 %v2817_v43  ;;  %4708 = vpow2.f32 %v2384_v48  ;;  %v6323_v52 = vpop.permute.xlu0 %2617 }
 0x6a7   : > { %v4699_v49 = vpop.eup %4698  ;;  %v2382_v53 = vmul.f32 1.442695, %v2322_v59  ;;  %v6821_v59 = vsub.f32 %v6072_v6, %v6086_v13 }
 0x6a8   : > { %2498 = vadd.xlane.f32.xlu0 %v4699_v49  ;;  %v2287_v38 = vpop.permute.xlu1 %2286  ;;  %v2818_v39 = vpack.c.bf16 %v4697_v63, %v4699_v49  ;;  %v4701_v4 = vpop.eup %4700 }
 0x6a9   : > { %4710 = vpow2.f32 %v2382_v53  ;;  %v2324_v45 = vsub.f32 %v6819_v47, %v2287_v38  ;;  %2492 = vadd.xlane.f32.xlu1 %v4689_v40 }
 0x6aa   : > { %4256 = vmatmul.mubr.bf16.gmra.mrb[52].mxu1 %v2818_v39  ;;  %4712 = vpow2.f32 %v2388_v17 }
 0x6ab   : > { %v4703_v34 = vpop.eup %4702  ;;  %v2386_v46 = vmul.f32 1.442695, %v2324_v45 }
 0x6ac   : > { %2494 = vadd.xlane.f32.xlu0 %v4695_v8  ;;  %v2819_v51 = vpack.c.bf16 %v4701_v4, %v4703_v34  ;;  %v4705_v0 = vpop.eup %4704  ;;  %v6327_v41 = vpop.permute.xlu1 %2622 }
 0x6ad   : > { %4714 = vpow2.f32 %v2386_v46  ;;  %2488 = vadd.xlane.f32.xlu1 %v4685_v62  ;;  %v6325_v62 = vpop.permute.xlu0 %2632 }
 0x6ae   : > { %4259 = vmatprep.mubr.bf16.mxu1 %v2819_v51 }
 0x6af   : > { %v4707_v60 = vpop.eup %4706 }
 0x6b0   : > { %2506 = vadd.xlane.f32.xlu0 %v4707_v60  ;;  %v2820_v10 = vpack.c.bf16 %v4705_v0, %v4707_v60  ;;  %v4709_v12 = vpop.eup %4708  ;;  %v6334_v43 = vpop.permute.xlu1 %2627 }
 0x6b1   : > { %2500 = vadd.xlane.f32.xlu1 %v4697_v63  ;;  %v6329_v29 = vpop.permute.xlu0 %2642  ;;  %v2130_v63 = vmul.f32 1.442695, %v6821_v59 }
 0x6b2   : > { %4260 = vmatmul.mubr.bf16.gmra.mrb[56].mxu1 %v2820_v10 }
 0x6b3   : > { %v4711_v36 = vpop.eup %4710 }
 0x6b4   : > { %2502 = vadd.xlane.f32.xlu0 %v4703_v34  ;;  %v2821_v40 = vpack.c.bf16 %v4709_v12, %v4711_v36  ;;  %v4713_v11 = vpop.eup %4712  ;;  %v6341_v49 = vpop.permute.xlu1 %2637 }
 0x6b5   : > { %2496 = vadd.xlane.f32.xlu1 %v4693_v23  ;;  %v2132_v23 = vmul.f32 1.442695, %v6820_v28  ;;  %v6336_v20 = vpop.permute.xlu0 %2652  ;;  %v2392_v28 = vld [vmem:[#allocation6 + $0x10] sm:$0xff] }
 0x6b6   : > { %4263 = vmatprep.mubr.bf16.mxu1 %v2821_v40 }
 0x6b7   : > { %v4715_v8 = vpop.eup %4714  ;;  %4716 = vpow2.f32 %v2132_v23  ;;  %v2424_v23 = vmul.f32 %v6157_v22, %v2392_v28 }
 0x6b8   : > { %2514 = vadd.xlane.f32.xlu0 %v4715_v8  ;;  %v2822_v48 = vpack.c.bf16 %v4713_v11, %v4715_v8  ;;  %4718 = vpow2.f32 %v2130_v63  ;;  %v6345_v17 = vpop.permute.xlu1 %2647  ;;  %v2391_v63 = vld [vmem:[#allocation6 + $0x8] sm:$0xff] }
 0x6b9   : > { %2508 = vadd.xlane.f32.xlu1 %v4705_v0  ;;  %v6343_v53 = vpop.permute.xlu0 %2662 }
 0x6ba   : > { %4264 = vmatmul.mubr.bf16.gmra.mrb[60].mxu1 %v2822_v48 }
 0x6bc   : > { %2510 = vadd.xlane.f32.xlu0 %v4711_v36  ;;  %v6354_v39 = vpop.permute.xlu1 %2657 }
 0x6bd   : > { %2504 = vadd.xlane.f32.xlu1 %v4701_v4  ;;  %v6349_v30 = vpop.permute.xlu0 %2672 }
 0x6c0   : > { %v6359_v13 = vpop.permute.xlu1 %2667 }
 0x6c1   : > { %2516 = vadd.xlane.f32.xlu1 %v4713_v11  ;;  %v6347_v38 = vpop.eup %4716  ;;  %v6357_v6 = vpop.permute.xlu0 %2682 }
 0x6c2   : > { %v6352_v61 = vpop.eup %4718 }
 0x6c4   : > { %v6363_v45 = vpop.permute.xlu1 %2677 }
 0x6c5   : > { %2512 = vadd.xlane.f32.xlu1 %v4709_v12  ;;  %v6361_v47 = vpop.permute.xlu0 %2692 }
 0x6c8   : > { %v6367_v34 = vpop.permute.xlu1 %2687 }
 0x6c9   : > { %v6365_v4 = vpop.permute.xlu0 %2702 }
 0x6cc   : > { %v6371_v51 = vpop.permute.xlu1 %2697 }
 0x6cd   : > { %v6369_v46 = vpop.permute.xlu0 %2712 }
 0x6d0   : > { %v6375_v60 = vpop.permute.xlu1 %2707 }
 0x6d1   : > { %v6373_v0 = vpop.permute.xlu0 %2722 }
 0x6d2   : > { %2772 = vperm.xlu0 %4454, %v6347_v38   ;;  %6822 = vst [vmem:[#allocation63_spill] sm:$0xff] %v6373_v0 }
 0x6d4   : > { %v6379_v12 = vpop.permute.xlu1 %2717 }
 0x6d5   : > { %v6377_v10 = vpop.permute.xlu0 %2732  ;;  %6824 = vst [vmem:[#allocation31_spill] sm:$0xff] %v6379_v12 }
 0x6d6   : > { %2767 = vperm.xlu1 %4455, %v6352_v61   ;;  %6823 = vst [vmem:[#allocation64_spill] sm:$0xff] %v6377_v10 }
 0x6d8   : > { %v6383_v40 = vpop.permute.xlu1 %2727 }
 0x6d9   : > { %v6381_v36 = vpop.permute.xlu0 %2752  ;;  %6826 = vst [vmem:[#allocation33_spill] sm:$0xff] %v6383_v40 }
 0x6da   : > { %6825 = vst [vmem:[#allocation32_spill] sm:$0xff] %v6381_v36 }
 0x6dc   : > { %v6387_v8 = vpop.permute.xlu1 %2747 }
 0x6dd   : > { %v6385_v11 = vpop.permute.xlu0 %2742  ;;  %6828 = vst [vmem:[#allocation36_spill] sm:$0xff] %v6387_v8 }
 0x6de   : > { %6827 = vst [vmem:[#allocation34_spill] sm:$0xff] %v6385_v11  ;;  %v2423_v11 = vmul.f32 %v6149_v25, %v2391_v63  ;;  %v2394_v25 = vld [vmem:[#allocation6 + $0x20] sm:$0xff]  ;;  %v5028_v63 = vmov 0.0  }
 0x6df   : > { %3128 = vst [vmem:[%s5298_s11] sm:$0xff] %v5028_v63  ;;  %3129 = vst [vmem:[%s5298_s11 + $0x8] sm:$0xff] %v5028_v63 }
 0x6e0   : > { %v6392_v0 = vpop.permute.xlu1 %2737  ;;  %3130 = vst [vmem:[%s5298_s11 + $0x10] sm:$0xff] %v5028_v63  ;;  %3131 = vst [vmem:[%s5298_s11 + $0x18] sm:$0xff] %v5028_v63 }
 0x6e1   : > { %v6389_v48 = vpop.permute.xlu0 %2762  ;;  %6830 = vst [vmem:[#allocation38_spill] sm:$0xff] %v6392_v0  ;;  %3132 = vst [vmem:[%s5298_s11 + $0x20] sm:$0xff] %v5028_v63  ;;  %v2400_v0 = vld [vmem:[#allocation6 + $0x50] sm:$0xff] }
 0x6e2   : > { %6829 = vst [vmem:[#allocation35_spill] sm:$0xff] %v6389_v48  ;;  %v2396_v48 = vld [vmem:[#allocation6 + $0x30] sm:$0xff]  ;;  %3133 = vst [vmem:[%s5298_s11 + $0x28] sm:$0xff] %v5028_v63 }
 0x6e3   : > { %v2428_v28 = vmul.f32 %v6178_v3, %v2396_v48  ;;  %3134 = vst [vmem:[%s5298_s11 + $0x30] sm:$0xff] %v5028_v63  ;;  %3135 = vst [vmem:[%s5298_s11 + $0x38] sm:$0xff] %v5028_v63 }
 0x6e4   : > { %v6396_v22 = vpop.permute.xlu1 %2757  ;;  %3136 = vst [vmem:[%s5298_s11 + $0x40] sm:$0xff] %v5028_v63  ;;  %3137 = vst [vmem:[%s5298_s11 + $0x48] sm:$0xff] %v5028_v63 }
 0x6e5   : > { %6831 = vst [vmem:[#allocation42_spill] sm:$0xff] %v6396_v22  ;;  %3138 = vst [vmem:[%s5298_s11 + $0x50] sm:$0xff] %v5028_v63 }
 0x6e6   : > { %3139 = vst [vmem:[%s5298_s11 + $0x58] sm:$0xff] %v5028_v63  ;;  %3140 = vst [vmem:[%s5298_s11 + $0x60] sm:$0xff] %v5028_v63 }
 0x6e7   : > { %3141 = vst [vmem:[%s5298_s11 + $0x68] sm:$0xff] %v5028_v63  ;;  %3142 = vst [vmem:[%s5298_s11 + $0x70] sm:$0xff] %v5028_v63 }
 0x6e8   : > { %3143 = vst [vmem:[%s5298_s11 + $0x78] sm:$0xff] %v5028_v63  ;;  %v2397_v63 = vld [vmem:[#allocation6 + $0x38] sm:$0xff] }
 0x70b   : > { %v2459_v59 = vpop.xlane.xlu0 %2458 }
 0x70c   : > { %v2520_v10 = vadd.f32 %v2459_v59, %v2424_v23 }
 0x70e   : > { %2553 = vst.msk [vmem:[#allocation6 + $0x10] sm:$0xff] %vm2550_vm1, %v2520_v10  ;;  %v2390_v10 = vld [vmem:[#allocation6] sm:$0xff] }
 0x70f   : > { %v2457_v36 = vpop.xlane.xlu0 %2456  ;;  %v2422_v3 = vmul.f32 %v6135_v21, %v2390_v10  ;;  %v2432_v21 = vmul.f32 %v6199_v58, %v2400_v0  ;;  %v2404_v58 = vld [vmem:[#allocation6 + $0x70] sm:$0xff] }
 0x710   : > { %v2519_v8 = vadd.f32 %v2457_v36, %v2423_v11  ;;  %v2426_v11 = vmul.f32 %v6170_v24, %v2394_v25  ;;  %v2429_v24 = vmul.f32 %v6162_v33, %v2397_v63  ;;  %v2398_v25 = vld [vmem:[#allocation6 + $0x40] sm:$0xff]  ;;  %v2436_v33 = vmul.f32 %v6220_v56, %v2404_v58  ;;  %v2408_v56 = vld [vmem:[#allocation6 + $0x90] sm:$0xff] }
 0x712   : > { %2552 = vst.msk [vmem:[#allocation6 + $0x8] sm:$0xff] %vm2550_vm1, %v2519_v8  ;;  %v2393_v8 = vld [vmem:[#allocation6 + $0x18] sm:$0xff] }
 0x713   : > { %v2467_v23 = vpop.xlane.xlu0 %2466  ;;  %v2425_v22 = vmul.f32 %v6141_v37, %v2393_v8  ;;  %v2430_v37 = vmul.f32 %v6191_v32, %v2398_v25  ;;  %v2402_v32 = vld [vmem:[#allocation6 + $0x60] sm:$0xff] }
 0x714   : > { %v2524_v59 = vadd.f32 %v2467_v23, %v2428_v28 }
 0x716   : > { %2557 = vst.msk [vmem:[#allocation6 + $0x30] sm:$0xff] %vm2550_vm1, %v2524_v59  ;;  %v2455_v36 = vpop.xlane.xlu1 %2454 }
 0x717   : > { %v2518_v48 = vadd.f32 %v2455_v36, %v2422_v3  ;;  %v2463_v28 = vpop.xlane.xlu0 %2462  ;;  %v2395_v36 = vld [vmem:[#allocation6 + $0x28] sm:$0xff] }
 0x718   : > { %v2522_v23 = vadd.f32 %v2463_v28, %v2426_v11 }
 0x719   : > { %2551 = vst.msk [vmem:[#allocation6] sm:$0xff] %vm2550_vm1, %v2518_v48 }
 0x71a   : > { %2555 = vst.msk [vmem:[#allocation6 + $0x20] sm:$0xff] %vm2550_vm1, %v2522_v23  ;;  %v2461_v12 = vpop.xlane.xlu1 %2460 }
 0x71b   : > { %v2521_v40 = vadd.f32 %v2461_v12, %v2425_v22  ;;  %v2427_v12 = vmul.f32 %v6154_v7, %v2395_v36  ;;  %v2401_v22 = vld [vmem:[#allocation6 + $0x58] sm:$0xff]  ;;  %v2434_v7 = vmul.f32 %v6212_v31, %v2402_v32  ;;  %v2406_v31 = vld [vmem:[#allocation6 + $0x80] sm:$0xff] }
 0x71c   : > { %v2433_v23 = vmul.f32 %v6183_v27, %v2401_v22  ;;  %v2440_v27 = vmul.f32 %v6243_v55, %v2408_v56  ;;  %v2412_v55 = vld [vmem:[#allocation6 + $0xb0] sm:$0xff]  ;;  %v2409_v32 = vld [vmem:[#allocation6 + $0x98] sm:$0xff] }
 0x71d   : > { %2554 = vst.msk [vmem:[#allocation6 + $0x18] sm:$0xff] %vm2550_vm1, %v2521_v40  ;;  %v2475_v10 = vpop.xlane.xlu0 %2474 }
 0x71e   : > { %v2528_v59 = vadd.f32 %v2475_v10, %v2432_v21  ;;  %v2469_v3 = vpop.xlane.xlu1 %2468  ;;  %v2399_v10 = vld [vmem:[#allocation6 + $0x48] sm:$0xff] }
 0x71f   : > { %v2525_v11 = vadd.f32 %v2469_v3, %v2429_v24 }
 0x720   : > { %2561 = vst.msk [vmem:[#allocation6 + $0x50] sm:$0xff] %vm2550_vm1, %v2528_v59  ;;  %v2431_v59 = vmul.f32 %v6175_v35, %v2399_v10  ;;  %v2438_v35 = vmul.f32 %v6233_v1, %v2406_v31  ;;  %v2441_v10 = vmul.f32 %v6225_v2, %v2409_v32  ;;  %v2410_v1 = vld [vmem:[#allocation6 + $0xa0] sm:$0xff] }
 0x721   : > { %2558 = vst.msk [vmem:[#allocation6 + $0x38] sm:$0xff] %vm2550_vm1, %v2525_v11  ;;  %v2471_v8 = vpop.xlane.xlu0 %2470  ;;  %v2405_v11 = vld [vmem:[#allocation6 + $0x78] sm:$0xff] }
 0x722   : > { %v2526_v0 = vadd.f32 %v2471_v8, %v2430_v37  ;;  %v2465_v40 = vpop.xlane.xlu1 %2464 }
 0x723   : > { %v2523_v48 = vadd.f32 %v2465_v40, %v2427_v12  ;;  %v2437_v12 = vmul.f32 %v6204_v9, %v2405_v11  ;;  %v2403_v40 = vld [vmem:[#allocation6 + $0x68] sm:$0xff]  ;;  %v2444_v9 = vmul.f32 %v6257_v26, %v2412_v55  ;;  %v2416_v26 = vld [vmem:[#allocation6 + $0xd0] sm:$0xff]  ;;  %v2417_v55 = vld [vmem:[#allocation6 + $0xd8] sm:$0xff] }
 0x724   : > { %2559 = vst.msk [vmem:[#allocation6 + $0x40] sm:$0xff] %vm2550_vm1, %v2526_v0  ;;  %v2448_v2 = vmul.f32 %v6263_v19, %v2416_v26  ;;  %v2420_v19 = vld [vmem:[#allocation6 + $0xf0] sm:$0xff]  ;;  %v2449_v32 = vmul.f32 %v6254_v44, %v2417_v55 }
 0x725   : > { %2556 = vst.msk [vmem:[#allocation6 + $0x28] sm:$0xff] %vm2550_vm1, %v2523_v48  ;;  %v2483_v28 = vpop.xlane.xlu0 %2482 }
 0x726   : > { %v2532_v63 = vadd.f32 %v2483_v28, %v2436_v33  ;;  %v2477_v21 = vpop.xlane.xlu1 %2476  ;;  %v2435_v33 = vmul.f32 %v6196_v42, %v2403_v40  ;;  %v2442_v42 = vmul.f32 %v6251_v15, %v2410_v1  ;;  %v2414_v15 = vld [vmem:[#allocation6 + $0xc0] sm:$0xff] }
 0x727   : > { %v2529_v24 = vadd.f32 %v2477_v21, %v2433_v23 }
 0x728   : > { %2565 = vst.msk [vmem:[#allocation6 + $0x70] sm:$0xff] %vm2550_vm1, %v2532_v63 }
 0x729   : > { %2562 = vst.msk [vmem:[#allocation6 + $0x58] sm:$0xff] %vm2550_vm1, %v2529_v24  ;;  %v2479_v25 = vpop.xlane.xlu0 %2478 }
 0x72a   : > { %v2530_v3 = vadd.f32 %v2479_v25, %v2434_v7  ;;  %v2473_v36 = vpop.xlane.xlu1 %2472  ;;  %v2407_v25 = vld [vmem:[#allocation6 + $0x88] sm:$0xff] }
 0x72b   : > { %v2527_v37 = vadd.f32 %v2473_v36, %v2431_v59 }
 0x72c   : > { %2563 = vst.msk [vmem:[#allocation6 + $0x60] sm:$0xff] %vm2550_vm1, %v2530_v3  ;;  %v2439_v3 = vmul.f32 %v6217_v18, %v2407_v25  ;;  %v2446_v18 = vmul.f32 %v6269_v57, %v2414_v15  ;;  %v2418_v57 = vld [vmem:[#allocation6 + $0xe0] sm:$0xff] }
 0x72d   : > { %2560 = vst.msk [vmem:[#allocation6 + $0x48] sm:$0xff] %vm2550_vm1, %v2527_v37  ;;  %v2491_v8 = vpop.xlane.xlu0 %2490  ;;  %v2413_v37 = vld [vmem:[#allocation6 + $0xb8] sm:$0xff] }
 0x72e   : > { %v2536_v58 = vadd.f32 %v2491_v8, %v2440_v27  ;;  %v2485_v0 = vpop.xlane.xlu1 %2484 }
 0x72f   : > { %v2533_v22 = vadd.f32 %v2485_v0, %v2437_v12  ;;  %v2445_v12 = vmul.f32 %v6246_v14, %v2413_v37  ;;  %v2411_v0 = vld [vmem:[#allocation6 + $0xa8] sm:$0xff]  ;;  %v2452_v14 = vmul.f32 %v6352_v61, %v2420_v19  ;;  %v2585_v61 = vld [vmem:[#allocation4 + $0x10] sm:$0xff] }
 0x730   : > { %2569 = vst.msk [vmem:[#allocation6 + $0x90] sm:$0xff] %vm2550_vm1, %v2536_v58  ;;  %v2777_v26 = vmul.f32 %v6334_v43, %v2585_v61  ;;  %v2419_v37 = vld [vmem:[#allocation6 + $0xe8] sm:$0xff] }
 0x731   : > { %2566 = vst.msk [vmem:[#allocation6 + $0x78] sm:$0xff] %vm2550_vm1, %v2533_v22  ;;  %v2487_v48 = vpop.xlane.xlu0 %2486 }
 0x732   : > { %v2534_v28 = vadd.f32 %v2487_v48, %v2438_v35  ;;  %v2481_v23 = vpop.xlane.xlu1 %2480  ;;  %v2443_v35 = vmul.f32 %v6238_v5, %v2411_v0  ;;  %v2450_v5 = vmul.f32 %v6273_v50, %v2418_v57 }
 0x733   : > { %v2531_v63 = vadd.f32 %v2481_v23, %v2435_v33 }
 0x734   : > { %2567 = vst.msk [vmem:[#allocation6 + $0x80] sm:$0xff] %vm2550_vm1, %v2534_v28 }
 0x735   : > { %2564 = vst.msk [vmem:[#allocation6 + $0x68] sm:$0xff] %vm2550_vm1, %v2531_v63  ;;  %v2499_v21 = vpop.xlane.xlu0 %2498 }
 0x736   : > { %v2540_v24 = vadd.f32 %v2499_v21, %v2444_v9  ;;  %v2493_v7 = vpop.xlane.xlu1 %2492  ;;  %v2415_v21 = vld [vmem:[#allocation6 + $0xc8] sm:$0xff] }
 0x737   : > { %v2537_v59 = vadd.f32 %v2493_v7, %v2441_v10 }
 0x738   : > { %2573 = vst.msk [vmem:[#allocation6 + $0xb0] sm:$0xff] %vm2550_vm1, %v2540_v24  ;;  %v2447_v24 = vmul.f32 %v6260_v54, %v2415_v21 }
 0x739   : > { %2570 = vst.msk [vmem:[#allocation6 + $0x98] sm:$0xff] %vm2550_vm1, %v2537_v59  ;;  %v2495_v56 = vpop.xlane.xlu0 %2494  ;;  %v2421_v59 = vld [vmem:[#allocation6 + $0xf8] sm:$0xff] }
 0x73a   : > { %v2538_v36 = vadd.f32 %v2495_v56, %v2442_v42  ;;  %v2489_v11 = vpop.xlane.xlu1 %2488  ;;  %v2583_v42 = vld [vmem:[#allocation4] sm:$0xff]  ;;  %v2586_v56 = vld [vmem:[#allocation4 + $0x18] sm:$0xff]  ;;  %v2453_v50 = vmul.f32 %v6347_v38, %v2421_v59  ;;  %v2451_v38 = vmul.f32 %v6266_v16, %v2419_v37 }
 0x73b   : > { %v2535_v27 = vadd.f32 %v2489_v11, %v2439_v3  ;;  %v2584_v3 = vld [vmem:[#allocation4 + $0x8] sm:$0xff] }
 0x73c   : > { %2571 = vst.msk [vmem:[#allocation6 + $0xa0] sm:$0xff] %vm2550_vm1, %v2538_v36  ;;  %v2775_v36 = vmul.f32 %v6323_v52, %v2583_v42  ;;  %v2776_v15 = vmul.f32 %v6327_v41, %v2584_v3  ;;  %v2590_v41 = vld [vmem:[#allocation4 + $0x38] sm:$0xff] }
 0x73d   : > { %2568 = vst.msk [vmem:[#allocation6 + $0x88] sm:$0xff] %vm2550_vm1, %v2535_v27  ;;  %v2507_v8 = vpop.xlane.xlu0 %2506  ;;  %v2778_v27 = vmul.f32 %v6325_v62, %v2586_v56  ;;  %v2589_v62 = vld [vmem:[#allocation4 + $0x30] sm:$0xff]  ;;  %v2782_v55 = vmul.f32 %v6336_v20, %v2590_v41 }
 0x73e   : > { %v2544_v31 = vadd.f32 %v2507_v8, %v2448_v2  ;;  %v2501_v58 = vpop.xlane.xlu1 %2500  ;;  %v2781_v19 = vmul.f32 %v6345_v17, %v2589_v62  ;;  %v2594_v17 = vld [vmem:[#allocation4 + $0x58] sm:$0xff]  ;;  %v2597_v56 = vld [vmem:[#allocation4 + $0x70] sm:$0xff] }
 0x73f   : > { %v2541_v40 = vadd.f32 %v2501_v58, %v2445_v12 }
 0x740   : > { %2577 = vst.msk [vmem:[#allocation6 + $0xd0] sm:$0xff] %vm2550_vm1, %v2544_v31 }
 0x741   : > { %2574 = vst.msk [vmem:[#allocation6 + $0xb8] sm:$0xff] %vm2550_vm1, %v2541_v40  ;;  %v2503_v22 = vpop.xlane.xlu0 %2502 }
 0x742   : > { %v2542_v48 = vadd.f32 %v2503_v22, %v2446_v18  ;;  %v2497_v33 = vpop.xlane.xlu1 %2496  ;;  %v2587_v22 = vld [vmem:[#allocation4 + $0x20] sm:$0xff] }
 0x743   : > { %v2539_v28 = vadd.f32 %v2497_v33, %v2443_v35  ;;  %v2588_v35 = vld [vmem:[#allocation4 + $0x28] sm:$0xff] }
 0x744   : > { %2575 = vst.msk [vmem:[#allocation6 + $0xc0] sm:$0xff] %vm2550_vm1, %v2542_v48  ;;  %v2779_v48 = vmul.f32 %v6341_v49, %v2587_v22  ;;  %v2592_v49 = vld [vmem:[#allocation4 + $0x48] sm:$0xff] }
 0x745   : > { %2572 = vst.msk [vmem:[#allocation6 + $0xa8] sm:$0xff] %vm2550_vm1, %v2539_v28  ;;  %v2515_v23 = vpop.xlane.xlu0 %2514 }
 0x746   : > { %v2548_v63 = vadd.f32 %v2515_v23, %v2452_v14  ;;  %v2509_v9 = vpop.xlane.xlu1 %2508  ;;  %v2780_v14 = vmul.f32 %v6329_v29, %v2588_v35  ;;  %v2786_v29 = vmul.f32 %v6349_v30, %v2594_v17  ;;  %v2605_v35 = vld [vmem:[#allocation4 + $0xb0] sm:$0xff] }
 0x747   : > { %v2545_v10 = vadd.f32 %v2509_v9, %v2449_v32  ;;  %v2593_v9 = vld [vmem:[#allocation4 + $0x50] sm:$0xff] }
 0x748   : > { %2581 = vst.msk [vmem:[#allocation6 + $0xf0] sm:$0xff] %vm2550_vm1, %v2548_v63 }
 0x749   : > { %2578 = vst.msk [vmem:[#allocation6 + $0xd8] sm:$0xff] %vm2550_vm1, %v2545_v10  ;;  %v2511_v1 = vpop.xlane.xlu0 %2510  ;;  %v2591_v10 = vld [vmem:[#allocation4 + $0x40] sm:$0xff] }
 0x74a   : > { %v2546_v7 = vadd.f32 %v2511_v1, %v2450_v5  ;;  %v2505_v25 = vpop.xlane.xlu1 %2504  ;;  %v2785_v5 = vmul.f32 %v6359_v13, %v2593_v9  ;;  %v2783_v20 = vmul.f32 %v6354_v39, %v2591_v10  ;;  %v2598_v13 = vld [vmem:[#allocation4 + $0x78] sm:$0xff]  ;;  %v2596_v39 = vld [vmem:[#allocation4 + $0x68] sm:$0xff] }
 0x74b   : > { %v2543_v44 = vadd.f32 %v2505_v25, %v2447_v24  ;;  %v2788_v37 = vmul.f32 %v6357_v6, %v2596_v39 }
 0x74c   : > { %2579 = vst.msk [vmem:[#allocation6 + $0xe0] sm:$0xff] %vm2550_vm1, %v2546_v7  ;;  %v2784_v7 = vmul.f32 %v6343_v53, %v2592_v49  ;;  %v2790_v53 = vmul.f32 %v6361_v47, %v2598_v13  ;;  %v2609_v49 = vld [vmem:[#allocation4 + $0xd0] sm:$0xff] }
 0x74d   : > { %2576 = vst.msk [vmem:[#allocation6 + $0xc8] sm:$0xff] %vm2550_vm1, %v2543_v44 }
 0x74e   : > { %v4237_v11 = vpop.f32.mrb[32].mxu1  ;;  %v2517_v54 = vpop.xlane.xlu1 %2516 }
 0x74f   : > { %v3034_v2 = vadd.f32 %v4237_v11, %v2777_v26  ;;  %v2549_v8 = vadd.f32 %v2517_v54, %v2453_v50  ;;  %v2905_v12 = vpop.f32.mrb[33].mxu1  ;;  %v2595_v26 = vld [vmem:[#allocation4 + $0x60] sm:$0xff]  ;;  %v2789_v50 = vmul.f32 %v6367_v34, %v2597_v56  ;;  %v2602_v34 = vld [vmem:[#allocation4 + $0x98] sm:$0xff] }
 0x750   : > { %v3032_v31 = vadd.f32 %v2905_v12, %v2775_v36  ;;  %v4238_v58 = vpop.f32.mrb[34].mxu1  ;;  %v2787_v30 = vmul.f32 %v6363_v45, %v2595_v26  ;;  %v2600_v45 = vld [vmem:[#allocation4 + $0x88] sm:$0xff]  ;;  %v2794_v6 = vmul.f32 %v6369_v46, %v2602_v34  ;;  %v6833_v46 = vld [vmem:[#allocation31_spill] sm:$0xff]  ;;  %v6839_v26 = vld [vmem:[#allocation34_spill] sm:$0xff] }
 0x751   : > { %3066 = vst [vmem:[#allocation4 + $0x10] sm:$0xff] %v3034_v2  ;;  %2582 = vst.msk [vmem:[#allocation6 + $0xf8] sm:$0xff] %vm2550_vm1, %v2549_v8  ;;  %v3035_v43 = vadd.f32 %v4238_v58, %v2778_v27  ;;  %v2908_v0 = vpop.f32.mrb[35].mxu1  ;;  %v2599_v58 = vld [vmem:[#allocation4 + $0x80] sm:$0xff] }
 0x752   : > { %3064 = vst [vmem:[#allocation4] sm:$0xff] %v3032_v31  ;;  %v3033_v52 = vadd.f32 %v2908_v0, %v2776_v15  ;;  %v2513_v40 = vpop.xlane.xlu1 %2512  ;;  %v2601_v15 = vld [vmem:[#allocation4 + $0x90] sm:$0xff]  ;;  %v2791_v47 = vmul.f32 %v6371_v51, %v2599_v58  ;;  %v2604_v51 = vld [vmem:[#allocation4 + $0xa8] sm:$0xff] }
 0x753   : > { %3067 = vst [vmem:[#allocation4 + $0x18] sm:$0xff] %v3035_v43  ;;  %v2547_v18 = vadd.f32 %v2513_v40, %v2451_v38  ;;  %v2793_v43 = vmul.f32 %v6375_v60, %v2601_v15  ;;  %v2792_v40 = vmul.f32 %v6365_v4, %v2600_v45  ;;  %v2606_v60 = vld [vmem:[#allocation4 + $0xb8] sm:$0xff] }
 0x754   : > { %3065 = vst [vmem:[#allocation4 + $0x8] sm:$0xff] %v3033_v52  ;;  %v6840_v15 = vld [vmem:[#allocation42_spill] sm:$0xff] }
 0x755   : > { %2580 = vst.msk [vmem:[#allocation6 + $0xe8] sm:$0xff] %vm2550_vm1, %v2547_v18 }
 0x75d   : > { %v4241_v33 = vpop.f32.mrb[36].mxu1 }
 0x75e   : > { %v3038_v16 = vadd.f32 %v4241_v33, %v2781_v19  ;;  %v2921_v28 = vpop.f32.mrb[37].mxu1  ;;  %v6832_v33 = vld [vmem:[#allocation33_spill] sm:$0xff] }
 0x75f   : > { %v3036_v23 = vadd.f32 %v2921_v28, %v2779_v48  ;;  %v4242_v32 = vpop.f32.mrb[38].mxu1  ;;  %v2603_v48 = vld [vmem:[#allocation4 + $0xa0] sm:$0xff] }
 0x760   : > { %3070 = vst [vmem:[#allocation4 + $0x30] sm:$0xff] %v3038_v16  ;;  %v3039_v57 = vadd.f32 %v4242_v32, %v2782_v55  ;;  %v2924_v63 = vpop.f32.mrb[39].mxu1  ;;  %v2797_v55 = vmul.f32 %v6832_v33, %v2605_v35  ;;  %v2795_v16 = vmul.f32 %v6833_v46, %v2603_v48 }
 0x761   : > { %3068 = vst [vmem:[#allocation4 + $0x20] sm:$0xff] %v3036_v23  ;;  %v3037_v21 = vadd.f32 %v2924_v63, %v2780_v14  ;;  %v6834_v14 = vld [vmem:[#allocation64_spill] sm:$0xff] }
 0x762   : > { %3071 = vst [vmem:[#allocation4 + $0x38] sm:$0xff] %v3039_v57  ;;  %v2798_v4 = vmul.f32 %v6834_v14, %v2606_v60  ;;  %v6835_v57 = vld [vmem:[#allocation63_spill] sm:$0xff] }
 0x763   : > { %3069 = vst [vmem:[#allocation4 + $0x28] sm:$0xff] %v3037_v21  ;;  %v2796_v63 = vmul.f32 %v6835_v57, %v2604_v51 }
 0x765   : > { %v4245_v1 = vpop.f32.mrb[40].mxu1 }
 0x766   : > { %v3042_v24 = vadd.f32 %v4245_v1, %v2785_v5  ;;  %v2937_v61 = vpop.f32.mrb[41].mxu1  ;;  %v2610_v1 = vld [vmem:[#allocation4 + $0xd8] sm:$0xff] }
 0x767   : > { %v3040_v25 = vadd.f32 %v2937_v61, %v2783_v20  ;;  %v4246_v59 = vpop.f32.mrb[42].mxu1  ;;  %v2607_v20 = vld [vmem:[#allocation4 + $0xc0] sm:$0xff] }
 0x768   : > { %3074 = vst [vmem:[#allocation4 + $0x50] sm:$0xff] %v3042_v24  ;;  %v3043_v42 = vadd.f32 %v4246_v59, %v2786_v29  ;;  %v2940_v44 = vpop.f32.mrb[43].mxu1  ;;  %v2608_v29 = vld [vmem:[#allocation4 + $0xc8] sm:$0xff] }
 0x769   : > { %3072 = vst [vmem:[#allocation4 + $0x40] sm:$0xff] %v3040_v25  ;;  %v3041_v3 = vadd.f32 %v2940_v44, %v2784_v7  ;;  %v6836_v24 = vld [vmem:[#allocation36_spill] sm:$0xff]  ;;  %v6837_v7 = vld [vmem:[#allocation38_spill] sm:$0xff]  ;;  %v2800_v13 = vmul.f32 %v6839_v26, %v2608_v29 }
 0x76a   : > { %3075 = vst [vmem:[#allocation4 + $0x58] sm:$0xff] %v3043_v42  ;;  %v2801_v61 = vmul.f32 %v6836_v24, %v2609_v49  ;;  %v2799_v25 = vmul.f32 %v6837_v7, %v2607_v20  ;;  %v6838_v42 = vld [vmem:[#allocation32_spill] sm:$0xff] }
 0x76b   : > { %3073 = vst [vmem:[#allocation4 + $0x48] sm:$0xff] %v3041_v3  ;;  %v2802_v44 = vmul.f32 %v6838_v42, %v2610_v1 }
 0x76d   : > { %v4249_v36 = vpop.f32.mrb[44].mxu1 }
 0x76e   : > { %v3046_v11 = vadd.f32 %v4249_v36, %v2789_v50  ;;  %v2953_v54 = vpop.f32.mrb[45].mxu1 }
 0x76f   : > { %v3044_v27 = vadd.f32 %v2953_v54, %v2787_v30  ;;  %v4250_v2 = vpop.f32.mrb[46].mxu1 }
 0x770   : > { %3078 = vst [vmem:[#allocation4 + $0x70] sm:$0xff] %v3046_v11  ;;  %v3047_v8 = vadd.f32 %v4250_v2, %v2790_v53  ;;  %v2956_v12 = vpop.f32.mrb[47].mxu1  ;;  %v2613_v53 = vld [vmem:[#allocation4 + $0xf0] sm:$0xff]  ;;  %v2768_v11 = vpop.permute.xlu1 %2767 }
 0x771   : > { %3076 = vst [vmem:[#allocation4 + $0x60] sm:$0xff] %v3044_v27  ;;  %v3045_v31 = vadd.f32 %v2956_v12, %v2788_v37  ;;  %v2611_v37 = vld [vmem:[#allocation4 + $0xe0] sm:$0xff]  ;;  %v2614_v27 = vld [vmem:[#allocation4 + $0xf8] sm:$0xff]  ;;  %v2773_v2 = vpop.permute.xlu0 %2772  ;;  %v2805_v12 = vmul.f32 %v2768_v11, %v2613_v53 }
 0x772   : > { %3079 = vst [vmem:[#allocation4 + $0x78] sm:$0xff] %v3047_v8  ;;  %v2612_v8 = vld [vmem:[#allocation4 + $0xe8] sm:$0xff]  ;;  %v2806_v34 = vmul.f32 %v2773_v2, %v2614_v27 }
 0x773   : > { %3077 = vst [vmem:[#allocation4 + $0x68] sm:$0xff] %v3045_v31  ;;  %v2803_v31 = vmul.f32 %v6840_v15, %v2611_v37 }
 0x775   : > { %v4253_v0 = vpop.f32.mrb[48].mxu1 }
 0x776   : > { %v3050_v38 = vadd.f32 %v4253_v0, %v2793_v43  ;;  %v2969_v52 = vpop.f32.mrb[49].mxu1 }
 0x777   : > { %v3048_v18 = vadd.f32 %v2969_v52, %v2791_v47  ;;  %v4254_v62 = vpop.f32.mrb[50].mxu1  ;;  %v6841_v47 = vld [vmem:[#allocation35_spill] sm:$0xff] }
 0x778   : > { %3082 = vst [vmem:[#allocation4 + $0x90] sm:$0xff] %v3050_v38  ;;  %v3051_v22 = vadd.f32 %v4254_v62, %v2794_v6  ;;  %v2972_v41 = vpop.f32.mrb[51].mxu1  ;;  %v2804_v0 = vmul.f32 %v6841_v47, %v2612_v8 }
 0x779   : > { %3080 = vst [vmem:[#allocation4 + $0x80] sm:$0xff] %v3048_v18  ;;  %v3049_v19 = vadd.f32 %v2972_v41, %v2792_v40 }
 0x77a   : > { %3083 = vst [vmem:[#allocation4 + $0x98] sm:$0xff] %v3051_v22 }
 0x77b   : > { %3081 = vst [vmem:[#allocation4 + $0x88] sm:$0xff] %v3049_v19 }
 0x77d   : > { %v4257_v28 = vpop.f32.mrb[52].mxu1 }
 0x77e   : > { %v3054_v23 = vadd.f32 %v4257_v28, %v2797_v55  ;;  %v2985_v32 = vpop.f32.mrb[53].mxu1 }
 0x77f   : > { %v3052_v9 = vadd.f32 %v2985_v32, %v2795_v16  ;;  %v4258_v21 = vpop.f32.mrb[54].mxu1 }
 0x780   : > { %3086 = vst [vmem:[#allocation4 + $0xb0] sm:$0xff] %v3054_v23  ;;  %v3055_v10 = vadd.f32 %v4258_v21, %v2798_v4  ;;  %v2988_v17 = vpop.f32.mrb[55].mxu1 }
 0x781   : > { %3084 = vst [vmem:[#allocation4 + $0xa0] sm:$0xff] %v3052_v9  ;;  %v3053_v5 = vadd.f32 %v2988_v17, %v2796_v63 }
 0x782   : > { %3087 = vst [vmem:[#allocation4 + $0xb8] sm:$0xff] %v3055_v10 }
 0x783   : > { %3085 = vst [vmem:[#allocation4 + $0xa8] sm:$0xff] %v3053_v5 }
 0x785   : > { %v4261_v59 = vpop.f32.mrb[56].mxu1 }
 0x786   : > { %v3058_v56 = vadd.f32 %v4261_v59, %v2801_v61  ;;  %v3001_v3 = vpop.f32.mrb[57].mxu1 }
 0x787   : > { %v3056_v39 = vadd.f32 %v3001_v3, %v2799_v25  ;;  %v4262_v50 = vpop.f32.mrb[58].mxu1 }
 0x788   : > { %3090 = vst [vmem:[#allocation4 + $0xd0] sm:$0xff] %v3058_v56  ;;  %v3059_v30 = vadd.f32 %v4262_v50, %v2802_v44  ;;  %v3004_v36 = vpop.f32.mrb[59].mxu1 }
 0x789   : > { %3088 = vst [vmem:[#allocation4 + $0xc0] sm:$0xff] %v3056_v39  ;;  %v3057_v54 = vadd.f32 %v3004_v36, %v2800_v13 }
 0x78a   : > { %3091 = vst [vmem:[#allocation4 + $0xd8] sm:$0xff] %v3059_v30 }
 0x78b   : > { %3089 = vst [vmem:[#allocation4 + $0xc8] sm:$0xff] %v3057_v54 }
 0x78d   : > { %v4265_v58 = vpop.f32.mrb[60].mxu1 }
 0x78e   : > { %v3062_v45 = vadd.f32 %v4265_v58, %v2805_v12  ;;  %v3017_v43 = vpop.f32.mrb[61].mxu1 }
 0x78f   : > { %v3060_v6 = vadd.f32 %v3017_v43, %v2803_v31  ;;  %v4266_v38 = vpop.f32.mrb[62].mxu1 }
 0x790   : > { %3094 = vst [vmem:[#allocation4 + $0xf0] sm:$0xff] %v3062_v45  ;;  %v3063_v52 = vadd.f32 %v4266_v38, %v2806_v34  ;;  %v3020_v40 = vpop.f32.mrb[63].mxu1 }
 0x791   : > { %3092 = vst [vmem:[#allocation4 + $0xe0] sm:$0xff] %v3060_v6  ;;  %v3061_v18 = vadd.f32 %v3020_v40, %v2804_v0 }
 0x792   : > { %3095 = vst [vmem:[#allocation4 + $0xf8] sm:$0xff] %v3063_v52 }
 0x793   : > { %3093 = vst [vmem:[#allocation4 + $0xe8] sm:$0xff] %v3061_v18 }
 0x794 PF: > { %p3818_p1 = scmp.ne.s32.totalorder %s5004_s9, 1 }
 0x795   : > { %v5029_v62 = vmov (!%p3818_p1), 0   ;;  %s6507_s25 = scalar_lea.vmem (!%p3818_p1), [#allocation6], %s5292_s26  ;;  %v4722_v51 = vld [vmem:[#allocation16 + $0x40] sm:$0xff] (!%p3818_p1)   ;;  %v4724_v46 = vld [vmem:[#allocation16 + $0x48] sm:$0xff] (!%p3818_p1)   ;;  %v4726_v14 = vld [vmem:[#allocation16 + $0x50] sm:$0xff] (!%p3818_p1)   ;;  %s3294_s21 = sshra.s32 (!%p3818_p1), %s5292_s26, 4 }
 0x796   : > { %3147 = sbr.rel (%p3818_p1) target bundleno = 2336 (0x920), region = 84  ;;  %4721 = vset.pattern.permute.xlu1 (!%p3818_p1), %v5029_v62  ;;  %4720 = vset.pattern.permute.xlu0 (!%p3818_p1), %v5029_v62  ;;  %v3174_v22 = vld [vmem:[%s6507_s25 + $0x40] sm:$0xff] (!%p3818_p1)  ;;  %v3175_v35 = vld [vmem:[%s6507_s25 + $0x48] sm:$0xff] (!%p3818_p1)  ;;  %v3169_v48 = vld [vmem:[%s6507_s25 + $0x18] sm:$0xff] (!%p3818_p1)  ;;  %s3819_s27 = sshll.u32 (!%p3818_p1), %s3294_s21, 3 }
 0x797   : > { %v3166_v41 = vld [vmem:[%s6507_s25] sm:$0xff] (!%p3818_p1)  ;;  %4738 = vrcp.f32 (!%p3818_p1), %v3174_v22  ;;  %v3167_v19 = vld [vmem:[%s6507_s25 + $0x8] sm:$0xff] (!%p3818_p1)  ;;  %v3168_v60 = vld [vmem:[%s6507_s25 + $0x10] sm:$0xff] (!%p3818_p1)  ;;  %4027 = vmatprep.subr.bf16.mxu0 (!%p3818_p1), %v4722_v51  ;;  %4283 = vmatprep.subr.bf16.mxu1 (!%p3818_p1), %v4722_v51  ;;  %s6527_s20 = scalar_lea.vmem (!%p3818_p1), [#allocation4], %s5292_s26  ;;  %s6535_s26 = scalar_lea.vmem (!%p3818_p1), [#allocation3], %s3819_s27 }
 0x798   : > { %4740 = vrcp.f32 (!%p3818_p1), %v3166_v41  ;;  %v3177_v33 = vld [vmem:[%s6507_s25 + $0x58] sm:$0xff] (!%p3818_p1)  ;;  %v4723_v55 = vld [vmem:[#allocation16] sm:$0xff] (!%p3818_p1)   ;;  %v4725_v16 = vld [vmem:[#allocation16 + $0x8] sm:$0xff] (!%p3818_p1)  }
 0x799   : > { %4742 = vrcp.f32 (!%p3818_p1), %v3175_v35  ;;  %4028 = vmatpush3.bf16.msra.mxu0 (!%p3818_p1), %v4723_v55  ;;  %4291 = vmatpush3.bf16.msra.mxu1 (!%p3818_p1), %v4723_v55  ;;  %v3176_v28 = vld [vmem:[%s6507_s25 + $0x50] sm:$0xff] (!%p3818_p1)  ;;  %v3171_v23 = vld [vmem:[%s6507_s25 + $0x28] sm:$0xff] (!%p3818_p1)  ;;  %v3170_v9 = vld [vmem:[%s6507_s25 + $0x20] sm:$0xff] (!%p3818_p1) }
 0x79a   : > { %4744 = vrcp.f32 (!%p3818_p1), %v3167_v19  ;;  %4029 = vmatprep.subr.bf16.mxu0 (!%p3818_p1), %v4724_v46  ;;  %4284 = vmatprep.subr.bf16.mxu1 (!%p3818_p1), %v4724_v46  ;;  %v4727_v57 = vld [vmem:[#allocation16 + $0x10] sm:$0xff] (!%p3818_p1)   ;;  %v4728_v10 = vld [vmem:[#allocation16 + $0x58] sm:$0xff] (!%p3818_p1)   ;;  %v3179_v17 = vld [vmem:[%s6507_s25 + $0x68] sm:$0xff] (!%p3818_p1) }
 0x79b   : > { %4746 = vrcp.f32 (!%p3818_p1), %v3169_v48  ;;  %v4729_v49 = vld [vmem:[#allocation16 + $0x18] sm:$0xff] (!%p3818_p1)   ;;  %v3178_v20 = vld [vmem:[%s6507_s25 + $0x60] sm:$0xff] (!%p3818_p1)  ;;  %v3172_v25 = vld [vmem:[%s6507_s25 + $0x30] sm:$0xff] (!%p3818_p1) }
 0x79c   : > { %4748 = vrcp.f32 (!%p3818_p1), %v3168_v60  ;;  %v4730_v29 = vld [vmem:[#allocation16 + $0x60] sm:$0xff] (!%p3818_p1)   ;;  %v3173_v24 = vld [vmem:[%s6507_s25 + $0x38] sm:$0xff] (!%p3818_p1)  ;;  %v4732_v42 = vld [vmem:[#allocation16 + $0x68] sm:$0xff] (!%p3818_p1)  }
 0x79d   : > { %4750 = vrcp.f32 %v3177_v33  ;;  %4030 = vmatpush3.bf16.msra.mxu0 %v4725_v16  ;;  %4292 = vmatpush3.bf16.msra.mxu1 %v4725_v16  ;;  %v4731_v61 = vld [vmem:[#allocation16 + $0x20] sm:$0xff]   ;;  %v3181_v44 = vld [vmem:[%s6507_s25 + $0x78] sm:$0xff]  ;;  %v4733_v56 = vld [vmem:[#allocation16 + $0x28] sm:$0xff]  }
 0x79e   : > { %4752 = vrcp.f32 %v3176_v28  ;;  %4031 = vmatprep.subr.bf16.mxu0 %v4726_v14  ;;  %4285 = vmatprep.subr.bf16.mxu1 %v4726_v14  ;;  %v3180_v26 = vld [vmem:[%s6507_s25 + $0x70] sm:$0xff]  ;;  %v4736_v53 = vld [vmem:[#allocation16 + $0x78] sm:$0xff]   ;;  %v3157_v15 = vld [vmem:[%s6527_s20 + $0x40] sm:$0xff] }
 0x79f   : > { %4754 = vrcp.f32 %v3171_v23  ;;  %v4734_v39 = vld [vmem:[#allocation16 + $0x70] sm:$0xff]   ;;  %v4737_v11 = vld [vmem:[#allocation16 + $0x38] sm:$0xff]   ;;  %v3158_v31 = vld [vmem:[%s6527_s20 + $0x48] sm:$0xff] }
 0x7a0   : > { %4756 = vrcp.f32 %v3170_v9  ;;  %v4735_v50 = vld [vmem:[#allocation16 + $0x30] sm:$0xff]   ;;  %v3149_v58 = vld [vmem:[%s6527_s20] sm:$0xff]  ;;  %v3150_v34 = vld [vmem:[%s6527_s20 + $0x8] sm:$0xff] }
 0x7a1   : > { %v4739_v4 = vpop.eup %4738  ;;  %4032 = vmatpush3.bf16.msra.mxu0 %v4727_v57  ;;  %4293 = vmatpush3.bf16.msra.mxu1 %v4727_v57  ;;  %4758 = vrcp.f32 %v3179_v17  ;;  %v3152_v52 = vld [vmem:[%s6527_s20 + $0x18] sm:$0xff]  ;;  %v3151_v40 = vld [vmem:[%s6527_s20 + $0x10] sm:$0xff]  ;;  %v3302_v62 = vld [vmem:[%s6535_s26 + $0x20] sm:$0xff] }
 0x7a2   : > { %v4741_v32 = vpop.eup %4740  ;;  %3240 = vperm.xlu1 %4721, %v4739_v4   ;;  %4033 = vmatprep.subr.bf16.mxu0 %v4728_v10  ;;  %4760 = vrcp.f32 %v3178_v20  ;;  %v3298_v35 = vld [vmem:[%s6535_s26] sm:$0xff]  ;;  %v3160_v51 = vld [vmem:[%s6527_s20 + $0x58] sm:$0xff]  ;;  %v3159_v33 = vld [vmem:[%s6527_s20 + $0x50] sm:$0xff] }
 0x7a3   : > { %v4743_v63 = vpop.eup %4742  ;;  %3200 = vperm.xlu0 %4720, %v4741_v32   ;;  %4286 = vmatprep.subr.bf16.mxu1 %v4728_v10  ;;  %4762 = vrcp.f32 %v3173_v24  ;;  %v3154_v4 = vld [vmem:[%s6527_s20 + $0x28] sm:$0xff]  ;;  %v3153_v23 = vld [vmem:[%s6527_s20 + $0x20] sm:$0xff] }
 0x7a4   : > { %v4745_v21 = vpop.eup %4744  ;;  %4764 = vrcp.f32 %v3172_v25  ;;  %v3303_v9 = vld [vmem:[%s6535_s26 + $0x28] sm:$0xff]  ;;  %v3155_v25 = vld [vmem:[%s6527_s20 + $0x30] sm:$0xff] }
 0x7a5   : > { %v4747_v5 = vpop.eup %4746  ;;  %4034 = vmatpush3.bf16.msra.mxu0 %v4729_v49  ;;  %4294 = vmatpush3.bf16.msra.mxu1 %v4729_v49  ;;  %4766 = vrcp.f32 %v3181_v44  ;;  %v3162_v49 = vld [vmem:[%s6527_s20 + $0x68] sm:$0xff]  ;;  %v3300_v44 = vld [vmem:[%s6535_s26 + $0x10] sm:$0xff] }
 0x7a6   : > { %3245 = vperm.xlu1 %4721, %v4743_v63   ;;  %v4749_v1 = vpop.eup %4748  ;;  %4035 = vmatprep.subr.bf16.mxu0 %v4730_v29  ;;  %4768 = vrcp.f32 %v3180_v26  ;;  %v3299_v63 = vld [vmem:[%s6535_s26 + $0x8] sm:$0xff] }
 0x7a7   : > { %3205 = vperm.xlu0 %4720, %v4745_v21   ;;  %v4751_v7 = vpop.eup %4750  ;;  %4287 = vmatprep.subr.bf16.mxu1 %v4730_v29 }
 0x7a8   : > { %v4753_v59 = vpop.eup %4752 }
 0x7a9   : > { %4036 = vmatpush3.bf16.msra.mxu0 %v4731_v61  ;;  %v4755_v3 = vpop.eup %4754  ;;  %4295 = vmatpush3.bf16.msra.mxu1 %v4731_v61 }
 0x7aa   : > { %3215 = vperm.xlu1 %4721, %v4747_v5   ;;  %v4757_v13 = vpop.eup %4756  ;;  %4037 = vmatprep.subr.bf16.mxu0 %v4732_v42  ;;  %v3161_v5 = vld [vmem:[%s6527_s20 + $0x60] sm:$0xff] }
 0x7ab   : > { %3210 = vperm.xlu0 %4720, %v4749_v1   ;;  %4288 = vmatprep.subr.bf16.mxu1 %v4732_v42  ;;  %v4759_v30 = vpop.eup %4758 }
 0x7ac   : > { %v4761_v36 = vpop.eup %4760 }
 0x7ad   : > { %4038 = vmatpush3.bf16.msra.mxu0 %v4733_v56  ;;  %4296 = vmatpush3.bf16.msra.mxu1 %v4733_v56  ;;  %v4763_v54 = vpop.eup %4762  ;;  %v3304_v56 = vld [vmem:[%s6535_s26 + $0x30] sm:$0xff] }
 0x7ae   : > { %3255 = vperm.xlu1 %4721, %v4751_v7   ;;  %4039 = vmatprep.subr.bf16.mxu0 %v4734_v39  ;;  %v4765_v37 = vpop.eup %4764  ;;  %v3156_v7 = vld [vmem:[%s6527_s20 + $0x38] sm:$0xff] }
 0x7af   : > { %3250 = vperm.xlu0 %4720, %v4753_v59   ;;  %4289 = vmatprep.subr.bf16.mxu1 %v4734_v39  ;;  %v4767_v27 = vpop.eup %4766  ;;  %v3164_v39 = vld [vmem:[%s6527_s20 + $0x78] sm:$0xff] }
 0x7b0   : > { %v4769_v2 = vpop.eup %4768 }
 0x7b1   : > { %4040 = vmatpush3.bf16.msra.mxu0 %v4735_v50  ;;  %4297 = vmatpush3.bf16.msra.mxu1 %v4735_v50  ;;  %v3163_v50 = vld [vmem:[%s6527_s20 + $0x70] sm:$0xff] }
 0x7b2   : > { %3225 = vperm.xlu1 %4721, %v4755_v3   ;;  %4041 = vmatprep.subr.bf16.mxu0 %v4736_v53 }
 0x7b3   : > { %3220 = vperm.xlu0 %4720, %v4757_v13   ;;  %4290 = vmatprep.subr.bf16.mxu1 %v4736_v53 }
 0x7b5   : > { %4042 = vmatpush3.bf16.msra.mxu0 %v4737_v11  ;;  %4298 = vmatpush3.bf16.msra.mxu1 %v4737_v11 }
 0x7b6   : > { %3265 = vperm.xlu1 %4721, %v4759_v30  }
 0x7b7   : > { %3260 = vperm.xlu0 %4720, %v4761_v36  }
 0x7ba   : > { %3235 = vperm.xlu1 %4721, %v4763_v54  }
 0x7bb   : > { %3230 = vperm.xlu0 %4720, %v4765_v37  }
 0x7be   : > { %3275 = vperm.xlu1 %4721, %v4767_v27   ;;  %v3301_v27 = vld [vmem:[%s6535_s26 + $0x18] sm:$0xff] }
 0x7bf   : > { %3270 = vperm.xlu0 %4720, %v4769_v2   ;;  %v3305_v2 = vld [vmem:[%s6535_s26 + $0x38] sm:$0xff] }
 0x821   : > { %v3241_v8 = vpop.permute.xlu1 %3240 }
 0x822   : > { %v3201_v12 = vpop.permute.xlu0 %3200  ;;  %v3286_v43 = vmul.f32 %v3241_v8, %v3157_v15  ;;  %v6558_v15 = vld [vmem:[%s6663_s7] ss:$0 sm:$0xff] }
 0x823   : > { %v3278_v6 = vmul.f32 %v3201_v12, %v3149_v58 }
 0x825   : > { %v3246_v45 = vpop.permute.xlu1 %3245 }
 0x826   : > { %v3287_v47 = vmul.f32 %v3246_v45, %v3158_v31  ;;  %v3206_v0 = vpop.permute.xlu0 %3205 }
 0x827   : > { %v3279_v38 = vmul.f32 %v3206_v0, %v3150_v34 }
 0x828   : > { %v3318_v18 = vpack.c.bf16 %v3287_v47, %v3286_v43 }
 0x829   : > { %v3216_v22 = vpop.permute.xlu1 %3215  ;;  %v3314_v41 = vpack.c.bf16 %v3279_v38, %v3278_v6 }
 0x82a   : > { %v3281_v19 = vmul.f32 %v3216_v22, %v3152_v52  ;;  %v3211_v48 = vpop.permute.xlu0 %3210  ;;  %3545 = vmatprep.mubr.bf16.mxu1 %v3318_v18 }
 0x82b   : > { %v3280_v60 = vmul.f32 %v3211_v48, %v3151_v40  ;;  %3513 = vmatprep.mubr.bf16.mxu0 %v3314_v41  ;;  %3546 = vmatmul.mubr.bf16.vlgmr.msra.gmra.mrb[0].mxu1 %v3302_v62 }
 0x82c   : > { %3514 = vmatmul.mubr.bf16.vlgmr.msra.gmra.mrb[0].mxu0 %v3298_v35 }
 0x82d   : > { %v3315_v55 = vpack.c.bf16 %v3281_v19, %v3280_v60  ;;  %v3256_v46 = vpop.permute.xlu1 %3255 }
 0x82e   : > { %v3289_v16 = vmul.f32 %v3256_v46, %v3160_v51  ;;  %v3251_v28 = vpop.permute.xlu0 %3250 }
 0x82f   : > { %v3288_v14 = vmul.f32 %v3251_v28, %v3159_v33  ;;  %3521 = vmatprep.mubr.bf16.mxu0 %v3315_v55 }
 0x831   : > { %v3319_v32 = vpack.c.bf16 %v3289_v16, %v3288_v14  ;;  %v3226_v57 = vpop.permute.xlu1 %3225 }
 0x832   : > { %v3283_v21 = vmul.f32 %v3226_v57, %v3154_v4  ;;  %v3221_v10 = vpop.permute.xlu0 %3220 }
 0x833   : > { %v3282_v17 = vmul.f32 %v3221_v10, %v3153_v23  ;;  %3553 = vmatprep.mubr.bf16.mxu1 %v3319_v32 }
 0x834   : > { %3522 = vmatmul.mubr.bf16.gmra.mrb[4].mxu0 %v3299_v63  ;;  %3554 = vmatmul.mubr.bf16.gmra.mrb[4].mxu1 %v3303_v9 }
 0x835   : > { %v3316_v20 = vpack.c.bf16 %v3283_v21, %v3282_v17  ;;  %v3266_v1 = vpop.permute.xlu1 %3265 }
 0x836   : > { %v3291_v29 = vmul.f32 %v3266_v1, %v3162_v49  ;;  %v3261_v24 = vpop.permute.xlu0 %3260 }
 0x837   : > { %v3290_v61 = vmul.f32 %v3261_v24, %v3161_v5  ;;  %3529 = vmatprep.mubr.bf16.mxu0 %v3316_v20 }
 0x839   : > { %v3320_v59 = vpack.c.bf16 %v3291_v29, %v3290_v61  ;;  %v3236_v42 = vpop.permute.xlu1 %3235 }
 0x83a   : > { %v3285_v3 = vmul.f32 %v3236_v42, %v3156_v7  ;;  %v3231_v26 = vpop.permute.xlu0 %3230 }
 0x83b   : > { %v3284_v13 = vmul.f32 %v3231_v26, %v3155_v25  ;;  %3561 = vmatprep.mubr.bf16.mxu1 %v3320_v59 }
 0x83c   : > { %3530 = vmatmul.mubr.bf16.gmra.mrb[8].mxu0 %v3300_v44  ;;  %3562 = vmatmul.mubr.bf16.gmra.mrb[8].mxu1 %v3304_v56 }
 0x83d   : > { %v3317_v30 = vpack.c.bf16 %v3285_v3, %v3284_v13  ;;  %v3276_v36 = vpop.permute.xlu1 %3275 }
 0x83e   : > { %v3293_v53 = vmul.f32 %v3276_v36, %v3164_v39  ;;  %v3271_v11 = vpop.permute.xlu0 %3270 }
 0x83f   : > { %v3292_v54 = vmul.f32 %v3271_v11, %v3163_v50  ;;  %3537 = vmatprep.mubr.bf16.mxu0 %v3317_v30 }
 0x841   : > { %v3321_v37 = vpack.c.bf16 %v3293_v53, %v3292_v54 }
 0x843   : > { %3569 = vmatprep.mubr.bf16.mxu1 %v3321_v37 }
 0x844   : > { %3538 = vmatmul.mubr.bf16.gmra.mrb[12].mxu0 %v3301_v27  ;;  %3570 = vmatmul.mubr.bf16.gmra.mrb[12].mxu1 %v3305_v2 }
 0x8fe   : > { %v4067_v8 = vpop.f32.mrb[0].mxu1 }
 0x8ff   : > { %v4043_v12 = vpop.f32.mrb[0].mxu0  ;;  %v4068_v31 = vpop.f32.mrb[1].mxu1 }
 0x900   : > { %v4044_v58 = vpop.f32.mrb[1].mxu0  ;;  %v4069_v34 = vadd.f32 %v4068_v31, %v4067_v8  ;;  %v4070_v45 = vpop.f32.mrb[2].mxu1 }
 0x901   : > { %v4045_v43 = vadd.f32 %v4044_v58, %v4043_v12  ;;  %v4046_v47 = vpop.f32.mrb[2].mxu0  ;;  %v4071_v0 = vpop.f32.mrb[3].mxu1 }
 0x902   : > { %v3548_v6 = vadd.f32 %v4069_v34, %v6558_v15  ;;  %v4047_v38 = vpop.f32.mrb[3].mxu0  ;;  %v4072_v52 = vadd.f32 %v4071_v0, %v4070_v45 }
 0x903   : > { %v3516_v40 = vadd.f32 %v4045_v43, %v6558_v15  ;;  %v4048_v18 = vadd.f32 %v4047_v38, %v4046_v47 }
 0x904   : > { %3586 = vst [vmem:[%s5298_s11 + $0x40] sm:$0xff] %v3548_v6  ;;  %v3551_v62 = vadd.f32 %v4072_v52, %v6558_v15 }
 0x905   : > { %3578 = vst [vmem:[%s5298_s11] sm:$0xff] %v3516_v40  ;;  %v3519_v22 = vadd.f32 %v4048_v18, %v6558_v15 }
 0x906   : > { %3587 = vst [vmem:[%s5298_s11 + $0x48] sm:$0xff] %v3551_v62 }
 0x907   : > { %3579 = vst [vmem:[%s5298_s11 + $0x8] sm:$0xff] %v3519_v22  ;;  %v4049_v41 = vpop.f32.mrb[4].mxu0  ;;  %v4073_v35 = vpop.f32.mrb[4].mxu1 }
 0x908   : > { %v4050_v19 = vpop.f32.mrb[5].mxu0  ;;  %v4074_v48 = vpop.f32.mrb[5].mxu1 }
 0x909   : > { %v4051_v60 = vadd.f32 %v4050_v19, %v4049_v41  ;;  %v4075_v51 = vadd.f32 %v4074_v48, %v4073_v35  ;;  %v4052_v33 = vpop.f32.mrb[6].mxu0  ;;  %v4076_v55 = vpop.f32.mrb[6].mxu1 }
 0x90a   : > { %v4053_v46 = vpop.f32.mrb[7].mxu0  ;;  %v4077_v16 = vpop.f32.mrb[7].mxu1 }
 0x90b   : > { %v3524_v28 = vadd.f32 %v4051_v60, %v6558_v15  ;;  %v3556_v14 = vadd.f32 %v4075_v51, %v6558_v15  ;;  %v4054_v4 = vadd.f32 %v4053_v46, %v4052_v33  ;;  %v4078_v23 = vadd.f32 %v4077_v16, %v4076_v55 }
 0x90d   : > { %3580 = vst [vmem:[%s5298_s11 + $0x10] sm:$0xff] %v3524_v28  ;;  %3588 = vst [vmem:[%s5298_s11 + $0x50] sm:$0xff] %v3556_v14  ;;  %v3527_v32 = vadd.f32 %v4054_v4, %v6558_v15  ;;  %v3559_v57 = vadd.f32 %v4078_v23, %v6558_v15 }
 0x90f   : > { %3581 = vst [vmem:[%s5298_s11 + $0x18] sm:$0xff] %v3527_v32  ;;  %3589 = vst [vmem:[%s5298_s11 + $0x58] sm:$0xff] %v3559_v57  ;;  %v4055_v63 = vpop.f32.mrb[8].mxu0  ;;  %v4079_v9 = vpop.f32.mrb[8].mxu1 }
 0x910   : > { %v4056_v21 = vpop.f32.mrb[9].mxu0  ;;  %v4080_v10 = vpop.f32.mrb[9].mxu1 }
 0x911   : > { %v4057_v17 = vadd.f32 %v4056_v21, %v4055_v63  ;;  %v4081_v49 = vadd.f32 %v4080_v10, %v4079_v9  ;;  %v4058_v5 = vpop.f32.mrb[10].mxu0  ;;  %v4082_v20 = vpop.f32.mrb[10].mxu1 }
 0x912   : > { %v4059_v1 = vpop.f32.mrb[11].mxu0  ;;  %v4083_v29 = vpop.f32.mrb[11].mxu1 }
 0x913   : > { %v3532_v24 = vadd.f32 %v4057_v17, %v6558_v15  ;;  %v3564_v61 = vadd.f32 %v4081_v49, %v6558_v15  ;;  %v4060_v7 = vadd.f32 %v4059_v1, %v4058_v5  ;;  %v4084_v25 = vadd.f32 %v4083_v29, %v4082_v20 }
 0x915   : > { %3582 = vst [vmem:[%s5298_s11 + $0x20] sm:$0xff] %v3532_v24  ;;  %3590 = vst [vmem:[%s5298_s11 + $0x60] sm:$0xff] %v3564_v61  ;;  %v3535_v59 = vadd.f32 %v4060_v7, %v6558_v15  ;;  %v3567_v42 = vadd.f32 %v4084_v25, %v6558_v15 }
 0x917   : > { %3583 = vst [vmem:[%s5298_s11 + $0x28] sm:$0xff] %v3535_v59  ;;  %3591 = vst [vmem:[%s5298_s11 + $0x68] sm:$0xff] %v3567_v42  ;;  %v4061_v44 = vpop.f32.mrb[12].mxu0  ;;  %v4085_v56 = vpop.f32.mrb[12].mxu1 }
 0x918   : > { %v4062_v3 = vpop.f32.mrb[13].mxu0  ;;  %v4086_v26 = vpop.f32.mrb[13].mxu1 }
 0x919   : > { %v4063_v13 = vadd.f32 %v4062_v3, %v4061_v44  ;;  %v4087_v39 = vadd.f32 %v4086_v26, %v4085_v56  ;;  %v4064_v50 = vpop.f32.mrb[14].mxu0  ;;  %v4088_v30 = vpop.f32.mrb[14].mxu1 }
 0x91a   : > { %v4065_v36 = vpop.f32.mrb[15].mxu0  ;;  %v4089_v53 = vpop.f32.mrb[15].mxu1 }
 0x91b   : > { %v3540_v11 = vadd.f32 %v4063_v13, %v6558_v15  ;;  %v3572_v54 = vadd.f32 %v4087_v39, %v6558_v15  ;;  %v4066_v37 = vadd.f32 %v4065_v36, %v4064_v50  ;;  %v4090_v27 = vadd.f32 %v4089_v53, %v4088_v30 }
 0x91d   : > { %3584 = vst [vmem:[%s5298_s11 + $0x30] sm:$0xff] %v3540_v11  ;;  %3592 = vst [vmem:[%s5298_s11 + $0x70] sm:$0xff] %v3572_v54  ;;  %v3543_v2 = vadd.f32 %v4066_v37, %v6558_v15  ;;  %v3575_v8 = vadd.f32 %v4090_v27, %v6558_v15 }
 0x91f   : > { %3585 = vst [vmem:[%s5298_s11 + $0x38] sm:$0xff] %v3543_v2  ;;  %3593 = vst [vmem:[%s5298_s11 + $0x78] sm:$0xff] %v3575_v8 }
 0x920 PF: > { %s3602_s13 = smul.u32 %s5000_s30, %s5004_s9  ;;  %s3609_s15 = sshll.u32 %s5298_s11, 4  ;;  %s6595_s15 = int_to_ptr.vmem [resolvable:$true] %s3609_s15 }
 0x921   : > { %s6604_s17 = scalar_lea.sflag [#allocation10], %s368_s22  ;;  %s4910_s24 = scalar_lea.vmem %s6595_s15, 2048 }
 0x922   : > { %s3842_s1 = sshll.u32 %s3602_s13, 11  ;;  %p4911_p3 = scmp.ne.s32.totalorder %s6595_s15, %s4910_s24 }
 0x923   : > { %s6600_s16 = scalar_lea.hbm %s6664_s8, %s3842_s1  ;;  %p6842_p4 = scmp.ne.s32.totalorder %s6724_s19, 0 }
 0x924   : > { %s5030_s30 = smov [#allocation17]  }
 0x925   : > { %p4912_p5 = pnand %p4911_p3, %p6842_p4  ;;  %s4914_s9 = sshll.u32 %s5030_s30, 4  ;;  %s4915_s9 = int_to_ptr.vmem [resolvable:$false] %s4914_s9 }
 0x926   : > { %s4916_s11 = scalar_lea.vmem %s4915_s9, 4096  ;;  %p4917_p9 = scmp.lt.s32.totalorder %s6595_s15, %s4915_s9 }
 0x927   : > { %p4913_p7 = pneg %p4912_p5  ;;  %p4918_p12 = scmp.lt.s32.totalorder %s4916_s11, %s4910_s24 }
 0x929   : > { %p4919_p13 = por %p4918_p12, %p4917_p9 }
 0x92b   : > { %p4920_p6 = pnand %p4919_p13, %p4913_p7 }
 0x92d   : > { %4923 = shalt.err (!%p4920_p6)
}
 0x92e   : > { %s4924_s22 = scalar_lea.hbm %s6600_s16, 2048  ;;  %s4928_s25 = scalar_lea.hbm %s6664_s8, 4096 }
 0x92f   : > { %p4925_p2 = scmp.ne.s32.totalorder %s6600_s16, %s4924_s22  ;;  %p4929_p10 = scmp.lt.u32.totalorder %s6600_s16, %s6664_s8 }
 0x930   : > { %p4930_p11 = scmp.lt.u32.totalorder %s4928_s25, %s4924_s22  ;;  %p4932_p3 = scmp.lt.u32.totalorder %s4924_s22, %s6600_s16 }
 0x931   : > { %p4926_p0 = pnand %p4925_p2, %p6842_p4 }
 0x932   : > { %p4931_p1 = por %p4930_p11, %p4929_p10 }
 0x933   : > { %p4927_p8 = pneg %p4926_p0 }
 0x934   : > { %p4933_p5 = por %p4932_p3, %p4931_p1 }
 0x936   : > { %p4934_p7 = pnand %p4933_p5, %p4927_p8 }
 0x938   : > { %4937 = shalt.err (!%p4934_p7)
}
 0x939   : > { %s5031_s20 = smov 128   ;;  %s5032_s26 = smov 8  }
 0x93a   : > { %4319 = dma.vmem_to_hbm [thread:$0]  (%p6842_p4), %s6595_s15, 2048, %s6600_s16, %s6604_s17, %s5031_s20, %s5031_s20, %s5032_s26  }
 0x93b PF: > { %s6843_s18 = sld [smem:[#allocation26_spill]]  ;;  %s6844_s23 = sld [smem:[#allocation22_spill]] }
 0x93c   : > { %s6845_s13 = sld [smem:[#allocation29_spill]] }
 0x941   : > { %p4351_p9 = scmp.ge.s32.totalorder %s6843_s18, 2  ;;  %s3624_s1 = sand.u32 1, %s6844_s23  }
 0x942   : > { %p6846_p12 = scmp.ne.s32.totalorder %s6845_s13, 0  ;;  %s3625_s12 = scalar_lea.sflag [#allocation10], %s3624_s1 }
 0x944   : > { %p4338_p13 = pnand %p4351_p9, %p6846_p12 }
 0x946   : > { %4983 = dma.done.wait (!%p4338_p13), %s3625_s12, 2048  }
 0x947   : > { %4985 = vsyncadd (!%p4338_p13), %s3625_s12, 4294965248  ;;  %s24_s12 = sadd.s32 1, %s6843_s18   ;;  %s6847_s29 = sld [smem:[#allocation23_spill]] }
 0x948   : > { %p21_p6 = scmp.ge.s32.totalorder %s24_s12, 6   ;;  %s6848_s24 = sld [smem:[#allocation30_spill]] }
 0x949   : > { %s6849_s30 = sld [smem:[#allocation24_spill]]  ;;  %s6850_s9 = sld [smem:[#allocation25_spill]] }
 0x94a   : > { %s6851_s10 = sld [smem:[#allocation27_spill]]  ;;  %s6852_s11 = sld [smem:[#allocation28_spill]] }
 0x94b   : > { %s6853_s27 = smov %s4992_s28  ;;  %23 = sbr.rel (!%p21_p6) target bundleno = 10 (0xa), region = 123 }
 0x94d   : > { %s6854_s28 = smov %s6847_s29 }
 0x94e   : > { %s6855_s29 = smov %s6848_s24 }
 0x952   :  { %3630 = vsyncpa [#allocation9], 1 }
 0x953   :  { %3632 = vsyncpa [#allocation9 + $0x1], 1 }
 0x954   :  { %3633 = vsyncpa [#allocation12], 1 }
 0x955   :  { %3634 = vsyncpa [#allocation15], 1 }
 0x956   :  { %3635 = vsyncpa [#allocation10], 1 }
 0x957   :  { %3637 = vsyncpa [#allocation10 + $0x1], 1 }

</bundles_post_ra>
